<compile_context>
chip_gen: v6e
topology: v6e:2x2x1
jax: 0.10.0
libtpu: 0.0.40
codegen_flags: <defaults>
</compile_context>

<pallas_src>
import jax
import jax.numpy as jnp
from jax import lax
from jax.experimental import pallas as pl
from jax.experimental.pallas import tpu as pltpu

# ---------------- config (GraniteMoeHybridConfig, small synthetic) ----------------
HIDDEN = 64                                        # config.hidden_size
MAMBA_EXPAND = 2                                   # config.mamba_expand
INTERMEDIATE = MAMBA_EXPAND * HIDDEN               # 128 (mamba intermediate_size)
D_STATE = 16                                       # config.mamba_d_state
D_CONV = 4                                         # config.mamba_d_conv
N_GROUPS = 1                                       # config.mamba_n_groups
N_HEADS = 4                                        # config.mamba_n_heads
HEAD_DIM = INTERMEDIATE // N_HEADS                 # 32 == config.mamba_d_head
CONV_DIM = INTERMEDIATE + 2 * N_GROUPS * D_STATE   # 160
NUM_EXPERTS = 4                                    # config.num_local_experts
TOP_K = 2                                          # config.num_experts_per_tok
MOE_INTERMEDIATE = 64                              # config.intermediate_size
SHARED_INTERMEDIATE = 64                           # config.shared_intermediate_size
RMS_EPS = 1e-6                                     # config.rms_norm_eps
RESIDUAL_MULT = 0.5                                # config.residual_multiplier
SEQ_LEN = 8                                        # tokens in the example (single sequence)

DS2 = 2 * N_GROUPS * D_STATE                       # 32  (width of [B | C])
BC_GROUP = N_GROUPS * D_STATE                      # 16
GU_WIDTH = NUM_EXPERTS * MOE_INTERMEDIATE + SHARED_INTERMEDIATE   # 320
UP_WIDTH = 2 * GU_WIDTH + NUM_EXPERTS              # 644

# rows of the packed small-vector operand (one DMA instead of ~8 tiny ones)
ROW_LN1 = 0          # input_layernorm weight        (first HIDDEN lanes)
ROW_LN2 = 1          # post_attention_layernorm w    (first HIDDEN lanes)
ROW_MIX_NORM = 2     # Mixer2RMSNormGated weight     (128)
ROW_CONV_B = 3       # conv bias, x channels         (128)
ROW_A = 4            # -exp(A_log), head-expanded    (128)
ROW_DT_BIAS = 5      # dt_bias, head-expanded        (128)
ROW_D = 6            # D, head-expanded              (128)
ROW_CONV_W0 = 7      # conv taps 0..3, x channels    (4 x 128)
VEC_ROWS = 16        # padded to a sublane-aligned row count


# ---------------- elementwise helpers (kept in f32, EUP-friendly) ----------------

def _silu(x):
    # x * sigmoid(x) without relying on lax.logistic lowering
    return x / (1.0 + jnp.exp(-x))


def _softplus(x):
    # numerically stable softplus using only exp/log
    return jnp.maximum(x, 0.0) + jnp.log(1.0 + jnp.exp(-jnp.abs(x)))


# ================================ fused Pallas kernel ================================

def _granite_layer_kernel(x2_ref, vecs_ref, bcp_ref, w_in_ref, w_bct_ref,
                          w_out_ref, w_up_ref, w_down_ref, o_ref):
    """Fused decoder layer: RMSNorm -> in_proj -> causal conv + SiLU -> SSM scan ->
    gated RMSNorm -> out_proj -> residual -> RMSNorm -> (MoE + shared MLP) -> residual.
    Single invocation, no grid; everything VMEM-resident at this problem size."""
    t_len = x2_ref.shape[0]

    x2 = x2_ref[...]                                  # (T, 2H) f32, lane-dense [x | x]
    x = x2[:, :HIDDEN]                                # (T, H)  original residual

    # ---- input RMSNorm ----
    var1 = jnp.mean(x * x, axis=-1, keepdims=True)
    xn = x * lax.rsqrt(var1 + RMS_EPS) * vecs_ref[ROW_LN1:ROW_LN1 + 1, :HIDDEN]
    xn_b = xn.astype(jnp.bfloat16)

    # ---- in_proj (bf16 MXU, f32 acc): [gate 128 | x_conv 128 | dt 128 (head-expanded)] ----
    proj = jnp.dot(xn_b, w_in_ref[...], preferred_element_type=jnp.float32)   # (T, 384)
    gate = proj[:, :INTERMEDIATE]
    xc_pre = proj[:, INTERMEDIATE:2 * INTERMEDIATE]
    dt_pre = proj[:, 2 * INTERMEDIATE:]

    # ---- B/C columns of in_proj computed directly in (channel, time) orientation ----
    # NT dot_general: (32, H) x (T, H) contracted on H -> (32, T).  No in-kernel transpose.
    bc_pre_t = lax.dot_general(w_bct_ref[...], xn_b, (((1,), (1,)), ((), ())),
                               preferred_element_type=jnp.float32)            # (32, T)

    # ---- depthwise causal conv1d + SiLU on the 128 x-channels (roll + mask, no scratch) ----
    rows = lax.broadcasted_iota(jnp.int32, (t_len, INTERMEDIATE), 0)
    acc = (vecs_ref[ROW_CONV_B:ROW_CONV_B + 1, :]
           + xc_pre * vecs_ref[ROW_CONV_W0 + D_CONV - 1:ROW_CONV_W0 + D_CONV, :])  # tap k=3
    for k in range(D_CONV - 1):                        # taps k = 0,1,2 -> shifts 3,2,1
        shift = D_CONV - 1 - k
        tap = jnp.where(rows >= shift, pltpu.roll(xc_pre, shift, axis=0), 0.0)
        acc = acc + tap * vecs_ref[ROW_CONV_W0 + k:ROW_CONV_W0 + k + 1, :]
    x_conv = _silu(acc)                                # (T, 128)

    # ---- dt / decay / scan input (lane-dense, heads packed on the 128 lanes) ----
    dt = _softplus(dt_pre + vecs_ref[ROW_DT_BIAS:ROW_DT_BIAS + 1, :])
    dA = jnp.exp(dt * vecs_ref[ROW_A:ROW_A + 1, :])
    dtx = dt * x_conv

    # per-step causal conv + SiLU for the 32 B/C channels, already in (32,1) column form
    def _bc_col(t):
        col = bcp_ref[:, D_CONV:D_CONV + 1]            # conv bias column (32, 1)
        for j in range(D_CONV):
            s = t - (D_CONV - 1) + j
            if s >= 0:
                col = col + bcp_ref[:, j:j + 1] * bc_pre_t[:, s:s + 1]
        return _silu(col)

    # ---- selective SSM scan, pure VPU/XLU; state (d_state=16, intermediate=128) ----
    state = jnp.zeros((D_STATE, INTERMEDIATE), jnp.float32)
    y = jnp.zeros((t_len, INTERMEDIATE), jnp.float32)
    for t in range(t_len):                             # static unroll, T small
        bc_col = _bc_col(t)
        state = state * dA[t:t + 1, :] + bc_col[:BC_GROUP, :] * dtx[t:t + 1, :]
        y_t = jnp.sum(state * bc_col[BC_GROUP:, :], axis=0, keepdims=True)
        y = jnp.where(rows == t, y_t, y)               # register accumulate, no row stores
    y = y + vecs_ref[ROW_D:ROW_D + 1, :] * x_conv

    # ---- Mixer2RMSNormGated + out_proj (duplicated to 128 lanes) + residual ----
    yg = y * _silu(gate)
    varg = jnp.mean(yg * yg, axis=-1, keepdims=True)
    yn = yg * lax.rsqrt(varg + RMS_EPS) * vecs_ref[ROW_MIX_NORM:ROW_MIX_NORM + 1, :]
    out_m2 = jnp.dot(yn.astype(jnp.bfloat16), w_out_ref[...],
                     preferred_element_type=jnp.float32)              # (T, 2H) = [o | o]
    h1_2 = x2 + out_m2 * RESIDUAL_MULT                                # (T, 2H) = [h1 | h1]
    h1 = h1_2[:, :HIDDEN]

    # ---- post-attention RMSNorm ----
    var2 = jnp.mean(h1 * h1, axis=-1, keepdims=True)
    hn = h1 * lax.rsqrt(var2 + RMS_EPS) * vecs_ref[ROW_LN2:ROW_LN2 + 1, :HIDDEN]
    hn_b = hn.astype(jnp.bfloat16)

    # ---- ONE wide up matmul: [g_e0..3 g_sh (320) | u_e0..3 u_sh (320) | router (4)] ----
    up = jnp.dot(hn_b, w_up_ref[...], preferred_element_type=jnp.float32)   # (T, 644)
    g_all = up[:, :GU_WIDTH]
    u_all = up[:, GU_WIDTH:2 * GU_WIDTH]
    logits = up[:, 2 * GU_WIDTH:]                                           # (T, E)

    # ---- top-k gating: topk on logits, softmax over the selected k (HF order) ----
    lane_e = lax.broadcasted_iota(jnp.int32, (t_len, NUM_EXPERTS), 1).astype(jnp.float32)
    m_top = jnp.max(logits, axis=-1, keepdims=True)
    remaining = logits
    rw = jnp.zeros((t_len, NUM_EXPERTS), jnp.float32)
    for _ in range(TOP_K):                             # static, 2 iterations
        m = jnp.max(remaining, axis=-1, keepdims=True)
        sel_idx = jnp.min(jnp.where(remaining >= m, lane_e, float(NUM_EXPERTS)),
                          axis=-1, keepdims=True)      # first max (tie-break)
        sel = lane_e == sel_idx
        rw = rw + jnp.where(sel, jnp.exp(m - m_top), 0.0)
        remaining = jnp.where(sel, -1e30, remaining)
    rw = rw / jnp.sum(rw, axis=-1, keepdims=True)      # (T, E) dense routing weights

    # ---- expand routing weights across the 5 stacked blocks (shared MLP weight = 1) ----
    lanes_gu = lax.broadcasted_iota(jnp.int32, (t_len, GU_WIDTH), 1)
    rw_exp = jnp.where(lanes_gu >= NUM_EXPERTS * MOE_INTERMEDIATE, 1.0, 0.0)
    for e in range(NUM_EXPERTS):
        blk = (lanes_gu >= e * MOE_INTERMEDIATE) & (lanes_gu < (e + 1) * MOE_INTERMEDIATE)
        rw_exp = rw_exp + jnp.where(blk, rw[:, e:e + 1], 0.0)

    # ---- single stacked down-projection (4 experts + shared MLP), zero-padded 2nd half ----
    h_act = _silu(g_all) * u_all * rw_exp                              # (T, 320)
    down2 = jnp.dot(h_act.astype(jnp.bfloat16), w_down_ref[...],
                    preferred_element_type=jnp.float32)                # (T, 2H) = [down | 0]

    # lane-dense single store: [layer_out | residual h1]
    o_ref[...] = h1_2 + down2 * RESIDUAL_MULT


# ================================ thin wrapper ================================

def decoder_layer_forward(hidden_states, pk):
    """GraniteMoeHybridMambaDecoderLayer.forward -> (hidden_states, residual).
    The module's `residual` argument is ignored because it is always overwritten."""
    t, h = hidden_states.shape
    x2 = jnp.concatenate([hidden_states, hidden_states], axis=-1)      # lane-dense (T, 2H)
    packed_out = pl.pallas_call(
        _granite_layer_kernel,
        out_shape=jax.ShapeDtypeStruct((t, 2 * h), jnp.float32),
    )(x2, pk["vecs"], pk["bcp"], pk["w_in"], pk["w_bct"],
      pk["w_out"], pk["w_up"], pk["w_down"])
    return packed_out[:, :h], packed_out[:, h:]


# ================================ params / packing ================================

def init_params(key):
    """Raw params in PyTorch-equivalent layout (linear weights stored as W.T)."""
    ks = list(jax.random.split(key, 12))
    it = iter(ks)

    def w(shape, scale=0.05):
        return scale * jax.random.normal(next(it), shape, jnp.float32)

    return {
        "input_ln_w": jnp.ones((HIDDEN,), jnp.float32),
        "post_ln_w": jnp.ones((HIDDEN,), jnp.float32),
        # MambaMixer2: in_proj columns = [gate 128 | x 128 | B 16 | C 16 | dt 4]
        "in_proj_w": w((HIDDEN, INTERMEDIATE + CONV_DIM + N_HEADS)),
        "conv_w": w((D_CONV, CONV_DIM), 0.2),           # == torch conv1d weight[c,0,k].T
        "conv_b": w((CONV_DIM,), 0.05),
        "A_log": jnp.log(jnp.arange(1, N_HEADS + 1, dtype=jnp.float32)),
        "dt_bias": w((N_HEADS,), 0.1),
        "D": jnp.ones((N_HEADS,), jnp.float32),
        "mixer_norm_w": jnp.ones((INTERMEDIATE,), jnp.float32),
        "out_proj_w": w((INTERMEDIATE, HIDDEN)),
        # GraniteMoeMoE
        "router_w": w((HIDDEN, NUM_EXPERTS), 0.1),
        "moe_w13": w((NUM_EXPERTS, HIDDEN, 2 * MOE_INTERMEDIATE)),   # [gate | up] per expert
        "moe_w2": w((NUM_EXPERTS, MOE_INTERMEDIATE, HIDDEN)),
        # GraniteMoeSharedMLP
        "shared_w_in": w((HIDDEN, 2 * SHARED_INTERMEDIATE)),         # [gate | up]
        "shared_w_out": w((SHARED_INTERMEDIATE, HIDDEN)),
    }


def pack_params(p):
    """One-time layout plumbing: fold the dt head-expansion into in_proj, keep the B/C
    in_proj columns as a separate pre-transposed weight, pack all small row vectors into
    one (16,128) operand, fold all expert/shared/router up-projections into one wide
    matmul, stack expert + shared down-projections, widen out/down projections so the
    kernel emits a single lane-dense (T,128) [out | residual] store, cast MXU weights
    to bfloat16 (f32 accumulate)."""
    expand = jnp.repeat(jnp.eye(N_HEADS, dtype=jnp.float32), HEAD_DIM, axis=1)   # (NH, 128)
    dt_cols = p["in_proj_w"][:, INTERMEDIATE + CONV_DIM:]                         # (H, NH)
    w_in = jnp.concatenate(
        [p["in_proj_w"][:, :2 * INTERMEDIATE], dt_cols @ expand], axis=1)         # (H, 384)
    w_bct = p["in_proj_w"][:, 2 * INTERMEDIATE:INTERMEDIATE + CONV_DIM].T         # (32, H)

    vecs = jnp.zeros((VEC_ROWS, INTERMEDIATE), jnp.float32)
    vecs = vecs.at[ROW_LN1, :HIDDEN].set(p["input_ln_w"])
    vecs = vecs.at[ROW_LN2, :HIDDEN].set(p["post_ln_w"])
    vecs = vecs.at[ROW_MIX_NORM, :].set(p["mixer_norm_w"])
    vecs = vecs.at[ROW_CONV_B, :].set(p["conv_b"][:INTERMEDIATE])
    vecs = vecs.at[ROW_A, :].set(jnp.repeat(-jnp.exp(p["A_log"]), HEAD_DIM))
    vecs = vecs.at[ROW_DT_BIAS, :].set(jnp.repeat(p["dt_bias"], HEAD_DIM))
    vecs = vecs.at[ROW_D, :].set(jnp.repeat(p["D"], HEAD_DIM))
    vecs = vecs.at[ROW_CONV_W0:ROW_CONV_W0 + D_CONV, :].set(p["conv_w"][:, :INTERMEDIATE])

    bcp = jnp.zeros((DS2, 8), jnp.float32)              # B/C conv taps (cols 0..3) + bias (col 4)
    bcp = bcp.at[:, :D_CONV].set(p["conv_w"][:, INTERMEDIATE:].T)
    bcp = bcp.at[:, D_CONV].set(p["conv_b"][INTERMEDIATE:])

    # MoE up: [g_e0..g_e3 g_shared | u_e0..u_e3 u_shared | router]  ->  (H, 644)
    g_blocks = [p["moe_w13"][e][:, :MOE_INTERMEDIATE] for e in range(NUM_EXPERTS)]
    u_blocks = [p["moe_w13"][e][:, MOE_INTERMEDIATE:] for e in range(NUM_EXPERTS)]
    g_blocks.append(p["shared_w_in"][:, :SHARED_INTERMEDIATE])
    u_blocks.append(p["shared_w_in"][:, SHARED_INTERMEDIATE:])
    w_up = jnp.concatenate(g_blocks + u_blocks + [p["router_w"]], axis=1)         # (H, 644)

    # stacked down-projection (4 experts + shared MLP), widened with zeros for the
    # residual half of the lane-dense output
    w_down = jnp.concatenate([p["moe_w2"][e] for e in range(NUM_EXPERTS)]
                             + [p["shared_w_out"]], axis=0)                       # (320, H)
    w_down2 = jnp.concatenate([w_down, jnp.zeros_like(w_down)], axis=1)           # (320, 2H)
    w_out2 = jnp.concatenate([p["out_proj_w"], p["out_proj_w"]], axis=1)          # (128, 2H)

    return {
        "vecs": vecs,                                    # (16, 128) f32
        "bcp": bcp,                                      # (32, 8)   f32
        "w_in": w_in.astype(jnp.bfloat16),               # (64, 384)
        "w_bct": w_bct.astype(jnp.bfloat16),             # (32, 64)
        "w_out": w_out2.astype(jnp.bfloat16),            # (128, 128)
        "w_up": w_up.astype(jnp.bfloat16),               # (64, 644)
        "w_down": w_down2.astype(jnp.bfloat16),          # (320, 128)
    }


# ================================ main ================================

if __name__ == "__main__":
    key = jax.random.PRNGKey(0)
    k_params, k_x = jax.random.split(key)
    params = init_params(k_params)
    packed = pack_params(params)
    hidden_states = jax.random.normal(k_x, (SEQ_LEN, HIDDEN), jnp.float32)

    fwd = jax.jit(decoder_layer_forward)
    out, residual = fwd(hidden_states, packed)
    jax.block_until_ready((out, residual))

    assert out.shape == (SEQ_LEN, HIDDEN) and residual.shape == (SEQ_LEN, HIDDEN)
    assert bool(jnp.all(jnp.isfinite(out))) and bool(jnp.all(jnp.isfinite(residual)))
    print("KERNEL_OK")
</pallas_src>

<mosaic_0001>
module attributes {stable_mosaic.version = 11 : i64} {
  func.func @_granite_layer_kernel(%arg0: memref<8x128xf32, #tpu.memory_space<vmem>>, %arg1: memref<16x128xf32, #tpu.memory_space<vmem>>, %arg2: memref<32x8xf32, #tpu.memory_space<vmem>>, %arg3: memref<64x384xbf16, #tpu.memory_space<vmem>>, %arg4: memref<32x64xbf16, #tpu.memory_space<vmem>>, %arg5: memref<128x128xbf16, #tpu.memory_space<vmem>>, %arg6: memref<64x644xbf16, #tpu.memory_space<vmem>>, %arg7: memref<320x128xbf16, #tpu.memory_space<vmem>>, %arg8: memref<8x128xf32, #tpu.memory_space<vmem>>) attributes {dimension_semantics = [], scalar_prefetch = 0 : i64, scratch_operands = 0 : i64, tpu.core_type = #tpu.core_type<tc>} {
    %c0 = arith.constant 0 : index
    %c0_0 = arith.constant 0 : index
    %0 = vector.load %arg0[%c0, %c0_0] : memref<8x128xf32, #tpu.memory_space<vmem>>, vector<8x128xf32>
    %1 = vector.extract_strided_slice %0 {offsets = [0, 0], sizes = [8, 64], strides = [1, 1]} : vector<8x128xf32> to vector<8x64xf32>
    %2 = arith.mulf %1, %1 : vector<8x64xf32>
    %cst = arith.constant dense<0.000000e+00> : vector<8xf32>
    %3 = vector.multi_reduction <add>, %2, %cst [1] : vector<8x64xf32> to vector<8xf32>
    %4 = vector.shape_cast %3 : vector<8xf32> to vector<8x1xf32>
    %cst_1 = arith.constant 6.400000e+01 : f32
    %5 = vector.broadcast %cst_1 : f32 to vector<8x1xf32>
    %6 = arith.divf %4, %5 : vector<8x1xf32>
    %cst_2 = arith.constant 9.99999997E-7 : f32
    %7 = vector.broadcast %cst_2 : f32 to vector<8x1xf32>
    %8 = arith.addf %6, %7 : vector<8x1xf32>
    %9 = math.rsqrt %8 : vector<8x1xf32>
    %10 = vector.broadcast %9 : vector<8x1xf32> to vector<8x64xf32>
    %11 = arith.mulf %1, %10 : vector<8x64xf32>
    %c0_3 = arith.constant 0 : index
    %c0_4 = arith.constant 0 : index
    %12 = vector.load %arg1[%c0_3, %c0_4] : memref<16x128xf32, #tpu.memory_space<vmem>>, vector<1x64xf32>
    %13 = vector.broadcast %12 : vector<1x64xf32> to vector<8x64xf32>
    %14 = arith.mulf %11, %13 : vector<8x64xf32>
    %15 = arith.truncf %14 : vector<8x64xf32> to vector<8x64xbf16>
    %c0_5 = arith.constant 0 : index
    %c0_6 = arith.constant 0 : index
    %16 = vector.load %arg3[%c0_5, %c0_6] : memref<64x384xbf16, #tpu.memory_space<vmem>>, vector<64x384xbf16>
    %cst_7 = arith.constant dense<0.000000e+00> : vector<8x384xf32>
    %17 = tpu.matmul %15, %16, %cst_7 {dimension_numbers = #tpu.dot_dimension_numbers<[1], [0], [0], [1], [0, 0, 1, 1], [], []>} : vector<8x64xbf16>, vector<64x384xbf16>, vector<8x384xf32> -> vector<8x384xf32>
    %18 = vector.extract_strided_slice %17 {offsets = [0, 0], sizes = [8, 128], strides = [1, 1]} : vector<8x384xf32> to vector<8x128xf32>
    %19 = vector.extract_strided_slice %17 {offsets = [0, 128], sizes = [8, 128], strides = [1, 1]} : vector<8x384xf32> to vector<8x128xf32>
    %20 = vector.extract_strided_slice %17 {offsets = [0, 256], sizes = [8, 128], strides = [1, 1]} : vector<8x384xf32> to vector<8x128xf32>
    %c0_8 = arith.constant 0 : index
    %c0_9 = arith.constant 0 : index
    %21 = vector.load %arg4[%c0_8, %c0_9] : memref<32x64xbf16, #tpu.memory_space<vmem>>, vector<32x64xbf16>
    %cst_10 = arith.constant dense<0.000000e+00> : vector<32x8xf32>
    %22 = tpu.matmul %21, %15, %cst_10 {dimension_numbers = #tpu.dot_dimension_numbers<[1], [1], [0], [0], [0, 0, 1, 0], [], []>} : vector<32x64xbf16>, vector<8x64xbf16>, vector<32x8xf32> -> vector<32x8xf32>
    %23 = tpu.iota {dimensions = array<i32: 0>} : vector<8x128xi32>
    %c3 = arith.constant 3 : index
    %c0_11 = arith.constant 0 : index
    %24 = vector.load %arg1[%c3, %c0_11] : memref<16x128xf32, #tpu.memory_space<vmem>>, vector<1x128xf32>
    %c10 = arith.constant 10 : index
    %c0_12 = arith.constant 0 : index
    %25 = vector.load %arg1[%c10, %c0_12] : memref<16x128xf32, #tpu.memory_space<vmem>>, vector<1x128xf32>
    %26 = vector.broadcast %25 : vector<1x128xf32> to vector<8x128xf32>
    %27 = arith.mulf %19, %26 : vector<8x128xf32>
    %28 = vector.broadcast %24 : vector<1x128xf32> to vector<8x128xf32>
    %29 = arith.addf %28, %27 : vector<8x128xf32>
    %c3_i32 = arith.constant 3 : i32
    %30 = vector.broadcast %c3_i32 : i32 to vector<8x128xi32>
    %31 = arith.cmpi sge, %23, %30 : vector<8x128xi32>
    %c3_i32_13 = arith.constant 3 : i32
    %32 = tpu.dynamic_rotate %19 by %c3_i32_13 dim 0 : vector<8x128xf32>, i32 -> vector<8x128xf32>
    %cst_14 = arith.constant 0.000000e+00 : f32
    %33 = vector.broadcast %cst_14 : f32 to vector<8x128xf32>
    %34 = arith.select %31, %32, %33 : vector<8x128xi1>, vector<8x128xf32>
    %c7 = arith.constant 7 : index
    %c0_15 = arith.constant 0 : index
    %35 = vector.load %arg1[%c7, %c0_15] : memref<16x128xf32, #tpu.memory_space<vmem>>, vector<1x128xf32>
    %36 = vector.broadcast %35 : vector<1x128xf32> to vector<8x128xf32>
    %37 = arith.mulf %34, %36 : vector<8x128xf32>
    %38 = arith.addf %29, %37 : vector<8x128xf32>
    %c2_i32 = arith.constant 2 : i32
    %39 = vector.broadcast %c2_i32 : i32 to vector<8x128xi32>
    %40 = arith.cmpi sge, %23, %39 : vector<8x128xi32>
    %c2_i32_16 = arith.constant 2 : i32
    %41 = tpu.dynamic_rotate %19 by %c2_i32_16 dim 0 : vector<8x128xf32>, i32 -> vector<8x128xf32>
    %cst_17 = arith.constant 0.000000e+00 : f32
    %42 = vector.broadcast %cst_17 : f32 to vector<8x128xf32>
    %43 = arith.select %40, %41, %42 : vector<8x128xi1>, vector<8x128xf32>
    %c8 = arith.constant 8 : index
    %c0_18 = arith.constant 0 : index
    %44 = vector.load %arg1[%c8, %c0_18] : memref<16x128xf32, #tpu.memory_space<vmem>>, vector<1x128xf32>
    %45 = vector.broadcast %44 : vector<1x128xf32> to vector<8x128xf32>
    %46 = arith.mulf %43, %45 : vector<8x128xf32>
    %47 = arith.addf %38, %46 : vector<8x128xf32>
    %c1_i32 = arith.constant 1 : i32
    %48 = vector.broadcast %c1_i32 : i32 to vector<8x128xi32>
    %49 = arith.cmpi sge, %23, %48 : vector<8x128xi32>
    %c1_i32_19 = arith.constant 1 : i32
    %50 = tpu.dynamic_rotate %19 by %c1_i32_19 dim 0 : vector<8x128xf32>, i32 -> vector<8x128xf32>
    %cst_20 = arith.constant 0.000000e+00 : f32
    %51 = vector.broadcast %cst_20 : f32 to vector<8x128xf32>
    %52 = arith.select %49, %50, %51 : vector<8x128xi1>, vector<8x128xf32>
    %c9 = arith.constant 9 : index
    %c0_21 = arith.constant 0 : index
    %53 = vector.load %arg1[%c9, %c0_21] : memref<16x128xf32, #tpu.memory_space<vmem>>, vector<1x128xf32>
    %54 = vector.broadcast %53 : vector<1x128xf32> to vector<8x128xf32>
    %55 = arith.mulf %52, %54 : vector<8x128xf32>
    %56 = arith.addf %47, %55 : vector<8x128xf32>
    %cst_22 = arith.constant 0.000000e+00 : f32
    %57 = vector.broadcast %cst_22 : f32 to vector<8x128xf32>
    %58 = arith.subf %57, %56 : vector<8x128xf32>
    %59 = math.exp %58 : vector<8x128xf32>
    %cst_23 = arith.constant 1.000000e+00 : f32
    %60 = vector.broadcast %cst_23 : f32 to vector<8x128xf32>
    %61 = arith.addf %60, %59 : vector<8x128xf32>
    %62 = arith.divf %56, %61 : vector<8x128xf32>
    %c5 = arith.constant 5 : index
    %c0_24 = arith.constant 0 : index
    %63 = vector.load %arg1[%c5, %c0_24] : memref<16x128xf32, #tpu.memory_space<vmem>>, vector<1x128xf32>
    %64 = vector.broadcast %63 : vector<1x128xf32> to vector<8x128xf32>
    %65 = arith.addf %20, %64 : vector<8x128xf32>
    %cst_25 = arith.constant 0.000000e+00 : f32
    %66 = vector.broadcast %cst_25 : f32 to vector<8x128xf32>
    %67 = arith.maximumf %65, %66 : vector<8x128xf32>
    %68 = math.absf %65 : vector<8x128xf32>
    %cst_26 = arith.constant 0.000000e+00 : f32
    %69 = vector.broadcast %cst_26 : f32 to vector<8x128xf32>
    %70 = arith.subf %69, %68 : vector<8x128xf32>
    %71 = math.exp %70 : vector<8x128xf32>
    %cst_27 = arith.constant 1.000000e+00 : f32
    %72 = vector.broadcast %cst_27 : f32 to vector<8x128xf32>
    %73 = arith.addf %72, %71 : vector<8x128xf32>
    %74 = math.log %73 : vector<8x128xf32>
    %75 = arith.addf %67, %74 : vector<8x128xf32>
    %c4 = arith.constant 4 : index
    %c0_28 = arith.constant 0 : index
    %76 = vector.load %arg1[%c4, %c0_28] : memref<16x128xf32, #tpu.memory_space<vmem>>, vector<1x128xf32>
    %77 = vector.broadcast %76 : vector<1x128xf32> to vector<8x128xf32>
    %78 = arith.mulf %75, %77 : vector<8x128xf32>
    %79 = math.exp %78 : vector<8x128xf32>
    %80 = arith.mulf %75, %62 : vector<8x128xf32>
    %cst_29 = arith.constant 0.000000e+00 : f32
    %81 = vector.broadcast %cst_29 : f32 to vector<16x128xf32>
    %cst_30 = arith.constant 0.000000e+00 : f32
    %82 = vector.broadcast %cst_30 : f32 to vector<8x128xf32>
    %c0_31 = arith.constant 0 : index
    %c4_32 = arith.constant 4 : index
    %83 = vector.load %arg2[%c0_31, %c4_32] : memref<32x8xf32, #tpu.memory_space<vmem>>, vector<32x1xf32>
    %c0_33 = arith.constant 0 : index
    %c3_34 = arith.constant 3 : index
    %84 = vector.load %arg2[%c0_33, %c3_34] : memref<32x8xf32, #tpu.memory_space<vmem>>, vector<32x1xf32>
    %85 = vector.extract_strided_slice %22 {offsets = [0, 0], sizes = [32, 1], strides = [1, 1]} : vector<32x8xf32> to vector<32x1xf32>
    %86 = arith.mulf %84, %85 : vector<32x1xf32>
    %87 = arith.addf %83, %86 : vector<32x1xf32>
    %cst_35 = arith.constant 0.000000e+00 : f32
    %88 = vector.broadcast %cst_35 : f32 to vector<32x1xf32>
    %89 = arith.subf %88, %87 : vector<32x1xf32>
    %90 = math.exp %89 : vector<32x1xf32>
    %cst_36 = arith.constant 1.000000e+00 : f32
    %91 = vector.broadcast %cst_36 : f32 to vector<32x1xf32>
    %92 = arith.addf %91, %90 : vector<32x1xf32>
    %93 = arith.divf %87, %92 : vector<32x1xf32>
    %94 = vector.extract_strided_slice %79 {offsets = [0, 0], sizes = [1, 128], strides = [1, 1]} : vector<8x128xf32> to vector<1x128xf32>
    %95 = vector.broadcast %94 : vector<1x128xf32> to vector<16x128xf32>
    %96 = arith.mulf %81, %95 : vector<16x128xf32>
    %97 = vector.extract_strided_slice %93 {offsets = [0, 0], sizes = [16, 1], strides = [1, 1]} : vector<32x1xf32> to vector<16x1xf32>
    %98 = vector.extract_strided_slice %80 {offsets = [0, 0], sizes = [1, 128], strides = [1, 1]} : vector<8x128xf32> to vector<1x128xf32>
    %99 = vector.broadcast %97 : vector<16x1xf32> to vector<16x128xf32>
    %100 = vector.broadcast %98 : vector<1x128xf32> to vector<16x128xf32>
    %101 = arith.mulf %99, %100 : vector<16x128xf32>
    %102 = arith.addf %96, %101 : vector<16x128xf32>
    %103 = vector.extract_strided_slice %93 {offsets = [16, 0], sizes = [16, 1], strides = [1, 1]} : vector<32x1xf32> to vector<16x1xf32>
    %104 = vector.broadcast %103 : vector<16x1xf32> to vector<16x128xf32>
    %105 = arith.mulf %102, %104 : vector<16x128xf32>
    %cst_37 = arith.constant dense<0.000000e+00> : vector<128xf32>
    %106 = vector.multi_reduction <add>, %105, %cst_37 [0] : vector<16x128xf32> to vector<128xf32>
    %107 = vector.shape_cast %106 : vector<128xf32> to vector<1x128xf32>
    %c0_i32 = arith.constant 0 : i32
    %108 = vector.broadcast %c0_i32 : i32 to vector<8x128xi32>
    %109 = arith.cmpi eq, %23, %108 : vector<8x128xi32>
    %110 = vector.shape_cast %107 : vector<1x128xf32> to vector<1x128xf32>
    %111 = vector.broadcast %110 : vector<1x128xf32> to vector<8x128xf32>
    %112 = arith.select %109, %111, %82 : vector<8x128xi1>, vector<8x128xf32>
    %c0_38 = arith.constant 0 : index
    %c4_39 = arith.constant 4 : index
    %113 = vector.load %arg2[%c0_38, %c4_39] : memref<32x8xf32, #tpu.memory_space<vmem>>, vector<32x1xf32>
    %c0_40 = arith.constant 0 : index
    %c2 = arith.constant 2 : index
    %114 = vector.load %arg2[%c0_40, %c2] : memref<32x8xf32, #tpu.memory_space<vmem>>, vector<32x1xf32>
    %115 = vector.extract_strided_slice %22 {offsets = [0, 0], sizes = [32, 1], strides = [1, 1]} : vector<32x8xf32> to vector<32x1xf32>
    %116 = arith.mulf %114, %115 : vector<32x1xf32>
    %117 = arith.addf %113, %116 : vector<32x1xf32>
    %c0_41 = arith.constant 0 : index
    %c3_42 = arith.constant 3 : index
    %118 = vector.load %arg2[%c0_41, %c3_42] : memref<32x8xf32, #tpu.memory_space<vmem>>, vector<32x1xf32>
    %119 = vector.extract_strided_slice %22 {offsets = [0, 1], sizes = [32, 1], strides = [1, 1]} : vector<32x8xf32> to vector<32x1xf32>
    %120 = arith.mulf %118, %119 : vector<32x1xf32>
    %121 = arith.addf %117, %120 : vector<32x1xf32>
    %cst_43 = arith.constant 0.000000e+00 : f32
    %122 = vector.broadcast %cst_43 : f32 to vector<32x1xf32>
    %123 = arith.subf %122, %121 : vector<32x1xf32>
    %124 = math.exp %123 : vector<32x1xf32>
    %cst_44 = arith.constant 1.000000e+00 : f32
    %125 = vector.broadcast %cst_44 : f32 to vector<32x1xf32>
    %126 = arith.addf %125, %124 : vector<32x1xf32>
    %127 = arith.divf %121, %126 : vector<32x1xf32>
    %128 = vector.extract_strided_slice %79 {offsets = [1, 0], sizes = [1, 128], strides = [1, 1]} : vector<8x128xf32> to vector<1x128xf32>
    %129 = vector.broadcast %128 : vector<1x128xf32> to vector<16x128xf32>
    %130 = arith.mulf %102, %129 : vector<16x128xf32>
    %131 = vector.extract_strided_slice %127 {offsets = [0, 0], sizes = [16, 1], strides = [1, 1]} : vector<32x1xf32> to vector<16x1xf32>
    %132 = vector.extract_strided_slice %80 {offsets = [1, 0], sizes = [1, 128], strides = [1, 1]} : vector<8x128xf32> to vector<1x128xf32>
    %133 = vector.broadcast %131 : vector<16x1xf32> to vector<16x128xf32>
    %134 = vector.broadcast %132 : vector<1x128xf32> to vector<16x128xf32>
    %135 = arith.mulf %133, %134 : vector<16x128xf32>
    %136 = arith.addf %130, %135 : vector<16x128xf32>
    %137 = vector.extract_strided_slice %127 {offsets = [16, 0], sizes = [16, 1], strides = [1, 1]} : vector<32x1xf32> to vector<16x1xf32>
    %138 = vector.broadcast %137 : vector<16x1xf32> to vector<16x128xf32>
    %139 = arith.mulf %136, %138 : vector<16x128xf32>
    %cst_45 = arith.constant dense<0.000000e+00> : vector<128xf32>
    %140 = vector.multi_reduction <add>, %139, %cst_45 [0] : vector<16x128xf32> to vector<128xf32>
    %141 = vector.shape_cast %140 : vector<128xf32> to vector<1x128xf32>
    %c1_i32_46 = arith.constant 1 : i32
    %142 = vector.broadcast %c1_i32_46 : i32 to vector<8x128xi32>
    %143 = arith.cmpi eq, %23, %142 : vector<8x128xi32>
    %144 = vector.shape_cast %141 : vector<1x128xf32> to vector<1x128xf32>
    %145 = vector.broadcast %144 : vector<1x128xf32> to vector<8x128xf32>
    %146 = arith.select %143, %145, %112 : vector<8x128xi1>, vector<8x128xf32>
    %c0_47 = arith.constant 0 : index
    %c4_48 = arith.constant 4 : index
    %147 = vector.load %arg2[%c0_47, %c4_48] : memref<32x8xf32, #tpu.memory_space<vmem>>, vector<32x1xf32>
    %c0_49 = arith.constant 0 : index
    %c1 = arith.constant 1 : index
    %148 = vector.load %arg2[%c0_49, %c1] : memref<32x8xf32, #tpu.memory_space<vmem>>, vector<32x1xf32>
    %149 = vector.extract_strided_slice %22 {offsets = [0, 0], sizes = [32, 1], strides = [1, 1]} : vector<32x8xf32> to vector<32x1xf32>
    %150 = arith.mulf %148, %149 : vector<32x1xf32>
    %151 = arith.addf %147, %150 : vector<32x1xf32>
    %c0_50 = arith.constant 0 : index
    %c2_51 = arith.constant 2 : index
    %152 = vector.load %arg2[%c0_50, %c2_51] : memref<32x8xf32, #tpu.memory_space<vmem>>, vector<32x1xf32>
    %153 = vector.extract_strided_slice %22 {offsets = [0, 1], sizes = [32, 1], strides = [1, 1]} : vector<32x8xf32> to vector<32x1xf32>
    %154 = arith.mulf %152, %153 : vector<32x1xf32>
    %155 = arith.addf %151, %154 : vector<32x1xf32>
    %c0_52 = arith.constant 0 : index
    %c3_53 = arith.constant 3 : index
    %156 = vector.load %arg2[%c0_52, %c3_53] : memref<32x8xf32, #tpu.memory_space<vmem>>, vector<32x1xf32>
    %157 = vector.extract_strided_slice %22 {offsets = [0, 2], sizes = [32, 1], strides = [1, 1]} : vector<32x8xf32> to vector<32x1xf32>
    %158 = arith.mulf %156, %157 : vector<32x1xf32>
    %159 = arith.addf %155, %158 : vector<32x1xf32>
    %cst_54 = arith.constant 0.000000e+00 : f32
    %160 = vector.broadcast %cst_54 : f32 to vector<32x1xf32>
    %161 = arith.subf %160, %159 : vector<32x1xf32>
    %162 = math.exp %161 : vector<32x1xf32>
    %cst_55 = arith.constant 1.000000e+00 : f32
    %163 = vector.broadcast %cst_55 : f32 to vector<32x1xf32>
    %164 = arith.addf %163, %162 : vector<32x1xf32>
    %165 = arith.divf %159, %164 : vector<32x1xf32>
    %166 = vector.extract_strided_slice %79 {offsets = [2, 0], sizes = [1, 128], strides = [1, 1]} : vector<8x128xf32> to vector<1x128xf32>
    %167 = vector.broadcast %166 : vector<1x128xf32> to vector<16x128xf32>
    %168 = arith.mulf %136, %167 : vector<16x128xf32>
    %169 = vector.extract_strided_slice %165 {offsets = [0, 0], sizes = [16, 1], strides = [1, 1]} : vector<32x1xf32> to vector<16x1xf32>
    %170 = vector.extract_strided_slice %80 {offsets = [2, 0], sizes = [1, 128], strides = [1, 1]} : vector<8x128xf32> to vector<1x128xf32>
    %171 = vector.broadcast %169 : vector<16x1xf32> to vector<16x128xf32>
    %172 = vector.broadcast %170 : vector<1x128xf32> to vector<16x128xf32>
    %173 = arith.mulf %171, %172 : vector<16x128xf32>
    %174 = arith.addf %168, %173 : vector<16x128xf32>
    %175 = vector.extract_strided_slice %165 {offsets = [16, 0], sizes = [16, 1], strides = [1, 1]} : vector<32x1xf32> to vector<16x1xf32>
    %176 = vector.broadcast %175 : vector<16x1xf32> to vector<16x128xf32>
    %177 = arith.mulf %174, %176 : vector<16x128xf32>
    %cst_56 = arith.constant dense<0.000000e+00> : vector<128xf32>
    %178 = vector.multi_reduction <add>, %177, %cst_56 [0] : vector<16x128xf32> to vector<128xf32>
    %179 = vector.shape_cast %178 : vector<128xf32> to vector<1x128xf32>
    %c2_i32_57 = arith.constant 2 : i32
    %180 = vector.broadcast %c2_i32_57 : i32 to vector<8x128xi32>
    %181 = arith.cmpi eq, %23, %180 : vector<8x128xi32>
    %182 = vector.shape_cast %179 : vector<1x128xf32> to vector<1x128xf32>
    %183 = vector.broadcast %182 : vector<1x128xf32> to vector<8x128xf32>
    %184 = arith.select %181, %183, %146 : vector<8x128xi1>, vector<8x128xf32>
    %c0_58 = arith.constant 0 : index
    %c4_59 = arith.constant 4 : index
    %185 = vector.load %arg2[%c0_58, %c4_59] : memref<32x8xf32, #tpu.memory_space<vmem>>, vector<32x1xf32>
    %c0_60 = arith.constant 0 : index
    %c0_61 = arith.constant 0 : index
    %186 = vector.load %arg2[%c0_60, %c0_61] : memref<32x8xf32, #tpu.memory_space<vmem>>, vector<32x1xf32>
    %187 = vector.extract_strided_slice %22 {offsets = [0, 0], sizes = [32, 1], strides = [1, 1]} : vector<32x8xf32> to vector<32x1xf32>
    %188 = arith.mulf %186, %187 : vector<32x1xf32>
    %189 = arith.addf %185, %188 : vector<32x1xf32>
    %c0_62 = arith.constant 0 : index
    %c1_63 = arith.constant 1 : index
    %190 = vector.load %arg2[%c0_62, %c1_63] : memref<32x8xf32, #tpu.memory_space<vmem>>, vector<32x1xf32>
    %191 = vector.extract_strided_slice %22 {offsets = [0, 1], sizes = [32, 1], strides = [1, 1]} : vector<32x8xf32> to vector<32x1xf32>
    %192 = arith.mulf %190, %191 : vector<32x1xf32>
    %193 = arith.addf %189, %192 : vector<32x1xf32>
    %c0_64 = arith.constant 0 : index
    %c2_65 = arith.constant 2 : index
    %194 = vector.load %arg2[%c0_64, %c2_65] : memref<32x8xf32, #tpu.memory_space<vmem>>, vector<32x1xf32>
    %195 = vector.extract_strided_slice %22 {offsets = [0, 2], sizes = [32, 1], strides = [1, 1]} : vector<32x8xf32> to vector<32x1xf32>
    %196 = arith.mulf %194, %195 : vector<32x1xf32>
    %197 = arith.addf %193, %196 : vector<32x1xf32>
    %c0_66 = arith.constant 0 : index
    %c3_67 = arith.constant 3 : index
    %198 = vector.load %arg2[%c0_66, %c3_67] : memref<32x8xf32, #tpu.memory_space<vmem>>, vector<32x1xf32>
    %199 = vector.extract_strided_slice %22 {offsets = [0, 3], sizes = [32, 1], strides = [1, 1]} : vector<32x8xf32> to vector<32x1xf32>
    %200 = arith.mulf %198, %199 : vector<32x1xf32>
    %201 = arith.addf %197, %200 : vector<32x1xf32>
    %cst_68 = arith.constant 0.000000e+00 : f32
    %202 = vector.broadcast %cst_68 : f32 to vector<32x1xf32>
    %203 = arith.subf %202, %201 : vector<32x1xf32>
    %204 = math.exp %203 : vector<32x1xf32>
    %cst_69 = arith.constant 1.000000e+00 : f32
    %205 = vector.broadcast %cst_69 : f32 to vector<32x1xf32>
    %206 = arith.addf %205, %204 : vector<32x1xf32>
    %207 = arith.divf %201, %206 : vector<32x1xf32>
    %208 = vector.extract_strided_slice %79 {offsets = [3, 0], sizes = [1, 128], strides = [1, 1]} : vector<8x128xf32> to vector<1x128xf32>
    %209 = vector.broadcast %208 : vector<1x128xf32> to vector<16x128xf32>
    %210 = arith.mulf %174, %209 : vector<16x128xf32>
    %211 = vector.extract_strided_slice %207 {offsets = [0, 0], sizes = [16, 1], strides = [1, 1]} : vector<32x1xf32> to vector<16x1xf32>
    %212 = vector.extract_strided_slice %80 {offsets = [3, 0], sizes = [1, 128], strides = [1, 1]} : vector<8x128xf32> to vector<1x128xf32>
    %213 = vector.broadcast %211 : vector<16x1xf32> to vector<16x128xf32>
    %214 = vector.broadcast %212 : vector<1x128xf32> to vector<16x128xf32>
    %215 = arith.mulf %213, %214 : vector<16x128xf32>
    %216 = arith.addf %210, %215 : vector<16x128xf32>
    %217 = vector.extract_strided_slice %207 {offsets = [16, 0], sizes = [16, 1], strides = [1, 1]} : vector<32x1xf32> to vector<16x1xf32>
    %218 = vector.broadcast %217 : vector<16x1xf32> to vector<16x128xf32>
    %219 = arith.mulf %216, %218 : vector<16x128xf32>
    %cst_70 = arith.constant dense<0.000000e+00> : vector<128xf32>
    %220 = vector.multi_reduction <add>, %219, %cst_70 [0] : vector<16x128xf32> to vector<128xf32>
    %221 = vector.shape_cast %220 : vector<128xf32> to vector<1x128xf32>
    %c3_i32_71 = arith.constant 3 : i32
    %222 = vector.broadcast %c3_i32_71 : i32 to vector<8x128xi32>
    %223 = arith.cmpi eq, %23, %222 : vector<8x128xi32>
    %224 = vector.shape_cast %221 : vector<1x128xf32> to vector<1x128xf32>
    %225 = vector.broadcast %224 : vector<1x128xf32> to vector<8x128xf32>
    %226 = arith.select %223, %225, %184 : vector<8x128xi1>, vector<8x128xf32>
    %c0_72 = arith.constant 0 : index
    %c4_73 = arith.constant 4 : index
    %227 = vector.load %arg2[%c0_72, %c4_73] : memref<32x8xf32, #tpu.memory_space<vmem>>, vector<32x1xf32>
    %c0_74 = arith.constant 0 : index
    %c0_75 = arith.constant 0 : index
    %228 = vector.load %arg2[%c0_74, %c0_75] : memref<32x8xf32, #tpu.memory_space<vmem>>, vector<32x1xf32>
    %229 = vector.extract_strided_slice %22 {offsets = [0, 1], sizes = [32, 1], strides = [1, 1]} : vector<32x8xf32> to vector<32x1xf32>
    %230 = arith.mulf %228, %229 : vector<32x1xf32>
    %231 = arith.addf %227, %230 : vector<32x1xf32>
    %c0_76 = arith.constant 0 : index
    %c1_77 = arith.constant 1 : index
    %232 = vector.load %arg2[%c0_76, %c1_77] : memref<32x8xf32, #tpu.memory_space<vmem>>, vector<32x1xf32>
    %233 = vector.extract_strided_slice %22 {offsets = [0, 2], sizes = [32, 1], strides = [1, 1]} : vector<32x8xf32> to vector<32x1xf32>
    %234 = arith.mulf %232, %233 : vector<32x1xf32>
    %235 = arith.addf %231, %234 : vector<32x1xf32>
    %c0_78 = arith.constant 0 : index
    %c2_79 = arith.constant 2 : index
    %236 = vector.load %arg2[%c0_78, %c2_79] : memref<32x8xf32, #tpu.memory_space<vmem>>, vector<32x1xf32>
    %237 = vector.extract_strided_slice %22 {offsets = [0, 3], sizes = [32, 1], strides = [1, 1]} : vector<32x8xf32> to vector<32x1xf32>
    %238 = arith.mulf %236, %237 : vector<32x1xf32>
    %239 = arith.addf %235, %238 : vector<32x1xf32>
    %c0_80 = arith.constant 0 : index
    %c3_81 = arith.constant 3 : index
    %240 = vector.load %arg2[%c0_80, %c3_81] : memref<32x8xf32, #tpu.memory_space<vmem>>, vector<32x1xf32>
    %241 = vector.extract_strided_slice %22 {offsets = [0, 4], sizes = [32, 1], strides = [1, 1]} : vector<32x8xf32> to vector<32x1xf32>
    %242 = arith.mulf %240, %241 : vector<32x1xf32>
    %243 = arith.addf %239, %242 : vector<32x1xf32>
    %cst_82 = arith.constant 0.000000e+00 : f32
    %244 = vector.broadcast %cst_82 : f32 to vector<32x1xf32>
    %245 = arith.subf %244, %243 : vector<32x1xf32>
    %246 = math.exp %245 : vector<32x1xf32>
    %cst_83 = arith.constant 1.000000e+00 : f32
    %247 = vector.broadcast %cst_83 : f32 to vector<32x1xf32>
    %248 = arith.addf %247, %246 : vector<32x1xf32>
    %249 = arith.divf %243, %248 : vector<32x1xf32>
    %250 = vector.extract_strided_slice %79 {offsets = [4, 0], sizes = [1, 128], strides = [1, 1]} : vector<8x128xf32> to vector<1x128xf32>
    %251 = vector.broadcast %250 : vector<1x128xf32> to vector<16x128xf32>
    %252 = arith.mulf %216, %251 : vector<16x128xf32>
    %253 = vector.extract_strided_slice %249 {offsets = [0, 0], sizes = [16, 1], strides = [1, 1]} : vector<32x1xf32> to vector<16x1xf32>
    %254 = vector.extract_strided_slice %80 {offsets = [4, 0], sizes = [1, 128], strides = [1, 1]} : vector<8x128xf32> to vector<1x128xf32>
    %255 = vector.broadcast %253 : vector<16x1xf32> to vector<16x128xf32>
    %256 = vector.broadcast %254 : vector<1x128xf32> to vector<16x128xf32>
    %257 = arith.mulf %255, %256 : vector<16x128xf32>
    %258 = arith.addf %252, %257 : vector<16x128xf32>
    %259 = vector.extract_strided_slice %249 {offsets = [16, 0], sizes = [16, 1], strides = [1, 1]} : vector<32x1xf32> to vector<16x1xf32>
    %260 = vector.broadcast %259 : vector<16x1xf32> to vector<16x128xf32>
    %261 = arith.mulf %258, %260 : vector<16x128xf32>
    %cst_84 = arith.constant dense<0.000000e+00> : vector<128xf32>
    %262 = vector.multi_reduction <add>, %261, %cst_84 [0] : vector<16x128xf32> to vector<128xf32>
    %263 = vector.shape_cast %262 : vector<128xf32> to vector<1x128xf32>
    %c4_i32 = arith.constant 4 : i32
    %264 = vector.broadcast %c4_i32 : i32 to vector<8x128xi32>
    %265 = arith.cmpi eq, %23, %264 : vector<8x128xi32>
    %266 = vector.shape_cast %263 : vector<1x128xf32> to vector<1x128xf32>
    %267 = vector.broadcast %266 : vector<1x128xf32> to vector<8x128xf32>
    %268 = arith.select %265, %267, %226 : vector<8x128xi1>, vector<8x128xf32>
    %c0_85 = arith.constant 0 : index
    %c4_86 = arith.constant 4 : index
    %269 = vector.load %arg2[%c0_85, %c4_86] : memref<32x8xf32, #tpu.memory_space<vmem>>, vector<32x1xf32>
    %c0_87 = arith.constant 0 : index
    %c0_88 = arith.constant 0 : index
    %270 = vector.load %arg2[%c0_87, %c0_88] : memref<32x8xf32, #tpu.memory_space<vmem>>, vector<32x1xf32>
    %271 = vector.extract_strided_slice %22 {offsets = [0, 2], sizes = [32, 1], strides = [1, 1]} : vector<32x8xf32> to vector<32x1xf32>
    %272 = arith.mulf %270, %271 : vector<32x1xf32>
    %273 = arith.addf %269, %272 : vector<32x1xf32>
    %c0_89 = arith.constant 0 : index
    %c1_90 = arith.constant 1 : index
    %274 = vector.load %arg2[%c0_89, %c1_90] : memref<32x8xf32, #tpu.memory_space<vmem>>, vector<32x1xf32>
    %275 = vector.extract_strided_slice %22 {offsets = [0, 3], sizes = [32, 1], strides = [1, 1]} : vector<32x8xf32> to vector<32x1xf32>
    %276 = arith.mulf %274, %275 : vector<32x1xf32>
    %277 = arith.addf %273, %276 : vector<32x1xf32>
    %c0_91 = arith.constant 0 : index
    %c2_92 = arith.constant 2 : index
    %278 = vector.load %arg2[%c0_91, %c2_92] : memref<32x8xf32, #tpu.memory_space<vmem>>, vector<32x1xf32>
    %279 = vector.extract_strided_slice %22 {offsets = [0, 4], sizes = [32, 1], strides = [1, 1]} : vector<32x8xf32> to vector<32x1xf32>
    %280 = arith.mulf %278, %279 : vector<32x1xf32>
    %281 = arith.addf %277, %280 : vector<32x1xf32>
    %c0_93 = arith.constant 0 : index
    %c3_94 = arith.constant 3 : index
    %282 = vector.load %arg2[%c0_93, %c3_94] : memref<32x8xf32, #tpu.memory_space<vmem>>, vector<32x1xf32>
    %283 = vector.extract_strided_slice %22 {offsets = [0, 5], sizes = [32, 1], strides = [1, 1]} : vector<32x8xf32> to vector<32x1xf32>
    %284 = arith.mulf %282, %283 : vector<32x1xf32>
    %285 = arith.addf %281, %284 : vector<32x1xf32>
    %cst_95 = arith.constant 0.000000e+00 : f32
    %286 = vector.broadcast %cst_95 : f32 to vector<32x1xf32>
    %287 = arith.subf %286, %285 : vector<32x1xf32>
    %288 = math.exp %287 : vector<32x1xf32>
    %cst_96 = arith.constant 1.000000e+00 : f32
    %289 = vector.broadcast %cst_96 : f32 to vector<32x1xf32>
    %290 = arith.addf %289, %288 : vector<32x1xf32>
    %291 = arith.divf %285, %290 : vector<32x1xf32>
    %292 = vector.extract_strided_slice %79 {offsets = [5, 0], sizes = [1, 128], strides = [1, 1]} : vector<8x128xf32> to vector<1x128xf32>
    %293 = vector.broadcast %292 : vector<1x128xf32> to vector<16x128xf32>
    %294 = arith.mulf %258, %293 : vector<16x128xf32>
    %295 = vector.extract_strided_slice %291 {offsets = [0, 0], sizes = [16, 1], strides = [1, 1]} : vector<32x1xf32> to vector<16x1xf32>
    %296 = vector.extract_strided_slice %80 {offsets = [5, 0], sizes = [1, 128], strides = [1, 1]} : vector<8x128xf32> to vector<1x128xf32>
    %297 = vector.broadcast %295 : vector<16x1xf32> to vector<16x128xf32>
    %298 = vector.broadcast %296 : vector<1x128xf32> to vector<16x128xf32>
    %299 = arith.mulf %297, %298 : vector<16x128xf32>
    %300 = arith.addf %294, %299 : vector<16x128xf32>
    %301 = vector.extract_strided_slice %291 {offsets = [16, 0], sizes = [16, 1], strides = [1, 1]} : vector<32x1xf32> to vector<16x1xf32>
    %302 = vector.broadcast %301 : vector<16x1xf32> to vector<16x128xf32>
    %303 = arith.mulf %300, %302 : vector<16x128xf32>
    %cst_97 = arith.constant dense<0.000000e+00> : vector<128xf32>
    %304 = vector.multi_reduction <add>, %303, %cst_97 [0] : vector<16x128xf32> to vector<128xf32>
    %305 = vector.shape_cast %304 : vector<128xf32> to vector<1x128xf32>
    %c5_i32 = arith.constant 5 : i32
    %306 = vector.broadcast %c5_i32 : i32 to vector<8x128xi32>
    %307 = arith.cmpi eq, %23, %306 : vector<8x128xi32>
    %308 = vector.shape_cast %305 : vector<1x128xf32> to vector<1x128xf32>
    %309 = vector.broadcast %308 : vector<1x128xf32> to vector<8x128xf32>
    %310 = arith.select %307, %309, %268 : vector<8x128xi1>, vector<8x128xf32>
    %c0_98 = arith.constant 0 : index
    %c4_99 = arith.constant 4 : index
    %311 = vector.load %arg2[%c0_98, %c4_99] : memref<32x8xf32, #tpu.memory_space<vmem>>, vector<32x1xf32>
    %c0_100 = arith.constant 0 : index
    %c0_101 = arith.constant 0 : index
    %312 = vector.load %arg2[%c0_100, %c0_101] : memref<32x8xf32, #tpu.memory_space<vmem>>, vector<32x1xf32>
    %313 = vector.extract_strided_slice %22 {offsets = [0, 3], sizes = [32, 1], strides = [1, 1]} : vector<32x8xf32> to vector<32x1xf32>
    %314 = arith.mulf %312, %313 : vector<32x1xf32>
    %315 = arith.addf %311, %314 : vector<32x1xf32>
    %c0_102 = arith.constant 0 : index
    %c1_103 = arith.constant 1 : index
    %316 = vector.load %arg2[%c0_102, %c1_103] : memref<32x8xf32, #tpu.memory_space<vmem>>, vector<32x1xf32>
    %317 = vector.extract_strided_slice %22 {offsets = [0, 4], sizes = [32, 1], strides = [1, 1]} : vector<32x8xf32> to vector<32x1xf32>
    %318 = arith.mulf %316, %317 : vector<32x1xf32>
    %319 = arith.addf %315, %318 : vector<32x1xf32>
    %c0_104 = arith.constant 0 : index
    %c2_105 = arith.constant 2 : index
    %320 = vector.load %arg2[%c0_104, %c2_105] : memref<32x8xf32, #tpu.memory_space<vmem>>, vector<32x1xf32>
    %321 = vector.extract_strided_slice %22 {offsets = [0, 5], sizes = [32, 1], strides = [1, 1]} : vector<32x8xf32> to vector<32x1xf32>
    %322 = arith.mulf %320, %321 : vector<32x1xf32>
    %323 = arith.addf %319, %322 : vector<32x1xf32>
    %c0_106 = arith.constant 0 : index
    %c3_107 = arith.constant 3 : index
    %324 = vector.load %arg2[%c0_106, %c3_107] : memref<32x8xf32, #tpu.memory_space<vmem>>, vector<32x1xf32>
    %325 = vector.extract_strided_slice %22 {offsets = [0, 6], sizes = [32, 1], strides = [1, 1]} : vector<32x8xf32> to vector<32x1xf32>
    %326 = arith.mulf %324, %325 : vector<32x1xf32>
    %327 = arith.addf %323, %326 : vector<32x1xf32>
    %cst_108 = arith.constant 0.000000e+00 : f32
    %328 = vector.broadcast %cst_108 : f32 to vector<32x1xf32>
    %329 = arith.subf %328, %327 : vector<32x1xf32>
    %330 = math.exp %329 : vector<32x1xf32>
    %cst_109 = arith.constant 1.000000e+00 : f32
    %331 = vector.broadcast %cst_109 : f32 to vector<32x1xf32>
    %332 = arith.addf %331, %330 : vector<32x1xf32>
    %333 = arith.divf %327, %332 : vector<32x1xf32>
    %334 = vector.extract_strided_slice %79 {offsets = [6, 0], sizes = [1, 128], strides = [1, 1]} : vector<8x128xf32> to vector<1x128xf32>
    %335 = vector.broadcast %334 : vector<1x128xf32> to vector<16x128xf32>
    %336 = arith.mulf %300, %335 : vector<16x128xf32>
    %337 = vector.extract_strided_slice %333 {offsets = [0, 0], sizes = [16, 1], strides = [1, 1]} : vector<32x1xf32> to vector<16x1xf32>
    %338 = vector.extract_strided_slice %80 {offsets = [6, 0], sizes = [1, 128], strides = [1, 1]} : vector<8x128xf32> to vector<1x128xf32>
    %339 = vector.broadcast %337 : vector<16x1xf32> to vector<16x128xf32>
    %340 = vector.broadcast %338 : vector<1x128xf32> to vector<16x128xf32>
    %341 = arith.mulf %339, %340 : vector<16x128xf32>
    %342 = arith.addf %336, %341 : vector<16x128xf32>
    %343 = vector.extract_strided_slice %333 {offsets = [16, 0], sizes = [16, 1], strides = [1, 1]} : vector<32x1xf32> to vector<16x1xf32>
    %344 = vector.broadcast %343 : vector<16x1xf32> to vector<16x128xf32>
    %345 = arith.mulf %342, %344 : vector<16x128xf32>
    %cst_110 = arith.constant dense<0.000000e+00> : vector<128xf32>
    %346 = vector.multi_reduction <add>, %345, %cst_110 [0] : vector<16x128xf32> to vector<128xf32>
    %347 = vector.shape_cast %346 : vector<128xf32> to vector<1x128xf32>
    %c6_i32 = arith.constant 6 : i32
    %348 = vector.broadcast %c6_i32 : i32 to vector<8x128xi32>
    %349 = arith.cmpi eq, %23, %348 : vector<8x128xi32>
    %350 = vector.shape_cast %347 : vector<1x128xf32> to vector<1x128xf32>
    %351 = vector.broadcast %350 : vector<1x128xf32> to vector<8x128xf32>
    %352 = arith.select %349, %351, %310 : vector<8x128xi1>, vector<8x128xf32>
    %c0_111 = arith.constant 0 : index
    %c4_112 = arith.constant 4 : index
    %353 = vector.load %arg2[%c0_111, %c4_112] : memref<32x8xf32, #tpu.memory_space<vmem>>, vector<32x1xf32>
    %c0_113 = arith.constant 0 : index
    %c0_114 = arith.constant 0 : index
    %354 = vector.load %arg2[%c0_113, %c0_114] : memref<32x8xf32, #tpu.memory_space<vmem>>, vector<32x1xf32>
    %355 = vector.extract_strided_slice %22 {offsets = [0, 4], sizes = [32, 1], strides = [1, 1]} : vector<32x8xf32> to vector<32x1xf32>
    %356 = arith.mulf %354, %355 : vector<32x1xf32>
    %357 = arith.addf %353, %356 : vector<32x1xf32>
    %c0_115 = arith.constant 0 : index
    %c1_116 = arith.constant 1 : index
    %358 = vector.load %arg2[%c0_115, %c1_116] : memref<32x8xf32, #tpu.memory_space<vmem>>, vector<32x1xf32>
    %359 = vector.extract_strided_slice %22 {offsets = [0, 5], sizes = [32, 1], strides = [1, 1]} : vector<32x8xf32> to vector<32x1xf32>
    %360 = arith.mulf %358, %359 : vector<32x1xf32>
    %361 = arith.addf %357, %360 : vector<32x1xf32>
    %c0_117 = arith.constant 0 : index
    %c2_118 = arith.constant 2 : index
    %362 = vector.load %arg2[%c0_117, %c2_118] : memref<32x8xf32, #tpu.memory_space<vmem>>, vector<32x1xf32>
    %363 = vector.extract_strided_slice %22 {offsets = [0, 6], sizes = [32, 1], strides = [1, 1]} : vector<32x8xf32> to vector<32x1xf32>
    %364 = arith.mulf %362, %363 : vector<32x1xf32>
    %365 = arith.addf %361, %364 : vector<32x1xf32>
    %c0_119 = arith.constant 0 : index
    %c3_120 = arith.constant 3 : index
    %366 = vector.load %arg2[%c0_119, %c3_120] : memref<32x8xf32, #tpu.memory_space<vmem>>, vector<32x1xf32>
    %367 = vector.extract_strided_slice %22 {offsets = [0, 7], sizes = [32, 1], strides = [1, 1]} : vector<32x8xf32> to vector<32x1xf32>
    %368 = arith.mulf %366, %367 : vector<32x1xf32>
    %369 = arith.addf %365, %368 : vector<32x1xf32>
    %cst_121 = arith.constant 0.000000e+00 : f32
    %370 = vector.broadcast %cst_121 : f32 to vector<32x1xf32>
    %371 = arith.subf %370, %369 : vector<32x1xf32>
    %372 = math.exp %371 : vector<32x1xf32>
    %cst_122 = arith.constant 1.000000e+00 : f32
    %373 = vector.broadcast %cst_122 : f32 to vector<32x1xf32>
    %374 = arith.addf %373, %372 : vector<32x1xf32>
    %375 = arith.divf %369, %374 : vector<32x1xf32>
    %376 = vector.extract_strided_slice %79 {offsets = [7, 0], sizes = [1, 128], strides = [1, 1]} : vector<8x128xf32> to vector<1x128xf32>
    %377 = vector.broadcast %376 : vector<1x128xf32> to vector<16x128xf32>
    %378 = arith.mulf %342, %377 : vector<16x128xf32>
    %379 = vector.extract_strided_slice %375 {offsets = [0, 0], sizes = [16, 1], strides = [1, 1]} : vector<32x1xf32> to vector<16x1xf32>
    %380 = vector.extract_strided_slice %80 {offsets = [7, 0], sizes = [1, 128], strides = [1, 1]} : vector<8x128xf32> to vector<1x128xf32>
    %381 = vector.broadcast %379 : vector<16x1xf32> to vector<16x128xf32>
    %382 = vector.broadcast %380 : vector<1x128xf32> to vector<16x128xf32>
    %383 = arith.mulf %381, %382 : vector<16x128xf32>
    %384 = arith.addf %378, %383 : vector<16x128xf32>
    %385 = vector.extract_strided_slice %375 {offsets = [16, 0], sizes = [16, 1], strides = [1, 1]} : vector<32x1xf32> to vector<16x1xf32>
    %386 = vector.broadcast %385 : vector<16x1xf32> to vector<16x128xf32>
    %387 = arith.mulf %384, %386 : vector<16x128xf32>
    %cst_123 = arith.constant dense<0.000000e+00> : vector<128xf32>
    %388 = vector.multi_reduction <add>, %387, %cst_123 [0] : vector<16x128xf32> to vector<128xf32>
    %389 = vector.shape_cast %388 : vector<128xf32> to vector<1x128xf32>
    %c7_i32 = arith.constant 7 : i32
    %390 = vector.broadcast %c7_i32 : i32 to vector<8x128xi32>
    %391 = arith.cmpi eq, %23, %390 : vector<8x128xi32>
    %392 = vector.shape_cast %389 : vector<1x128xf32> to vector<1x128xf32>
    %393 = vector.broadcast %392 : vector<1x128xf32> to vector<8x128xf32>
    %394 = arith.select %391, %393, %352 : vector<8x128xi1>, vector<8x128xf32>
    %c6 = arith.constant 6 : index
    %c0_124 = arith.constant 0 : index
    %395 = vector.load %arg1[%c6, %c0_124] : memref<16x128xf32, #tpu.memory_space<vmem>>, vector<1x128xf32>
    %396 = vector.broadcast %395 : vector<1x128xf32> to vector<8x128xf32>
    %397 = arith.mulf %396, %62 : vector<8x128xf32>
    %398 = arith.addf %394, %397 : vector<8x128xf32>
    %cst_125 = arith.constant 0.000000e+00 : f32
    %399 = vector.broadcast %cst_125 : f32 to vector<8x128xf32>
    %400 = arith.subf %399, %18 : vector<8x128xf32>
    %401 = math.exp %400 : vector<8x128xf32>
    %cst_126 = arith.constant 1.000000e+00 : f32
    %402 = vector.broadcast %cst_126 : f32 to vector<8x128xf32>
    %403 = arith.addf %402, %401 : vector<8x128xf32>
    %404 = arith.divf %18, %403 : vector<8x128xf32>
    %405 = arith.mulf %398, %404 : vector<8x128xf32>
    %406 = arith.mulf %405, %405 : vector<8x128xf32>
    %cst_127 = arith.constant dense<0.000000e+00> : vector<8xf32>
    %407 = vector.multi_reduction <add>, %406, %cst_127 [1] : vector<8x128xf32> to vector<8xf32>
    %408 = vector.shape_cast %407 : vector<8xf32> to vector<8x1xf32>
    %cst_128 = arith.constant 1.280000e+02 : f32
    %409 = vector.broadcast %cst_128 : f32 to vector<8x1xf32>
    %410 = arith.divf %408, %409 : vector<8x1xf32>
    %cst_129 = arith.constant 9.99999997E-7 : f32
    %411 = vector.broadcast %cst_129 : f32 to vector<8x1xf32>
    %412 = arith.addf %410, %411 : vector<8x1xf32>
    %413 = math.rsqrt %412 : vector<8x1xf32>
    %414 = vector.broadcast %413 : vector<8x1xf32> to vector<8x128xf32>
    %415 = arith.mulf %405, %414 : vector<8x128xf32>
    %c2_130 = arith.constant 2 : index
    %c0_131 = arith.constant 0 : index
    %416 = vector.load %arg1[%c2_130, %c0_131] : memref<16x128xf32, #tpu.memory_space<vmem>>, vector<1x128xf32>
    %417 = vector.broadcast %416 : vector<1x128xf32> to vector<8x128xf32>
    %418 = arith.mulf %415, %417 : vector<8x128xf32>
    %419 = arith.truncf %418 : vector<8x128xf32> to vector<8x128xbf16>
    %c0_132 = arith.constant 0 : index
    %c0_133 = arith.constant 0 : index
    %420 = vector.load %arg5[%c0_132, %c0_133] : memref<128x128xbf16, #tpu.memory_space<vmem>>, vector<128x128xbf16>
    %cst_134 = arith.constant dense<0.000000e+00> : vector<8x128xf32>
    %421 = tpu.matmul %419, %420, %cst_134 {dimension_numbers = #tpu.dot_dimension_numbers<[1], [0], [0], [1], [0, 0, 1, 1], [], []>} : vector<8x128xbf16>, vector<128x128xbf16>, vector<8x128xf32> -> vector<8x128xf32>
    %cst_135 = arith.constant 5.000000e-01 : f32
    %422 = vector.broadcast %cst_135 : f32 to vector<8x128xf32>
    %423 = arith.mulf %421, %422 : vector<8x128xf32>
    %424 = arith.addf %0, %423 : vector<8x128xf32>
    %425 = vector.extract_strided_slice %424 {offsets = [0, 0], sizes = [8, 64], strides = [1, 1]} : vector<8x128xf32> to vector<8x64xf32>
    %426 = arith.mulf %425, %425 : vector<8x64xf32>
    %cst_136 = arith.constant dense<0.000000e+00> : vector<8xf32>
    %427 = vector.multi_reduction <add>, %426, %cst_136 [1] : vector<8x64xf32> to vector<8xf32>
    %428 = vector.shape_cast %427 : vector<8xf32> to vector<8x1xf32>
    %cst_137 = arith.constant 6.400000e+01 : f32
    %429 = vector.broadcast %cst_137 : f32 to vector<8x1xf32>
    %430 = arith.divf %428, %429 : vector<8x1xf32>
    %cst_138 = arith.constant 9.99999997E-7 : f32
    %431 = vector.broadcast %cst_138 : f32 to vector<8x1xf32>
    %432 = arith.addf %430, %431 : vector<8x1xf32>
    %433 = math.rsqrt %432 : vector<8x1xf32>
    %434 = vector.broadcast %433 : vector<8x1xf32> to vector<8x64xf32>
    %435 = arith.mulf %425, %434 : vector<8x64xf32>
    %c1_139 = arith.constant 1 : index
    %c0_140 = arith.constant 0 : index
    %436 = vector.load %arg1[%c1_139, %c0_140] : memref<16x128xf32, #tpu.memory_space<vmem>>, vector<1x64xf32>
    %437 = vector.broadcast %436 : vector<1x64xf32> to vector<8x64xf32>
    %438 = arith.mulf %435, %437 : vector<8x64xf32>
    %439 = arith.truncf %438 : vector<8x64xf32> to vector<8x64xbf16>
    %c0_141 = arith.constant 0 : index
    %c0_142 = arith.constant 0 : index
    %440 = vector.load %arg6[%c0_141, %c0_142] : memref<64x644xbf16, #tpu.memory_space<vmem>>, vector<64x644xbf16>
    %cst_143 = arith.constant dense<0.000000e+00> : vector<8x644xf32>
    %441 = tpu.matmul %439, %440, %cst_143 {dimension_numbers = #tpu.dot_dimension_numbers<[1], [0], [0], [1], [0, 0, 1, 1], [], []>} : vector<8x64xbf16>, vector<64x644xbf16>, vector<8x644xf32> -> vector<8x644xf32>
    %442 = vector.extract_strided_slice %441 {offsets = [0, 0], sizes = [8, 320], strides = [1, 1]} : vector<8x644xf32> to vector<8x320xf32>
    %443 = vector.extract_strided_slice %441 {offsets = [0, 320], sizes = [8, 320], strides = [1, 1]} : vector<8x644xf32> to vector<8x320xf32>
    %444 = vector.extract_strided_slice %441 {offsets = [0, 640], sizes = [8, 4], strides = [1, 1]} : vector<8x644xf32> to vector<8x4xf32>
    %445 = tpu.iota {dimensions = array<i32: 1>} : vector<8x4xi32>
    %446 = arith.sitofp %445 : vector<8x4xi32> to vector<8x4xf32>
    %cst_144 = arith.constant dense<0xFF800000> : vector<8xf32>
    %447 = vector.multi_reduction <maximumf>, %444, %cst_144 [1] : vector<8x4xf32> to vector<8xf32>
    %448 = vector.shape_cast %447 : vector<8xf32> to vector<8x1xf32>
    %cst_145 = arith.constant 0.000000e+00 : f32
    %449 = vector.broadcast %cst_145 : f32 to vector<8x4xf32>
    %cst_146 = arith.constant dense<0xFF800000> : vector<8xf32>
    %450 = vector.multi_reduction <maximumf>, %444, %cst_146 [1] : vector<8x4xf32> to vector<8xf32>
    %451 = vector.shape_cast %450 : vector<8xf32> to vector<8x1xf32>
    %452 = vector.broadcast %451 : vector<8x1xf32> to vector<8x4xf32>
    %453 = arith.cmpf oge, %444, %452 : vector<8x4xf32>
    %cst_147 = arith.constant 4.000000e+00 : f32
    %454 = vector.broadcast %cst_147 : f32 to vector<8x4xf32>
    %455 = arith.select %453, %446, %454 : vector<8x4xi1>, vector<8x4xf32>
    %cst_148 = arith.constant dense<0x7F800000> : vector<8xf32>
    %456 = vector.multi_reduction <minimumf>, %455, %cst_148 [1] : vector<8x4xf32> to vector<8xf32>
    %457 = vector.shape_cast %456 : vector<8xf32> to vector<8x1xf32>
    %458 = vector.broadcast %457 : vector<8x1xf32> to vector<8x4xf32>
    %459 = arith.cmpf oeq, %446, %458 : vector<8x4xf32>
    %460 = arith.subf %451, %448 : vector<8x1xf32>
    %461 = math.exp %460 : vector<8x1xf32>
    %cst_149 = arith.constant 0.000000e+00 : f32
    %462 = vector.shape_cast %461 : vector<8x1xf32> to vector<8x1xf32>
    %463 = vector.broadcast %462 : vector<8x1xf32> to vector<8x4xf32>
    %464 = vector.broadcast %cst_149 : f32 to vector<8x4xf32>
    %465 = arith.select %459, %463, %464 : vector<8x4xi1>, vector<8x4xf32>
    %466 = arith.addf %449, %465 : vector<8x4xf32>
    %cst_150 = arith.constant -1.000000e+30 : f32
    %467 = vector.broadcast %cst_150 : f32 to vector<8x4xf32>
    %468 = arith.select %459, %467, %444 : vector<8x4xi1>, vector<8x4xf32>
    %cst_151 = arith.constant dense<0xFF800000> : vector<8xf32>
    %469 = vector.multi_reduction <maximumf>, %468, %cst_151 [1] : vector<8x4xf32> to vector<8xf32>
    %470 = vector.shape_cast %469 : vector<8xf32> to vector<8x1xf32>
    %471 = vector.broadcast %470 : vector<8x1xf32> to vector<8x4xf32>
    %472 = arith.cmpf oge, %468, %471 : vector<8x4xf32>
    %cst_152 = arith.constant 4.000000e+00 : f32
    %473 = vector.broadcast %cst_152 : f32 to vector<8x4xf32>
    %474 = arith.select %472, %446, %473 : vector<8x4xi1>, vector<8x4xf32>
    %cst_153 = arith.constant dense<0x7F800000> : vector<8xf32>
    %475 = vector.multi_reduction <minimumf>, %474, %cst_153 [1] : vector<8x4xf32> to vector<8xf32>
    %476 = vector.shape_cast %475 : vector<8xf32> to vector<8x1xf32>
    %477 = vector.broadcast %476 : vector<8x1xf32> to vector<8x4xf32>
    %478 = arith.cmpf oeq, %446, %477 : vector<8x4xf32>
    %479 = arith.subf %470, %448 : vector<8x1xf32>
    %480 = math.exp %479 : vector<8x1xf32>
    %cst_154 = arith.constant 0.000000e+00 : f32
    %481 = vector.shape_cast %480 : vector<8x1xf32> to vector<8x1xf32>
    %482 = vector.broadcast %481 : vector<8x1xf32> to vector<8x4xf32>
    %483 = vector.broadcast %cst_154 : f32 to vector<8x4xf32>
    %484 = arith.select %478, %482, %483 : vector<8x4xi1>, vector<8x4xf32>
    %485 = arith.addf %466, %484 : vector<8x4xf32>
    %cst_155 = arith.constant dense<0.000000e+00> : vector<8xf32>
    %486 = vector.multi_reduction <add>, %485, %cst_155 [1] : vector<8x4xf32> to vector<8xf32>
    %487 = vector.shape_cast %486 : vector<8xf32> to vector<8x1xf32>
    %488 = vector.broadcast %487 : vector<8x1xf32> to vector<8x4xf32>
    %489 = arith.divf %485, %488 : vector<8x4xf32>
    %490 = tpu.iota {dimensions = array<i32: 1>} : vector<8x320xi32>
    %c256_i32 = arith.constant 256 : i32
    %491 = vector.broadcast %c256_i32 : i32 to vector<8x320xi32>
    %492 = arith.cmpi sge, %490, %491 : vector<8x320xi32>
    %cst_156 = arith.constant 1.000000e+00 : f32
    %cst_157 = arith.constant 0.000000e+00 : f32
    %493 = vector.broadcast %cst_156 : f32 to vector<8x320xf32>
    %494 = vector.broadcast %cst_157 : f32 to vector<8x320xf32>
    %495 = arith.select %492, %493, %494 : vector<8x320xi1>, vector<8x320xf32>
    %c0_i32_158 = arith.constant 0 : i32
    %496 = vector.broadcast %c0_i32_158 : i32 to vector<8x320xi32>
    %497 = arith.cmpi sge, %490, %496 : vector<8x320xi32>
    %c64_i32 = arith.constant 64 : i32
    %498 = vector.broadcast %c64_i32 : i32 to vector<8x320xi32>
    %499 = arith.cmpi slt, %490, %498 : vector<8x320xi32>
    %500 = arith.andi %497, %499 : vector<8x320xi1>
    %501 = vector.extract_strided_slice %489 {offsets = [0, 0], sizes = [8, 1], strides = [1, 1]} : vector<8x4xf32> to vector<8x1xf32>
    %cst_159 = arith.constant 0.000000e+00 : f32
    %502 = vector.shape_cast %501 : vector<8x1xf32> to vector<8x1xf32>
    %503 = vector.broadcast %502 : vector<8x1xf32> to vector<8x320xf32>
    %504 = vector.broadcast %cst_159 : f32 to vector<8x320xf32>
    %505 = arith.select %500, %503, %504 : vector<8x320xi1>, vector<8x320xf32>
    %506 = arith.addf %495, %505 : vector<8x320xf32>
    %c64_i32_160 = arith.constant 64 : i32
    %507 = vector.broadcast %c64_i32_160 : i32 to vector<8x320xi32>
    %508 = arith.cmpi sge, %490, %507 : vector<8x320xi32>
    %c128_i32 = arith.constant 128 : i32
    %509 = vector.broadcast %c128_i32 : i32 to vector<8x320xi32>
    %510 = arith.cmpi slt, %490, %509 : vector<8x320xi32>
    %511 = arith.andi %508, %510 : vector<8x320xi1>
    %512 = vector.extract_strided_slice %489 {offsets = [0, 1], sizes = [8, 1], strides = [1, 1]} : vector<8x4xf32> to vector<8x1xf32>
    %cst_161 = arith.constant 0.000000e+00 : f32
    %513 = vector.shape_cast %512 : vector<8x1xf32> to vector<8x1xf32>
    %514 = vector.broadcast %513 : vector<8x1xf32> to vector<8x320xf32>
    %515 = vector.broadcast %cst_161 : f32 to vector<8x320xf32>
    %516 = arith.select %511, %514, %515 : vector<8x320xi1>, vector<8x320xf32>
    %517 = arith.addf %506, %516 : vector<8x320xf32>
    %c128_i32_162 = arith.constant 128 : i32
    %518 = vector.broadcast %c128_i32_162 : i32 to vector<8x320xi32>
    %519 = arith.cmpi sge, %490, %518 : vector<8x320xi32>
    %c192_i32 = arith.constant 192 : i32
    %520 = vector.broadcast %c192_i32 : i32 to vector<8x320xi32>
    %521 = arith.cmpi slt, %490, %520 : vector<8x320xi32>
    %522 = arith.andi %519, %521 : vector<8x320xi1>
    %523 = vector.extract_strided_slice %489 {offsets = [0, 2], sizes = [8, 1], strides = [1, 1]} : vector<8x4xf32> to vector<8x1xf32>
    %cst_163 = arith.constant 0.000000e+00 : f32
    %524 = vector.shape_cast %523 : vector<8x1xf32> to vector<8x1xf32>
    %525 = vector.broadcast %524 : vector<8x1xf32> to vector<8x320xf32>
    %526 = vector.broadcast %cst_163 : f32 to vector<8x320xf32>
    %527 = arith.select %522, %525, %526 : vector<8x320xi1>, vector<8x320xf32>
    %528 = arith.addf %517, %527 : vector<8x320xf32>
    %c192_i32_164 = arith.constant 192 : i32
    %529 = vector.broadcast %c192_i32_164 : i32 to vector<8x320xi32>
    %530 = arith.cmpi sge, %490, %529 : vector<8x320xi32>
    %c256_i32_165 = arith.constant 256 : i32
    %531 = vector.broadcast %c256_i32_165 : i32 to vector<8x320xi32>
    %532 = arith.cmpi slt, %490, %531 : vector<8x320xi32>
    %533 = arith.andi %530, %532 : vector<8x320xi1>
    %534 = vector.extract_strided_slice %489 {offsets = [0, 3], sizes = [8, 1], strides = [1, 1]} : vector<8x4xf32> to vector<8x1xf32>
    %cst_166 = arith.constant 0.000000e+00 : f32
    %535 = vector.shape_cast %534 : vector<8x1xf32> to vector<8x1xf32>
    %536 = vector.broadcast %535 : vector<8x1xf32> to vector<8x320xf32>
    %537 = vector.broadcast %cst_166 : f32 to vector<8x320xf32>
    %538 = arith.select %533, %536, %537 : vector<8x320xi1>, vector<8x320xf32>
    %539 = arith.addf %528, %538 : vector<8x320xf32>
    %cst_167 = arith.constant 0.000000e+00 : f32
    %540 = vector.broadcast %cst_167 : f32 to vector<8x320xf32>
    %541 = arith.subf %540, %442 : vector<8x320xf32>
    %542 = math.exp %541 : vector<8x320xf32>
    %cst_168 = arith.constant 1.000000e+00 : f32
    %543 = vector.broadcast %cst_168 : f32 to vector<8x320xf32>
    %544 = arith.addf %543, %542 : vector<8x320xf32>
    %545 = arith.divf %442, %544 : vector<8x320xf32>
    %546 = arith.mulf %545, %443 : vector<8x320xf32>
    %547 = arith.mulf %546, %539 : vector<8x320xf32>
    %548 = arith.truncf %547 : vector<8x320xf32> to vector<8x320xbf16>
    %c0_169 = arith.constant 0 : index
    %c0_170 = arith.constant 0 : index
    %549 = vector.load %arg7[%c0_169, %c0_170] : memref<320x128xbf16, #tpu.memory_space<vmem>>, vector<320x128xbf16>
    %cst_171 = arith.constant dense<0.000000e+00> : vector<8x128xf32>
    %550 = tpu.matmul %548, %549, %cst_171 {dimension_numbers = #tpu.dot_dimension_numbers<[1], [0], [0], [1], [0, 0, 1, 1], [], []>} : vector<8x320xbf16>, vector<320x128xbf16>, vector<8x128xf32> -> vector<8x128xf32>
    %cst_172 = arith.constant 5.000000e-01 : f32
    %551 = vector.broadcast %cst_172 : f32 to vector<8x128xf32>
    %552 = arith.mulf %550, %551 : vector<8x128xf32>
    %553 = arith.addf %424, %552 : vector<8x128xf32>
    %c0_173 = arith.constant 0 : index
    %c0_174 = arith.constant 0 : index
    %554 = vector.load %arg8[%c0_173, %c0_174] : memref<8x128xf32, #tpu.memory_space<vmem>>, vector<8x128xf32>
    tpu.vector_store %arg8[%c0_173, %c0_174], %553 {strides = array<i32>} : memref<8x128xf32, #tpu.memory_space<vmem>>, vector<8x128xf32>,
    return
  }
}

</mosaic_0001>

<bundles_post_ra>
// kernel: decoder_layer_forward.1
= control target key start
LH: loop header
LB: loop body
LE: loop exit
PB: predicated region body
PF: predicated region fallthrough
CT: control target
= control target key end

     0   :  { %13 = vsyncpa [#allocation3], 0  ;;  %s3765_s0 = inlined_call_operand.vmem [shape: f32[8,128], index: 0, kind: input, shape index: {}]   ;;  %s3766_s1 = inlined_call_operand.hbm [shape: f32[16,128], index: 1, kind: input, shape index: {}]   ;;  %s3767_s2 = inlined_call_operand.vmem [shape: f32[32,8], index: 2, kind: input, shape index: {}]   ;;  %s3768_s3 = inlined_call_operand.hbm [shape: bf16[64,384], index: 3, kind: input, shape index: {}]   ;;  %s3769_s4 = inlined_call_operand.hbm [shape: bf16[32,64], index: 4, kind: input, shape index: {}]   ;;  %s3770_s5 = inlined_call_operand.vmem [shape: bf16[128,128], index: 5, kind: input, shape index: {}]   ;;  %s3771_s6 = inlined_call_operand.hbm [shape: bf16[64,644], index: 6, kind: input, shape index: {}]   ;;  %s3772_s7 = inlined_call_operand.hbm [shape: bf16[320,128], index: 7, kind: input, shape index: {}]   ;;  %s3773_s8 = inlined_call_operand.vmem [shape: f32[8,128], index: 8, kind: output, shape index: {}]  }
   0x1   :  { %14 = vsyncpa [#allocation5], 0 }
   0x2   :  { %15 = vsyncpa [#allocation8], 0  ;;  %s2955_s27 = smov [#allocation4]  }
   0x3   :  { %s37_s28 = sshll.u32 %s2955_s27, 4  ;;  %s38_s28 = int_to_ptr.vmem [resolvable:$true] %s37_s28 }
   0x4   :  { %s2857_s29 = scalar_lea.vmem %s38_s28, 1536  ;;  %p2862_p1 = scmp.lt.s32.totalorder %s38_s28, %s38_s28 }
   0x5   :  { %p2858_p0 = scmp.ne.s32.totalorder %s38_s28, %s2857_s29  ;;  %p2863_p2 = scmp.lt.s32.totalorder %s2857_s29, %s2857_s29 }
   0x7   :  { %p2864_p3 = por %p2863_p2, %p2862_p1 }
   0x9   :  { %p2865_p4 = pnand %p2864_p3, %p2858_p0 }
   0xb   :  { %2868 = shalt.err (!%p2865_p4)
}
   0xc   :  { %s2956_s30 = smov 192   ;;  %s2957_s9 = smov 12  }
   0xd   :  { %43 = dma.hbm_to_vmem [thread:$0]  %s3768_s3, 1536, %s38_s28, [#allocation5], %s2956_s30, %s2956_s30, %s2957_s9  }
   0xe   :  { %s2958_s12 = smov [#allocation7]  }
   0xf   :  { %s63_s13 = sshll.u32 %s2958_s12, 4  ;;  %s64_s13 = int_to_ptr.vmem [resolvable:$true] %s63_s13 }
  0x10   :  { %s2877_s14 = scalar_lea.vmem %s64_s13, 3072  ;;  %p2882_p6 = scmp.lt.s32.totalorder %s64_s13, %s64_s13 }
  0x11   :  { %p2878_p5 = scmp.ne.s32.totalorder %s64_s13, %s2877_s14  ;;  %p2883_p7 = scmp.lt.s32.totalorder %s2877_s14, %s2877_s14 }
  0x13   :  { %p2884_p8 = por %p2883_p7, %p2882_p6 }
  0x15   :  { %p2885_p9 = pnand %p2884_p8, %p2878_p5 }
  0x17   :  { %2888 = shalt.err (!%p2885_p9)
}
  0x18   :  { %s2959_s15 = smov 384   ;;  %s2960_s16 = smov 24  }
  0x19   :  { %69 = dma.hbm_to_vmem [thread:$0]  %s3771_s6, 3072, %s64_s13, [#allocation8], %s2959_s15, %s2959_s15, %s2960_s16  }
  0x1a   :  { %s2961_s19 = smov [#allocation2]  }
  0x1b   :  { %s23_s20 = sshll.u32 %s2961_s19, 4  ;;  %s24_s20 = int_to_ptr.vmem [resolvable:$true] %s23_s20 }
  0x1c   :  { %s2897_s3 = scalar_lea.vmem %s24_s20, 256  ;;  %p2902_p11 = scmp.lt.s32.totalorder %s24_s20, %s24_s20 }
  0x1d   :  { %p2898_p10 = scmp.ne.s32.totalorder %s24_s20, %s2897_s3  ;;  %p2903_p12 = scmp.lt.s32.totalorder %s2897_s3, %s2897_s3 }
  0x1f   :  { %p2904_p13 = por %p2903_p12, %p2902_p11 }
  0x21   :  { %p2905_p0 = pnand %p2904_p13, %p2898_p10 }
  0x23   :  { %2908 = shalt.err (!%p2905_p0)
}
  0x24   :  { %s2962_s21 = smov 128   ;;  %s2963_s22 = smov 8  }
  0x25   :  { %29 = dma.hbm_to_vmem [thread:$0]  %s3766_s1, 256, %s24_s20, [#allocation3], %s2962_s21, %s2962_s21, %s2963_s22  }
  0x26   :  { %s2964_s25 = smov [#allocation6]  }
  0x27   :  { %s49_s26 = sshll.u32 %s2964_s25, 4  ;;  %s50_s26 = int_to_ptr.vmem [resolvable:$true] %s49_s26 }
  0x28   :  { %s2917_s6 = scalar_lea.vmem %s50_s26, 256  ;;  %p2922_p2 = scmp.lt.s32.totalorder %s50_s26, %s50_s26 }
  0x29   :  { %p2918_p1 = scmp.ne.s32.totalorder %s50_s26, %s2917_s6  ;;  %p2923_p3 = scmp.lt.s32.totalorder %s2917_s6, %s2917_s6 }
  0x2b   :  { %p2924_p4 = por %p2923_p3, %p2922_p2 }
  0x2d   :  { %p2925_p5 = pnand %p2924_p4, %p2918_p1 }
  0x2f   :  { %2928 = shalt.err (!%p2925_p5)
}
  0x30   :  { %s2965_s27 = smov 64   ;;  %s2966_s28 = smov 4  }
  0x31   :  { %55 = dma.hbm_to_vmem [thread:$0]  %s3769_s4, 256, %s50_s26, [#allocation5], %s2965_s27, %s2965_s27, %s2966_s28  }
  0x32   :  { %s2967_s1 = smov [#allocation9]  }
  0x33   :  { %s75_s9 = sshll.u32 %s2967_s1, 4  ;;  %s76_s9 = int_to_ptr.vmem [resolvable:$true] %s75_s9 }
  0x34   :  { %s2937_s10 = scalar_lea.vmem %s76_s9, 2560  ;;  %p2942_p7 = scmp.lt.s32.totalorder %s76_s9, %s76_s9 }
  0x35   :  { %p2938_p6 = scmp.ne.s32.totalorder %s76_s9, %s2937_s10  ;;  %p2943_p8 = scmp.lt.s32.totalorder %s2937_s10, %s2937_s10 }
  0x37   :  { %p2944_p9 = por %p2943_p8, %p2942_p7 }
  0x39   :  { %p2945_p10 = pnand %p2944_p9, %p2938_p6 }
  0x3b   :  { %2948 = shalt.err (!%p2945_p10)
}
  0x3c   :  { %81 = dma.hbm_to_vmem [thread:$0]  %s3772_s7, 2560, %s76_s9, [#allocation8], %s2965_s27, %s2965_s27, %s2966_s28  }
  0x3d   :  { %2949 = dma.done.wait [#allocation3], 256  }
  0x3e   :  { %2950 = vsyncadd [#allocation3], 4294967040 }
  0x3f   :  { %2951 = dma.done.wait [#allocation5], 1792  }
  0x40   :  { %2952 = vsyncadd [#allocation5], 4294965504 }
  0x41   :  { %2953 = dma.done.wait [#allocation8], 5632  }
  0x42   :  { %2954 = vsyncadd [#allocation8], 4294961664  ;;  %v98_v0 = vld [vmem:[%s3765_s0] sm:$0xff]  ;;  %vm100_vm0 = vcmask 523264   ;;  %v2596_v3 = vld [vmem:[#allocation4 + $0x4c] ss:$12 sps:$4 sm:$0xff]   ;;  %v349_v28 = vlaneseq }
  0x43   :  { %v99_v1 = vmul.f32 %v98_v0, %v98_v0  ;;  %v2598_v4 = vld [vmem:[#allocation4 + $0x48] ss:$12 sps:$4 sm:$0xff]   ;;  %v2968_v5 = vmov 0.0   ;;  %v2599_v6 = vld [vmem:[#allocation4 + $0x50] ss:$12 sps:$4 sm:$0xff]   ;;  %v2969_v8 = vmov 0   ;;  %207 = vmatprep.subr.bf16.mxu0 %v2596_v3 }
  0x44   :  { %2512 = vmatprep.subr.bf16.mxu1 %v2968_v5  ;;  %v2600_v7 = vld [vmem:[#allocation4 + $0x34] ss:$12 sps:$4 sm:$0xff]   ;;  %231 = vmatprep.mubr.bf16.mxu0 %v2969_v8  ;;  %v2602_v9 = vld [vmem:[#allocation4 + $0x30] ss:$12 sps:$4 sm:$0xff]   ;;  %v2603_v10 = vld [vmem:[#allocation4 + $0x38] ss:$12 sps:$4 sm:$0xff]  }
  0x45   :  { %v101_v2 = vsel %vm100_vm0, %v99_v1, 0.0  ;;  %208 = vmatpush1.bf16.msra.mxu0 %v2598_v4  ;;  %2513 = vmatpush3.bf16.msra.mxu1 %v2599_v6  ;;  %v2604_v11 = vld [vmem:[#allocation4 + $0x1c] ss:$12 sps:$4 sm:$0xff]   ;;  %v2606_v12 = vld [vmem:[#allocation4 + $0x18] ss:$12 sps:$4 sm:$0xff]   ;;  %vm2970_vm1 = vmmov 0  }
  0x46   :  { %102 = vadd.xlane.f32.xlu0 %v101_v2  ;;  %209 = vmatprep.subr.bf16.mxu0 %v2600_v7  ;;  %v2607_v13 = vld [vmem:[#allocation4 + $0x20] ss:$12 sps:$4 sm:$0xff]   ;;  %v2608_v14 = vld [vmem:[#allocation4 + $0x4] ss:$12 sps:$4 sm:$0xff]   ;;  %v2611_v16 = vld [vmem:[#allocation4 + $0x8] ss:$12 sps:$4 sm:$0xff]  }
  0x47   :  { %2514 = vmatprep.subr.bf16.mxu1 %v2968_v5  ;;  %2520 = vmatprep.mubr.msk.bf16.mxu1 %vm2970_vm1, %v2968_v5  ;;  %v2610_v15 = vld [vmem:[#allocation4] ss:$12 sps:$4 sm:$0xff]   ;;  %v2383_v21 = vld [vmem:[#allocation2] ss:$0 sm:$0xff]  ;;  %v2407_v29 = vld [vmem:[#allocation2 + $0x5] ss:$0 sm:$0xff] }
  0x48   :  { %v2612_v24 = vld [vmem:[#allocation6] sm:$0xff]   ;;  %v2613_v27 = vld [vmem:[#allocation6 + $0x8] sm:$0xff]   ;;  %v3070_v30 = vshrl.u32 %v349_v28, 7  ;;  %v2402_v33 = vld [vmem:[#allocation2 + $0xa] ss:$0 sm:$0xff]  ;;  %s2971_s7 = smov 1  }
  0x49   :  { %210 = vmatpush1.bf16.msra.mxu0 %v2602_v9  ;;  %2515 = vmatpush3.bf16.msra.mxu1 %v2603_v10  ;;  %v2403_v36 = vld [vmem:[#allocation2 + $0x3] ss:$0 sm:$0xff]  ;;  %v2404_v41 = vld [vmem:[#allocation2 + $0x7] ss:$0 sm:$0xff]  ;;  %v2405_v50 = vld [vmem:[#allocation2 + $0x8] ss:$0 sm:$0xff] }
  0x4a   :  { %211 = vmatprep.subr.bf16.mxu0 %v2604_v11  ;;  %2516 = vmatprep.subr.bf16.mxu1 %v2968_v5  ;;  %vm363_vm2 = vcmp.ge.s32.totalorder %v3070_v30, 3  ;;  %vm373_vm3 = vcmp.ge.s32.totalorder %v3070_v30, 2  ;;  %vm383_vm4 = vcmp.ge.s32.totalorder %v3070_v30, 1  ;;  %v2406_v56 = vld [vmem:[#allocation2 + $0x9] ss:$0 sm:$0xff]  ;;  %s2972_s14 = smov 2  }
  0x4b   :  { %s2973_s15 = smov 127   ;;  %s2974_s16 = smov 126   ;;  %vm533_vm5 = vcmp.eq.s32.totalorder %v3070_v30, 0  ;;  %vm654_vm6 = vcmp.eq.s32.totalorder %v3070_v30, 1  ;;  %vm791_vm7 = vcmp.eq.s32.totalorder %v3070_v30, 2  ;;  %vm932_vm8 = vcmp.eq.s32.totalorder %v3070_v30, 3 }
  0x4c   :  { %s2975_s17 = smov 3   ;;  %s2976_s18 = smov 125   ;;  %vm1085_vm9 = vcmp.eq.s32.totalorder %v3070_v30, 4  ;;  %vm1238_vm10 = vcmp.eq.s32.totalorder %v3070_v30, 5  ;;  %vm1391_vm11 = vcmp.eq.s32.totalorder %v3070_v30, 6  ;;  %vm1544_vm12 = vcmp.eq.s32.totalorder %v3070_v30, 7 }
  0x4d   :  { %212 = vmatpush1.bf16.msra.mxu0 %v2606_v12  ;;  %2517 = vmatpush3.bf16.msra.mxu1 %v2607_v13  ;;  %s2977_s19 = smov 124   ;;  %vm1969_vm13 = vcmask 31744  }
  0x4e   :  { %213 = vmatprep.subr.bf16.mxu0 %v2608_v14  ;;  %2518 = vmatprep.subr.bf16.mxu1 %v2968_v5 }
  0x51   :  { %214 = vmatpush1.bf16.msra.mxu0 %v2610_v15  ;;  %2519 = vmatpush3.bf16.msra.mxu1 %v2611_v16  ;;  %v3108_v15 = vld [vmem:[%s3767_s2 + $0x10] sm:$0xff] }
  0x52   :  { %2530 = vmatprep.subr.bf16.mxu1 %v2968_v5 }
  0xcf   :  { %v103_v17 = vpop.xlane.xlu0 %102 }
  0xd0   :  { %v105_v18 = vmul.f32 0.015625, %v103_v17 }
  0xd2   :  { %v106_v19 = vadd.f32 1e-06, %v105_v18 }
  0xd4   :  { %2678 = vrsqrt.f32 %v106_v19  ;;  %v3126_v19 = vld [vmem:[%s3767_s2] sm:$0xff] }
  0xe1   :  { %v2679_v20 = vpop.eup %2678 }
  0xe2   :  { %v108_v22 = vmul.f32 %v2679_v20, %v98_v0 }
  0xe4   :  { %v114_v23 = vmul.f32 %v2383_v21, %v108_v22  ;;  %v3137_v21 = vld [vmem:[%s3767_s2 + $0x18] sm:$0xff] }
  0xe6   :  { %v115_v25 = vpack.c.bf16 %v114_v23, %v114_v23  ;;  %v3149_v23 = vld [vmem:[%s3767_s2 + $0x8] sm:$0xff] }
  0xe8   :  { %2396 = vmatmul.mubr.msk.bf16.vlgmr.msra.gmra.mxu0 %vm100_vm0, %v115_v25  ;;  %2521 = vmatmul.mubr.msk.bf16.vlgmr.msra.gmra.mxu1 %vm100_vm0, %v115_v25  ;;  %v197_v26 = vsel %vm100_vm0, %v115_v25, 0 }
  0xe9   :  { %2562 = vmatprep.subr.msk.bf16.mxu0 %vm100_vm0, %v115_v25  ;;  %2526 = vmatprep.mubr.msk.bf16.mxu0 %vm100_vm0, %v2612_v24 }
  0xea   :  { %2525 = vmatpush3.bf16.xpose.msra.mxu0 %v197_v26  ;;  %2546 = vmatprep.mubr.msk.bf16.mxu1 %vm2970_vm1, %v2968_v5 }
  0xf1   :  { %2527 = vmatmul.mubr.msk.bf16.vlgmr.msra.gmra.mxu0 %vm100_vm0, %v2613_v27 }
  0xf2   :  { %1875 = vmatprep.mubr.bf16.mxu0 %v2969_v8 }
 0x1a8   :  { %v3072_v31 = vpop.f32.mrf.mxu0  ;;  %v274_v32 = vpop.f32.mrf.mxu1 }
 0x1a9   :  { %v3074_v34 = vadd.f32 %v2407_v29, %v274_v32 }
 0x1aa   :  { %v235_v35 = vpop.f32.mrf.mxu0  ;;  %v2522_v37 = vpop.f32.mrf.mxu1 }
 0x1ab   :  { %v406_v38 = vand.u32 2147483647, %v3074_v34  ;;  %v357_v39 = vmul.f32 %v2402_v33, %v235_v35  ;;  %v364_v40 = vrot.slane %v235_v35, 5  ;;  %v374_v42 = vrot.slane %v235_v35, 6 }
 0x1ac   :  { %v384_v43 = vrot.slane %v235_v35, 7  ;;  %v237_v44 = vpop.f32.mrf.mxu0  ;;  %v277_v45 = vpop.f32.mrf.mxu1  ;;  %v405_v11 = vmax.f32 %v3074_v34, 0.0 }
 0x1ad   :  { %v407_v46 = vsub.f32 0.0, %v406_v38  ;;  %v362_v47 = vadd.f32 %v2403_v36, %v357_v39  ;;  %v365_v48 = vsel %vm363_vm2, %v364_v40, 0.0  ;;  %v375_v49 = vsel %vm373_vm3, %v374_v42, 0.0 }
 0x1ae   :  { %v238_v51 = vpop.f32.mrf.mxu0  ;;  %v2523_v52 = vpop.f32.mrf.mxu1  ;;  %v371_v54 = vmul.f32 %v2404_v41, %v365_v48  ;;  %v385_v55 = vsel %vm383_vm4, %v384_v43, 0.0  ;;  %v381_v58 = vmul.f32 %v2405_v50, %v375_v49 }
 0x1af   :  { %v408_v53 = vmul.f32 1.442695, %v407_v46  ;;  %v391_v61 = vmul.f32 %v2406_v56, %v385_v55 }
 0x1b0   :  { %v372_v57 = vadd.f32 %v371_v54, %v362_v47 }
 0x1b1   :  { %2680 = vpow2.f32 %v408_v53  ;;  %v2528_v59 = vpop.f32.mrf.mxu0 }
 0x1b2   :  { %660 = vrot.lane.b32.xlu0 %v2528_v59, %s2971_s7  ;;  %v382_v60 = vadd.f32 %v381_v58, %v372_v57  ;;  %v795_v18 = vmul.f32 %v2528_v59, %v3108_v15 }
 0x1b3   :  { %v334_v62 = vpop.f32.mrf.mxu0 }
 0x1b4   :  { %535 = vrot.lane.b32.xlu1 %v334_v62, %s2972_s14  ;;  %v392_v63 = vadd.f32 %v391_v61, %v382_v60  ;;  %v793_v20 = vmul.f32 %v3126_v19, %v334_v62  ;;  %v2978_v61 = vmov 4  }
 0x1b5   :  { %v2529_v3 = vpop.f32.mrf.mxu0  ;;  %2590 = vset.pattern.permute.xlu1 %v2978_v61  ;;  %2591 = vset.pattern.permute.xlu0 %v2978_v61 }
 0x1b6   :  { %938 = vrot.lane.b32.xlu0 %v2528_v59, %s2973_s15  ;;  %v393_v0 = vsub.f32 0.0, %v392_v63  ;;  %v796_v22 = vmul.f32 %v2529_v3, %v3137_v21 }
 0x1b7   :  { %v337_v17 = vpop.f32.mrf.mxu0 }
 0x1b8   :  { %656 = vrot.lane.b32.xlu1 %v334_v62, %s2971_s7  ;;  %v394_v1 = vmul.f32 1.442695, %v393_v0  ;;  %v794_v24 = vmul.f32 %v3149_v23, %v337_v17 }
 0x1ba   :  { %539 = vrot.lane.b32.xlu0 %v2528_v59, %s2972_s14  ;;  %2682 = vpow2.f32 %v394_v1 }
 0x1bc   :  { %934 = vrot.lane.b32.xlu1 %v334_v62, %s2973_s15 }
 0x1be   :  { %v2681_v2 = vpop.eup %2680  ;;  %1091 = vrot.lane.b32.xlu0 %v2528_v59, %s2974_s16 }
 0x1bf   :  { %v410_v4 = vadd.f32 1.0, %v2681_v2 }
 0x1c0   :  { %662 = vrot.lane.b32.xlu1 %v2529_v3, %s2971_s7 }
 0x1c1   :  { %2684 = vlog2.f32 %v410_v4 }
 0x1c2   :  { %435 = vrot.lane.b32.xlu0 %v2528_v59, %s2975_s17 }
 0x1c4   :  { %940 = vrot.lane.b32.xlu1 %v2529_v3, %s2973_s15 }
 0x1c6   :  { %1244 = vrot.lane.b32.xlu0 %v2528_v59, %s2976_s18 }
 0x1c7   :  { %v2683_v6 = vpop.eup %2682 }
 0x1c8   :  { %541 = vrot.lane.b32.xlu1 %v2529_v3, %s2972_s14  ;;  %v396_v7 = vadd.f32 1.0, %v2683_v6 }
 0x1ca   :  { %1397 = vrot.lane.b32.xlu0 %v2528_v59, %s2977_s19  ;;  %2686 = vrcp.f32 %v396_v7 }
 0x1cc   :  { %1093 = vrot.lane.b32.xlu1 %v2529_v3, %s2974_s16 }
 0x1ce   :  { %431 = vrot.lane.b32.xlu0 %v334_v62, %s2975_s17  ;;  %v2685_v9 = vpop.eup %2684 }
 0x1cf   :  { %v412_v10 = vmul.f32 0.6931472, %v2685_v9 }
 0x1d0   :  { %437 = vrot.lane.b32.xlu1 %v2529_v3, %s2975_s17 }
 0x1d1   :  { %v3101_v13 = vadd.f32 %v412_v10, %v405_v11 }
 0x1d2   :  { %1087 = vrot.lane.b32.xlu0 %v334_v62, %s2974_s16 }
 0x1d4   :  { %1246 = vrot.lane.b32.xlu1 %v2529_v3, %s2976_s18 }
 0x1d6   :  { %1240 = vrot.lane.b32.xlu0 %v334_v62, %s2976_s18 }
 0x1d7   :  { %v2687_v12 = vpop.eup %2686 }
 0x1d8   :  { %1399 = vrot.lane.b32.xlu1 %v2529_v3, %s2977_s19  ;;  %v3103_v14 = vmul.f32 %v2687_v12, %v392_v63 }
 0x1da   :  { %1393 = vrot.lane.b32.xlu0 %v334_v62, %s2977_s19  ;;  %v3113_v16 = vmul.f32 %v3101_v13, %v3103_v14 }
 0x1dc   :  { %433 = vrot.lane.b32.xlu1 %v337_v17, %s2975_s17 }
 0x1de   :  { %805 = vrot.lane.b32.xlu0 %v795_v18, %s2966_s28 }
 0x1e0   :  { %537 = vrot.lane.b32.xlu1 %v337_v17, %s2972_s14 }
 0x1e2   :  { %821 = vrot.lane.b32.xlu0 %v795_v18, %s2975_s17 }
 0x1e4   :  { %658 = vrot.lane.b32.xlu1 %v337_v17, %s2971_s7 }
 0x1e6   :  { %837 = vrot.lane.b32.xlu0 %v795_v18, %s2972_s14 }
 0x1e8   :  { %936 = vrot.lane.b32.xlu1 %v337_v17, %s2973_s15 }
 0x1ea   :  { %853 = vrot.lane.b32.xlu0 %v795_v18, %s2971_s7 }
 0x1ec   :  { %1089 = vrot.lane.b32.xlu1 %v337_v17, %s2974_s16 }
 0x1ee   :  { %801 = vrot.lane.b32.xlu0 %v793_v20, %s2966_s28 }
 0x1f0   :  { %1242 = vrot.lane.b32.xlu1 %v337_v17, %s2976_s18 }
 0x1f2   :  { %817 = vrot.lane.b32.xlu0 %v793_v20, %s2975_s17 }
 0x1f4   :  { %1395 = vrot.lane.b32.xlu1 %v337_v17, %s2977_s19 }
 0x1f6   :  { %833 = vrot.lane.b32.xlu0 %v793_v20, %s2972_s14 }
 0x1f8   :  { %807 = vrot.lane.b32.xlu1 %v796_v22, %s2966_s28 }
 0x1fa   :  { %849 = vrot.lane.b32.xlu0 %v793_v20, %s2971_s7 }
 0x1fc   :  { %823 = vrot.lane.b32.xlu1 %v796_v22, %s2975_s17 }
 0x200   :  { %839 = vrot.lane.b32.xlu1 %v796_v22, %s2972_s14 }
 0x204   :  { %855 = vrot.lane.b32.xlu1 %v796_v22, %s2971_s7 }
 0x208   :  { %803 = vrot.lane.b32.xlu1 %v794_v24, %s2966_s28 }
 0x20c   :  { %819 = vrot.lane.b32.xlu1 %v794_v24, %s2975_s17 }
 0x210   :  { %835 = vrot.lane.b32.xlu1 %v794_v24, %s2972_s14 }
 0x214   :  { %851 = vrot.lane.b32.xlu1 %v794_v24, %s2971_s7 }
 0x224   :  { %v661_v25 = vpop.permute.xlu0 %660 }
 0x225   :  { %v670_v26 = vmul.f32 %v661_v25, %v3108_v15 }
 0x226   :  { %v3158_v27 = vpop.permute.xlu1 %535 }
 0x227   :  { %680 = vrot.lane.b32.xlu0 %v670_v26, %s2975_s17  ;;  %v547_v18 = vmul.f32 %v3158_v27, %v3126_v19 }
 0x228   :  { %v939_v29 = vpop.permute.xlu0 %938 }
 0x229   :  { %v3162_v32 = vmul.f32 %v939_v29, %v3108_v15 }
 0x22a   :  { %v3164_v33 = vpop.permute.xlu1 %656 }
 0x22b   :  { %958 = vrot.lane.b32.xlu0 %v3162_v32, %s2966_s28  ;;  %v668_v25 = vmul.f32 %v3164_v33, %v3126_v19 }
 0x22c   :  { %v540_v34 = vpop.permute.xlu0 %539 }
 0x22d   :  { %v549_v35 = vmul.f32 %v540_v34, %v3108_v15 }
 0x22e   :  { %v3169_v36 = vpop.permute.xlu1 %934 }
 0x22f   :  { %559 = vrot.lane.b32.xlu0 %v549_v35, %s2972_s14  ;;  %v946_v33 = vmul.f32 %v3169_v36, %v3126_v19 }
 0x230   :  { %v1092_v37 = vpop.permute.xlu0 %1091 }
 0x231   :  { %v3173_v38 = vmul.f32 %v1092_v37, %v3108_v15 }
 0x232   :  { %v663_v39 = vpop.permute.xlu1 %662 }
 0x233   :  { %v671_v40 = vmul.f32 %v663_v39, %v3137_v21  ;;  %1111 = vrot.lane.b32.xlu0 %v3173_v38, %s2966_s28 }
 0x234   :  { %v436_v41 = vpop.permute.xlu0 %435 }
 0x235   :  { %v445_v42 = vmul.f32 %v436_v41, %v3108_v15  ;;  %682 = vrot.lane.b32.xlu1 %v671_v40, %s2975_s17 }
 0x236   :  { %v941_v43 = vpop.permute.xlu1 %940 }
 0x237   :  { %v949_v44 = vmul.f32 %v941_v43, %v3137_v21  ;;  %455 = vrot.lane.b32.xlu0 %v445_v42, %s2971_s7 }
 0x238   :  { %v1245_v47 = vpop.permute.xlu0 %1244 }
 0x239   :  { %960 = vrot.lane.b32.xlu1 %v949_v44, %s2966_s28  ;;  %v1254_v50 = vmul.f32 %v1245_v47, %v3108_v15 }
 0x23a   :  { %v542_v45 = vpop.permute.xlu1 %541 }
 0x23b   :  { %v550_v46 = vmul.f32 %v542_v45, %v3137_v21  ;;  %696 = vrot.lane.b32.xlu0 %v670_v26, %s2972_s14 }
 0x23c   :  { %v1398_v54 = vpop.permute.xlu0 %1397 }
 0x23d   :  { %561 = vrot.lane.b32.xlu1 %v550_v46, %s2972_s14  ;;  %v3199_v56 = vmul.f32 %v1398_v54, %v3108_v15 }
 0x23e   :  { %v1094_v48 = vpop.permute.xlu1 %1093 }
 0x23f   :  { %v1102_v49 = vmul.f32 %v1094_v48, %v3137_v21  ;;  %974 = vrot.lane.b32.xlu0 %v3162_v32, %s2975_s17 }
 0x240   :  { %v432_v59 = vpop.permute.xlu0 %431 }
 0x241   :  { %1113 = vrot.lane.b32.xlu1 %v1102_v49, %s2966_s28  ;;  %v443_v12 = vmul.f32 %v432_v59, %v3126_v19 }
 0x242   :  { %v438_v51 = vpop.permute.xlu1 %437 }
 0x243   :  { %v446_v52 = vmul.f32 %v438_v51, %v3137_v21  ;;  %1264 = vrot.lane.b32.xlu0 %v1254_v50, %s2966_s28 }
 0x244   :  { %v3210_v62 = vpop.permute.xlu0 %1087 }
 0x245   :  { %457 = vrot.lane.b32.xlu1 %v446_v52, %s2971_s7  ;;  %v1099_v36 = vmul.f32 %v3210_v62, %v3126_v19 }
 0x246   :  { %v1247_v53 = vpop.permute.xlu1 %1246 }
 0x247   :  { %575 = vrot.lane.b32.xlu0 %v549_v35, %s2971_s7  ;;  %v1255_v57 = vmul.f32 %v1247_v53, %v3137_v21 }
 0x248   :  { %v3219_v1 = vpop.permute.xlu0 %1240 }
 0x249   :  { %698 = vrot.lane.b32.xlu1 %v671_v40, %s2972_s14  ;;  %v1252_v62 = vmul.f32 %v3219_v1, %v3126_v19 }
 0x24a   :  { %v1400_v55 = vpop.permute.xlu1 %1399 }
 0x24b   :  { %1127 = vrot.lane.b32.xlu0 %v3173_v38, %s2975_s17  ;;  %v3214_v63 = vmul.f32 %v1400_v55, %v3137_v21 }
 0x24c   :  { %v3226_v3 = vpop.permute.xlu0 %1393 }
 0x24d   :  { %976 = vrot.lane.b32.xlu1 %v949_v44, %s2975_s17 }
 0x24e   :  { %v434_v58 = vpop.permute.xlu1 %433 }
 0x24f   :  { %1417 = vrot.lane.b32.xlu0 %v3199_v56, %s2966_s28  ;;  %v444_v27 = vmul.f32 %v434_v58, %v3149_v23 }
 0x250   :  { %v3234_v6 = vpop.permute.xlu0 %805 }
 0x251   :  { %1266 = vrot.lane.b32.xlu1 %v1255_v57, %s2966_s28 }
 0x252   :  { %v538_v60 = vpop.permute.xlu1 %537 }
 0x253   :  { %712 = vrot.lane.b32.xlu0 %v670_v26, %s2971_s7 }
 0x254   :  { %v3242_v9 = vpop.permute.xlu0 %821 }
 0x255   :  { %577 = vrot.lane.b32.xlu1 %v550_v46, %s2971_s7 }
 0x256   :  { %v659_v0 = vpop.permute.xlu1 %658 }
 0x257   :  { %990 = vrot.lane.b32.xlu0 %v3162_v32, %s2972_s14 }
 0x258   :  { %v3251_v11 = vpop.permute.xlu0 %837 }
 0x259   :  { %1129 = vrot.lane.b32.xlu1 %v1102_v49, %s2975_s17 }
 0x25a   :  { %v937_v2 = vpop.permute.xlu1 %936 }
 0x25b   :  { %1280 = vrot.lane.b32.xlu0 %v1254_v50, %s2975_s17 }
 0x25c   :  { %v3259_v20 = vpop.permute.xlu0 %853 }
 0x25d   :  { %1419 = vrot.lane.b32.xlu1 %v3214_v63, %s2966_s28 }
 0x25e   :  { %v3229_v4 = vpop.permute.xlu1 %1089 }
 0x25f   :  { %1143 = vrot.lane.b32.xlu0 %v3173_v38, %s2972_s14 }
 0x260   :  { %v3265_v24 = vpop.permute.xlu0 %801 }
 0x261   :  { %714 = vrot.lane.b32.xlu1 %v671_v40, %s2971_s7  ;;  %v813_v1 = vadd.f32 %v3265_v24, %v3126_v19 }
 0x262   :  { %v3237_v7 = vpop.permute.xlu1 %1242 }
 0x263   :  { %1433 = vrot.lane.b32.xlu0 %v3199_v56, %s2975_s17 }
 0x264   :  { %v3273_v29 = vpop.permute.xlu0 %817 }
 0x265   :  { %992 = vrot.lane.b32.xlu1 %v949_v44, %s2972_s14 }
 0x266   :  { %v3246_v10 = vpop.permute.xlu1 %1395 }
 0x267   :  { %1006 = vrot.lane.b32.xlu0 %v3162_v32, %s2971_s7  ;;  %v548_v32 = vmul.f32 %v538_v60, %v3149_v23  ;;  %v1100_v60 = vmul.f32 %v3229_v4, %v3149_v23 }
 0x268   :  { %v834_v35 = vpop.permute.xlu0 %833 }
 0x269   :  { %1282 = vrot.lane.b32.xlu1 %v1255_v57, %s2975_s17 }
 0x26a   :  { %v808_v17 = vpop.permute.xlu1 %807 }
 0x26b   :  { %1296 = vrot.lane.b32.xlu0 %v1254_v50, %s2972_s14  ;;  %v816_v45 = vadd.f32 %v808_v17, %v3137_v21 }
 0x26c   :  { %v850_v39 = vpop.permute.xlu0 %849 }
 0x26d   :  { %1145 = vrot.lane.b32.xlu1 %v1102_v49, %s2972_s14 }
 0x26e   :  { %v824_v22 = vpop.permute.xlu1 %823 }
 0x26f   :  { %1159 = vrot.lane.b32.xlu0 %v3173_v38, %s2971_s7  ;;  %v669_v38 = vmul.f32 %v659_v0, %v3149_v23  ;;  %v832_v46 = vadd.f32 %v824_v22, %v816_v45  ;;  %v815_v0 = vadd.f32 %v3234_v6, %v3108_v15 }
 0x271   :  { %1435 = vrot.lane.b32.xlu1 %v3214_v63, %s2975_s17 }
 0x272   :  { %v840_v26 = vpop.permute.xlu1 %839 }
 0x273   :  { %1449 = vrot.lane.b32.xlu0 %v3199_v56, %s2972_s14  ;;  %v848_v48 = vadd.f32 %v840_v26, %v832_v46 }
 0x275   :  { %1008 = vrot.lane.b32.xlu1 %v949_v44, %s2971_s7  ;;  %v947_v44 = vmul.f32 %v937_v2, %v3149_v23 }
 0x276   :  { %v856_v34 = vpop.permute.xlu1 %855 }
 0x277   :  { %1312 = vrot.lane.b32.xlu0 %v1254_v50, %s2971_s7  ;;  %v3302_v51 = vadd.f32 %v856_v34, %v848_v48 }
 0x279   :  { %1298 = vrot.lane.b32.xlu1 %v1255_v57, %s2972_s14 }
 0x27a   :  { %v804_v37 = vpop.permute.xlu1 %803 }
 0x27b   :  { %451 = vrot.lane.b32.xlu0 %v443_v12, %s2971_s7 }
 0x27d   :  { %1161 = vrot.lane.b32.xlu1 %v1102_v49, %s2971_s7  ;;  %v814_v49 = vadd.f32 %v804_v37, %v3149_v23 }
 0x27e   :  { %v820_v40 = vpop.permute.xlu1 %819 }
 0x27f   :  { %555 = vrot.lane.b32.xlu0 %v547_v18, %s2972_s14  ;;  %v830_v52 = vadd.f32 %v820_v40, %v814_v49  ;;  %v1405_v40 = vmul.f32 %v3226_v3, %v3126_v19 }
 0x281   :  { %1451 = vrot.lane.b32.xlu1 %v3214_v63, %s2972_s14 }
 0x282   :  { %v836_v42 = vpop.permute.xlu1 %835 }
 0x283   :  { %571 = vrot.lane.b32.xlu0 %v547_v18, %s2971_s7  ;;  %v846_v54 = vadd.f32 %v836_v42, %v830_v52  ;;  %v831_v18 = vadd.f32 %v3242_v9, %v815_v0  ;;  %v829_v9 = vadd.f32 %v3273_v29, %v813_v1 }
 0x285   :  { %1314 = vrot.lane.b32.xlu1 %v1255_v57, %s2971_s7  ;;  %v868_v57 = vsub.f32 0.0, %v3302_v51  ;;  %v847_v22 = vadd.f32 %v3251_v11, %v831_v18 }
 0x286   :  { %v852_v50 = vpop.permute.xlu1 %851 }
 0x287   :  { %676 = vrot.lane.b32.xlu0 %v668_v25, %s2975_s17  ;;  %v3311_v58 = vadd.f32 %v852_v50, %v846_v54  ;;  %v875_v2 = vmul.f32 1.442695, %v868_v57  ;;  %v3338_v26 = vadd.f32 %v3259_v20, %v847_v22 }
 0x289   :  { %453 = vrot.lane.b32.xlu1 %v444_v27, %s2971_s7  ;;  %v866_v12 = vsub.f32 0.0, %v3311_v58  ;;  %2688 = vpow2.f32 %v875_v2  ;;  %v867_v24 = vsub.f32 0.0, %v3338_v26 }
 0x28b   :  { %692 = vrot.lane.b32.xlu0 %v668_v25, %s2972_s14  ;;  %v871_v6 = vmul.f32 1.442695, %v866_v12  ;;  %v873_v29 = vmul.f32 1.442695, %v867_v24 }
 0x28d   :  { %557 = vrot.lane.b32.xlu1 %v548_v32, %s2972_s14  ;;  %2690 = vpow2.f32 %v871_v6 }
 0x28e   :  { %2692 = vpow2.f32 %v873_v29 }
 0x28f   :  { %708 = vrot.lane.b32.xlu0 %v668_v25, %s2971_s7 }
 0x291   :  { %573 = vrot.lane.b32.xlu1 %v548_v32, %s2971_s7  ;;  %v845_v32 = vadd.f32 %v834_v35, %v829_v9  ;;  %v1253_v35 = vmul.f32 %v3237_v7, %v3149_v23 }
 0x293   :  { %954 = vrot.lane.b32.xlu0 %v946_v33, %s2966_s28  ;;  %v3348_v34 = vadd.f32 %v850_v39, %v845_v32 }
 0x295   :  { %678 = vrot.lane.b32.xlu1 %v669_v38, %s2975_s17  ;;  %v865_v37 = vsub.f32 0.0, %v3348_v34 }
 0x297   :  { %970 = vrot.lane.b32.xlu0 %v946_v33, %s2975_s17  ;;  %v869_v7 = vmul.f32 1.442695, %v865_v37 }
 0x299   :  { %v3287_v41 = vpop.permute.xlu0 %680  ;;  %694 = vrot.lane.b32.xlu1 %v669_v38, %s2972_s14  ;;  %2694 = vpow2.f32 %v869_v7 }
 0x29b   :  { %986 = vrot.lane.b32.xlu0 %v946_v33, %s2972_s14 }
 0x29d   :  { %v3293_v43 = vpop.permute.xlu0 %958  ;;  %710 = vrot.lane.b32.xlu1 %v669_v38, %s2971_s7 }
 0x29f   :  { %1107 = vrot.lane.b32.xlu0 %v1099_v36, %s2966_s28 }
 0x2a1   :  { %v560_v47 = vpop.permute.xlu0 %559  ;;  %956 = vrot.lane.b32.xlu1 %v947_v44, %s2966_s28 }
 0x2a3   :  { %1002 = vrot.lane.b32.xlu0 %v946_v33, %s2971_s7 }
 0x2a5   :  { %v3304_v53 = vpop.permute.xlu0 %1111  ;;  %972 = vrot.lane.b32.xlu1 %v947_v44, %s2975_s17 }
 0x2a7   :  { %1123 = vrot.lane.b32.xlu0 %v1099_v36, %s2975_s17  ;;  %v3308_v55 = vpop.permute.xlu1 %682 }
 0x2a9   :  { %v456_v59 = vpop.permute.xlu0 %455  ;;  %988 = vrot.lane.b32.xlu1 %v947_v44, %s2972_s14 }
 0x2aa   :  { %v3358_v38 = vadd.f32 %v456_v59, %v3108_v15 }
 0x2ab   :  { %1139 = vrot.lane.b32.xlu0 %v1099_v36, %s2972_s14  ;;  %v3317_v61 = vpop.permute.xlu1 %960 }
 0x2ac   :  { %v469_v45 = vsub.f32 0.0, %v3358_v38 }
 0x2ad   :  { %v3324_v17 = vpop.permute.xlu0 %696  ;;  %1109 = vrot.lane.b32.xlu1 %v1100_v60, %s2966_s28 }
 0x2af   :  { %1260 = vrot.lane.b32.xlu0 %v1252_v62, %s2966_s28  ;;  %v3329_v4 = vpop.permute.xlu1 %561 }
 0x2b1   :  { %v3334_v25 = vpop.permute.xlu0 %974  ;;  %1004 = vrot.lane.b32.xlu1 %v947_v44, %s2971_s7  ;;  %v2689_v44 = vpop.eup %2688 }
 0x2b2   :  { %v880_v49 = vadd.f32 1.0, %v2689_v44  ;;  %v2691_v3 = vpop.eup %2690 }
 0x2b3   :  { %1155 = vrot.lane.b32.xlu0 %v1099_v36, %s2971_s7  ;;  %v3342_v27 = vpop.permute.xlu1 %1113  ;;  %v569_v36 = vadd.f32 %v560_v47, %v3108_v15  ;;  %v475_v47 = vmul.f32 1.442695, %v469_v45  ;;  %v878_v57 = vadd.f32 1.0, %v2691_v3  ;;  %v2693_v18 = vpop.eup %2692 }
 0x2b4   :  { %2696 = vrcp.f32 %v880_v49  ;;  %v879_v1 = vadd.f32 1.0, %v2693_v18  ;;  %v2695_v9 = vpop.eup %2694 }
 0x2b5   :  { %v3344_v11 = vpop.permute.xlu0 %1264  ;;  %1125 = vrot.lane.b32.xlu1 %v1100_v60, %s2975_s17  ;;  %2698 = vpow2.f32 %v475_v47  ;;  %v877_v24 = vadd.f32 1.0, %v2695_v9 }
 0x2b6   :  { %2700 = vrcp.f32 %v878_v57 }
 0x2b7   :  { %1276 = vrot.lane.b32.xlu0 %v1252_v62, %s2975_s17  ;;  %v3351_v20 = vpop.permute.xlu1 %457 }
 0x2b9   :  { %v576_v33 = vpop.permute.xlu0 %575  ;;  %1141 = vrot.lane.b32.xlu1 %v1100_v60, %s2972_s14 }
 0x2ba   :  { %v3370_v46 = vadd.f32 %v576_v33, %v569_v36 }
 0x2bb   :  { %1292 = vrot.lane.b32.xlu0 %v1252_v62, %s2972_s14  ;;  %v3361_v39 = vpop.permute.xlu1 %698 }
 0x2bc   :  { %v589_v52 = vsub.f32 0.0, %v3370_v46 }
 0x2bd   :  { %v3366_v42 = vpop.permute.xlu0 %1127  ;;  %1262 = vrot.lane.b32.xlu1 %v1253_v35, %s2966_s28 }
 0x2be   :  { %v595_v0 = vmul.f32 1.442695, %v589_v52 }
 0x2bf   :  { %1413 = vrot.lane.b32.xlu0 %v1405_v40, %s2966_s28  ;;  %v3373_v48 = vpop.permute.xlu1 %976 }
 0x2c0   :  { %2702 = vpow2.f32 %v595_v0  ;;  %v3431_v0 = vadd.f32 %v3351_v20, %v3137_v21  ;;  %v690_v20 = vadd.f32 %v3287_v41, %v3108_v15 }
 0x2c1   :  { %v3375_v50 = vpop.permute.xlu0 %1417  ;;  %1157 = vrot.lane.b32.xlu1 %v1100_v60, %s2971_s7  ;;  %2704 = vrcp.f32 %v879_v1 }
 0x2c2   :  { %2706 = vrcp.f32 %v877_v24  ;;  %v470_v24 = vsub.f32 0.0, %v3431_v0 }
 0x2c3   :  { %1308 = vrot.lane.b32.xlu0 %v1252_v62, %s2971_s7  ;;  %v3380_v54 = vpop.permute.xlu1 %1266  ;;  %v1406_v62 = vmul.f32 %v3246_v10, %v3149_v23  ;;  %v2697_v10 = vpop.eup %2696 }
 0x2c4   :  { %v2699_v29 = vpop.eup %2698  ;;  %v888_v37 = vmul.f32 %v2697_v10, %v3302_v51 }
 0x2c5   :  { %v3382_v59 = vpop.permute.xlu0 %712  ;;  %1278 = vrot.lane.b32.xlu1 %v1253_v35, %s2975_s17  ;;  %v481_v44 = vadd.f32 1.0, %v2699_v29 }
 0x2c7   :  { %1429 = vrot.lane.b32.xlu0 %v1405_v40, %s2975_s17  ;;  %v578_v60 = vpop.permute.xlu1 %577  ;;  %2708 = vrcp.f32 %v481_v44  ;;  %v477_v44 = vmul.f32 1.442695, %v470_v24  ;;  %v968_v24 = vadd.f32 %v3293_v43, %v3108_v15  ;;  %v1121_v43 = vadd.f32 %v3304_v53, %v3108_v15 }
 0x2c9   :  { %v3386_v2 = vpop.permute.xlu0 %990  ;;  %1294 = vrot.lane.b32.xlu1 %v1253_v35, %s2972_s14 }
 0x2cb   :  { %1445 = vrot.lane.b32.xlu0 %v1405_v40, %s2972_s14  ;;  %v3392_v12 = vpop.permute.xlu1 %1129 }
 0x2cd   :  { %v3394_v22 = vpop.permute.xlu0 %1280  ;;  %1415 = vrot.lane.b32.xlu1 %v1406_v62, %s2966_s28 }
 0x2cf   :  { %1461 = vrot.lane.b32.xlu0 %v1405_v40, %s2971_s7  ;;  %v3398_v6 = vpop.permute.xlu1 %1419  ;;  %v2701_v40 = vpop.eup %2700 }
 0x2d0   :  { %v2703_v7 = vpop.eup %2702  ;;  %v884_v45 = vmul.f32 %v2701_v40, %v3311_v58  ;;  %v706_v40 = vadd.f32 %v3324_v17, %v690_v20 }
 0x2d1   :  { %v3400_v32 = vpop.permute.xlu0 %1143  ;;  %1310 = vrot.lane.b32.xlu1 %v1253_v35, %s2971_s7  ;;  %v2705_v52 = vpop.eup %2704 }
 0x2d2   :  { %v886_v58 = vmul.f32 %v2705_v52, %v3338_v26  ;;  %v2707_v1 = vpop.eup %2706 }
 0x2d3   :  { %1465 = vrot.lane.b32.xlu0 %v3199_v56, %s2971_s7  ;;  %v3405_v33 = vpop.permute.xlu1 %714  ;;  %v601_v56 = vadd.f32 1.0, %v2703_v7  ;;  %v882_v10 = vmul.f32 %v2707_v1, %v3348_v34  ;;  %v691_v1 = vadd.f32 %v3308_v55, %v3137_v21 }
 0x2d4   :  { %v2709_v29 = vpop.eup %2708 }
 0x2d5   :  { %v3408_v36 = vpop.permute.xlu0 %1433  ;;  %1431 = vrot.lane.b32.xlu1 %v1406_v62, %s2975_s17  ;;  %2710 = vrcp.f32 %v601_v56 }
 0x2d6   :  { %2712 = vpow2.f32 %v477_v44 }
 0x2d7   :  { %920 = vperm.xlu0 %2591, %v888_v37   ;;  %v3411_v35 = vpop.permute.xlu1 %992 }
 0x2d9   :  { %v3414_v49 = vpop.permute.xlu0 %1006  ;;  %1447 = vrot.lane.b32.xlu1 %v1406_v62, %s2972_s14 }
 0x2db   :  { %902 = vperm.xlu0 %2591, %v884_v45   ;;  %v3417_v51 = vpop.permute.xlu1 %1282  ;;  %v3455_v45 = vadd.f32 %v3382_v59, %v706_v40 }
 0x2dd   :  { %v3419_v3 = vpop.permute.xlu0 %1296  ;;  %1463 = vrot.lane.b32.xlu1 %v1406_v62, %s2971_s7  ;;  %v570_v62 = vadd.f32 %v3329_v4, %v3137_v21  ;;  %v488_v4 = vmul.f32 %v2709_v29, %v3358_v38  ;;  %v707_v29 = vadd.f32 %v3361_v39, %v691_v1  ;;  %v1274_v1 = vadd.f32 %v3344_v11, %v3108_v15 }
 0x2df   :  { %v3422_v47 = vpop.permute.xlu1 %1145  ;;  %v3475_v55 = vadd.f32 %v3405_v33, %v707_v29 }
 0x2e1   :  { %v3424_v57 = vpop.permute.xlu0 %1159  ;;  %1467 = vrot.lane.b32.xlu1 %v3214_v63, %s2971_s7  ;;  %v3441_v63 = vadd.f32 %v578_v60, %v570_v62  ;;  %v726_v62 = vsub.f32 0.0, %v3455_v45 }
 0x2e2   :  { %v2711_v60 = vpop.eup %2710 }
 0x2e3   :  { %v3433_v18 = vpop.permute.xlu1 %1435  ;;  %v590_v34 = vsub.f32 0.0, %v3441_v63  ;;  %v608_v52 = vmul.f32 %v2711_v60, %v3370_v46  ;;  %v732_v40 = vmul.f32 1.442695, %v726_v62  ;;  %v2713_v62 = vpop.eup %2712 }
 0x2e4   :  { %v482_v11 = vadd.f32 1.0, %v2713_v62 }
 0x2e5   :  { %v3437_v9 = vpop.permute.xlu0 %1449  ;;  %915 = vperm.xlu1 %2590, %v886_v58   ;;  %v597_v38 = vmul.f32 1.442695, %v590_v34 }
 0x2e7   :  { %v3443_v26 = vpop.permute.xlu1 %1008  ;;  %2714 = vpow2.f32 %v597_v38 }
 0x2e9   :  { %v3447_v37 = vpop.permute.xlu0 %1312  ;;  %897 = vperm.xlu1 %2590, %v882_v10  }
 0x2eb   :  { %v3452_v7 = vpop.permute.xlu1 %1298 }
 0x2ed   :  { %v452_v56 = vpop.permute.xlu0 %451  ;;  %516 = vperm.xlu1 %2590, %v488_v4   ;;  %v984_v4 = vadd.f32 %v3334_v25, %v968_v24  ;;  %v727_v25 = vsub.f32 0.0, %v3475_v55 }
 0x2ee   :  { %v3458_v41 = vadd.f32 %v452_v56, %v3126_v19 }
 0x2ef   :  { %v3461_v58 = vpop.permute.xlu1 %1161  ;;  %v1000_v39 = vadd.f32 %v3386_v2, %v984_v4 }
 0x2f0   :  { %v467_v17 = vsub.f32 0.0, %v3458_v41 }
 0x2f1   :  { %v556_v59 = vpop.permute.xlu0 %555  ;;  %637 = vperm.xlu1 %2590, %v608_v52   ;;  %v1137_v52 = vadd.f32 %v3366_v42, %v1121_v43  ;;  %v3488_v33 = vadd.f32 %v3414_v49, %v1000_v39  ;;  %v1290_v42 = vadd.f32 %v3394_v22, %v1274_v1 }
 0x2f2   :  { %v471_v10 = vmul.f32 1.442695, %v467_v17  ;;  %v567_v20 = vadd.f32 %v556_v59, %v3126_v19 }
 0x2f3   :  { %v3470_v46 = vpop.permute.xlu1 %1451  ;;  %v1153_v53 = vadd.f32 %v3400_v32, %v1137_v52  ;;  %v1020_v24 = vsub.f32 0.0, %v3488_v33  ;;  %v1306_v32 = vadd.f32 %v3419_v3, %v1290_v42 }
 0x2f4   :  { %2716 = vpow2.f32 %v471_v10  ;;  %v734_v10 = vmul.f32 1.442695, %v727_v25 }
 0x2f5   :  { %v572_v44 = vpop.permute.xlu0 %571  ;;  %2718 = vpow2.f32 %v732_v40  ;;  %v3499_v49 = vadd.f32 %v3424_v57, %v1153_v53  ;;  %v2715_v40 = vpop.eup %2714  ;;  %v3508_v52 = vadd.f32 %v3447_v37, %v1306_v32  ;;  %v1122_v37 = vadd.f32 %v3342_v27, %v3137_v21 }
 0x2f6   :  { %v3477_v34 = vadd.f32 %v572_v44, %v567_v20  ;;  %v969_v44 = vadd.f32 %v3317_v61, %v3137_v21  ;;  %v602_v1 = vadd.f32 1.0, %v2715_v40 }
 0x2f7   :  { %v3482_v60 = vpop.permute.xlu1 %1314  ;;  %v1173_v57 = vsub.f32 0.0, %v3499_v49 }
 0x2f8   :  { %v587_v56 = vsub.f32 0.0, %v3477_v34  ;;  %v985_v53 = vadd.f32 %v3373_v48, %v969_v44  ;;  %v1138_v48 = vadd.f32 %v3392_v12, %v1122_v37  ;;  %v1275_v44 = vadd.f32 %v3380_v54, %v3137_v21 }
 0x2f9   :  { %v677_v38 = vpop.permute.xlu0 %676  ;;  %v1179_v42 = vmul.f32 1.442695, %v1173_v57 }
 0x2fa   :  { %v591_v17 = vmul.f32 1.442695, %v587_v56  ;;  %v688_v20 = vadd.f32 %v677_v38, %v3126_v19  ;;  %v1026_v56 = vmul.f32 1.442695, %v1020_v24  ;;  %v1291_v12 = vadd.f32 %v3417_v51, %v1275_v44 }
 0x2fb   :  { %v454_v2 = vpop.permute.xlu1 %453 }
 0x2fc   :  { %2720 = vpow2.f32 %v591_v17  ;;  %v3494_v59 = vadd.f32 %v454_v2, %v3149_v23  ;;  %v1307_v21 = vadd.f32 %v3452_v7, %v1291_v12 }
 0x2fd   :  { %v693_v29 = vpop.permute.xlu0 %692  ;;  %2722 = vpow2.f32 %v734_v10 }
 0x2fe   :  { %v468_v15 = vsub.f32 0.0, %v3494_v59  ;;  %v704_v43 = vadd.f32 %v693_v29, %v688_v20  ;;  %v1001_v29 = vadd.f32 %v3411_v35, %v985_v53  ;;  %v1326_v20 = vsub.f32 0.0, %v3508_v52 }
 0x2ff   :  { %v558_v4 = vpop.permute.xlu1 %557  ;;  %v1154_v35 = vadd.f32 %v3422_v47, %v1138_v48  ;;  %v3538_v51 = vadd.f32 %v3482_v60, %v1307_v21 }
 0x300   :  { %v473_v22 = vmul.f32 1.442695, %v468_v15  ;;  %v568_v3 = vadd.f32 %v558_v4, %v3149_v23  ;;  %v3524_v4 = vadd.f32 %v3443_v26, %v1001_v29 }
 0x301   :  { %v2717_v39 = vpop.eup %2716  ;;  %v709_v25 = vpop.permute.xlu0 %708  ;;  %v3531_v57 = vadd.f32 %v3461_v58, %v1154_v35 }
 0x302   :  { %v479_v38 = vadd.f32 1.0, %v2717_v39  ;;  %2724 = vpow2.f32 %v473_v22  ;;  %v3511_v17 = vadd.f32 %v709_v25, %v704_v43  ;;  %v2719_v24 = vpop.eup %2718  ;;  %v1332_v39 = vmul.f32 1.442695, %v1326_v20 }
 0x303   :  { %2726 = vrcp.f32 %v482_v11  ;;  %v574_v61 = vpop.permute.xlu1 %573  ;;  %v738_v22 = vadd.f32 1.0, %v2719_v24  ;;  %v1021_v25 = vsub.f32 0.0, %v3524_v4 }
 0x304   :  { %2728 = vrcp.f32 %v479_v38  ;;  %v724_v2 = vsub.f32 0.0, %v3511_v17  ;;  %v3515_v62 = vadd.f32 %v574_v61, %v568_v3  ;;  %v1174_v61 = vsub.f32 0.0, %v3531_v57 }
 0x305   :  { %2730 = vpow2.f32 %v1026_v56  ;;  %v955_v10 = vpop.permute.xlu0 %954 }
 0x306   :  { %v728_v15 = vmul.f32 1.442695, %v724_v2  ;;  %v588_v11 = vsub.f32 0.0, %v3515_v62  ;;  %2732 = vrcp.f32 %v602_v1  ;;  %v1028_v2 = vmul.f32 1.442695, %v1021_v25 }
 0x307   :  { %v679_v32 = vpop.permute.xlu1 %678  ;;  %v1181_v60 = vmul.f32 1.442695, %v1174_v61 }
 0x308   :  { %2734 = vpow2.f32 %v728_v15  ;;  %v593_v27 = vmul.f32 1.442695, %v588_v11  ;;  %v689_v38 = vadd.f32 %v679_v32, %v3149_v23 }
 0x309   :  { %v2721_v40 = vpop.eup %2720  ;;  %2736 = vpow2.f32 %v1179_v42  ;;  %v971_v43 = vpop.permute.xlu0 %970  ;;  %v966_v42 = vadd.f32 %v955_v10, %v3126_v19 }
 0x30a   :  { %v599_v56 = vadd.f32 1.0, %v2721_v40  ;;  %2738 = vpow2.f32 %v593_v27  ;;  %v2723_v47 = vpop.eup %2722  ;;  %v1327_v27 = vsub.f32 0.0, %v3538_v51 }
 0x30b   :  { %v695_v26 = vpop.permute.xlu1 %694  ;;  %v739_v7 = vadd.f32 1.0, %v2723_v47  ;;  %v982_v48 = vadd.f32 %v971_v43, %v966_v42 }
 0x30c   :  { %2740 = vrcp.f32 %v599_v56  ;;  %v705_v3 = vadd.f32 %v695_v26, %v689_v38  ;;  %v1334_v38 = vmul.f32 1.442695, %v1327_v27 }
 0x30d   :  { %2742 = vrcp.f32 %v738_v22  ;;  %v987_v54 = vpop.permute.xlu0 %986 }
 0x30e   :  { %2744 = vpow2.f32 %v1332_v39  ;;  %v998_v22 = vadd.f32 %v987_v54, %v982_v48 }
 0x30f   :  { %v2725_v1 = vpop.eup %2724  ;;  %v711_v58 = vpop.permute.xlu1 %710 }
 0x310   :  { %v2727_v53 = vpop.eup %2726  ;;  %v480_v37 = vadd.f32 1.0, %v2725_v1  ;;  %v3541_v24 = vadd.f32 %v711_v58, %v705_v3 }
 0x311   :  { %v2729_v29 = vpop.eup %2728  ;;  %v1108_v20 = vpop.permute.xlu0 %1107 }
 0x312   :  { %v2731_v15 = vpop.eup %2730  ;;  %v484_v11 = vmul.f32 %v2729_v29, %v3458_v41  ;;  %2746 = vrcp.f32 %v480_v37  ;;  %v725_v32 = vsub.f32 0.0, %v3541_v24  ;;  %v490_v41 = vmul.f32 %v2727_v53, %v3431_v0 }
 0x313   :  { %v957_v40 = vpop.permute.xlu1 %956  ;;  %v2733_v44 = vpop.eup %2732  ;;  %2748 = vpow2.f32 %v1028_v2  ;;  %v1032_v39 = vadd.f32 1.0, %v2731_v15 }
 0x314   :  { %v730_v10 = vmul.f32 1.442695, %v725_v32  ;;  %498 = vperm.xlu0 %2591, %v484_v11   ;;  %2750 = vrcp.f32 %v739_v7  ;;  %v610_v1 = vmul.f32 %v2733_v44, %v3441_v63  ;;  %v967_v63 = vadd.f32 %v957_v40, %v3149_v23 }
 0x315   :  { %v2735_v35 = vpop.eup %2734  ;;  %v1003_v56 = vpop.permute.xlu0 %1002  ;;  %v1119_v32 = vadd.f32 %v1108_v20, %v3126_v19 }
 0x316   :  { %v2737_v12 = vpop.eup %2736  ;;  %v736_v26 = vadd.f32 1.0, %v2735_v35  ;;  %2752 = vpow2.f32 %v730_v10  ;;  %v3547_v43 = vadd.f32 %v1003_v56, %v998_v22 }
 0x317   :  { %v2739_v25 = vpop.eup %2738  ;;  %2754 = vpow2.f32 %v1181_v60  ;;  %v973_v21 = vpop.permute.xlu1 %972  ;;  %v1185_v0 = vadd.f32 1.0, %v2737_v12 }
 0x318   :  { %2756 = vrcp.f32 %v736_v26  ;;  %v600_v47 = vadd.f32 1.0, %v2739_v25  ;;  %v1018_v54 = vsub.f32 0.0, %v3547_v43  ;;  %521 = vperm.xlu0 %2591, %v490_v41  }
 0x319   :  { %v2741_v3 = vpop.eup %2740  ;;  %2758 = vrcp.f32 %v1032_v39  ;;  %v1124_v61 = vpop.permute.xlu0 %1123 }
 0x31a   :  { %v2743_v58 = vpop.eup %2742  ;;  %v604_v53 = vmul.f32 %v2741_v3, %v3477_v34  ;;  %2760 = vrcp.f32 %v600_v47  ;;  %v1022_v2 = vmul.f32 1.442695, %v1018_v54  ;;  %v983_v34 = vadd.f32 %v973_v21, %v967_v63 }
 0x31b   :  { %v2745_v37 = vpop.eup %2744  ;;  %2762 = vpow2.f32 %v1334_v38  ;;  %v989_v42 = vpop.permute.xlu1 %988  ;;  %v745_v7 = vmul.f32 %v2743_v58, %v3455_v45  ;;  %v1135_v10 = vadd.f32 %v1124_v61, %v1119_v32 }
 0x31c   :  { %2764 = vpow2.f32 %v1022_v2  ;;  %619 = vperm.xlu1 %2590, %v604_v53   ;;  %642 = vperm.xlu0 %2591, %v610_v1   ;;  %v1338_v15 = vadd.f32 1.0, %v2745_v37  ;;  %v999_v35 = vadd.f32 %v989_v42, %v983_v34 }
 0x31d   :  { %v1140_v29 = vpop.permute.xlu0 %1139  ;;  %2766 = vrcp.f32 %v1185_v0 }
 0x31e   :  { %2768 = vrcp.f32 %v1338_v15  ;;  %v1151_v40 = vadd.f32 %v1140_v29, %v1135_v10 }
 0x31f   :  { %v2747_v11 = vpop.eup %2746  ;;  %v1110_v48 = vpop.permute.xlu1 %1109 }
 0x320   :  { %774 = vperm.xlu1 %2590, %v745_v7   ;;  %v2749_v60 = vpop.eup %2748  ;;  %v486_v22 = vmul.f32 %v2747_v11, %v3494_v59  ;;  %v1120_v32 = vadd.f32 %v1110_v48, %v3149_v23 }
 0x321   :  { %v1261_v27 = vpop.permute.xlu0 %1260  ;;  %v2751_v44 = vpop.eup %2750  ;;  %v1033_v12 = vadd.f32 1.0, %v2749_v60  ;;  %v2844_v60 = vld [vmem:[%s3767_s2] sm:$0xff] }
 0x322   :  { %v747_v15 = vmul.f32 %v2751_v44, %v3475_v55 }
 0x323   :  { %v2753_v39 = vpop.eup %2752  ;;  %v1005_v45 = vpop.permute.xlu1 %1004 }
 0x324   :  { %v2755_v56 = vpop.eup %2754  ;;  %v737_v41 = vadd.f32 1.0, %v2753_v39  ;;  %v3556_v26 = vadd.f32 %v1005_v45, %v999_v35  ;;  %503 = vperm.xlu1 %2590, %v486_v22   ;;  %v1272_v22 = vadd.f32 %v2844_v60, %v1261_v27 }
 0x325   :  { %v2757_v19 = vpop.eup %2756  ;;  %v1156_v20 = vpop.permute.xlu0 %1155  ;;  %v1186_v54 = vadd.f32 1.0, %v2755_v56 }
 0x326   :  { %v2759_v25 = vpop.eup %2758  ;;  %v741_v38 = vmul.f32 %v2757_v19, %v3511_v17  ;;  %2770 = vrcp.f32 %v737_v41  ;;  %v1019_v21 = vsub.f32 0.0, %v3556_v26  ;;  %v3560_v59 = vadd.f32 %v1156_v20, %v1151_v40 }
 0x327   :  { %v2761_v47 = vpop.eup %2760  ;;  %v1126_v3 = vpop.permute.xlu1 %1125  ;;  %2772 = vrcp.f32 %v1033_v12  ;;  %v1039_v17 = vmul.f32 %v2759_v25, %v3488_v33 }
 0x328   :  { %v2763_v1 = vpop.eup %2762  ;;  %v606_v61 = vmul.f32 %v2761_v47, %v3515_v62  ;;  %v1024_v58 = vmul.f32 1.442695, %v1019_v21  ;;  %v1171_v0 = vsub.f32 0.0, %v3560_v59  ;;  %756 = vperm.xlu1 %2590, %v741_v38   ;;  %v1136_v10 = vadd.f32 %v1126_v3, %v1120_v32 }
 0x329   :  { %v2765_v53 = vpop.eup %2764  ;;  %v1277_v2 = vpop.permute.xlu0 %1276  ;;  %v1339_v63 = vadd.f32 1.0, %v2763_v1 }
 0x32a   :  { %v1030_v37 = vadd.f32 1.0, %v2765_v53  ;;  %2774 = vpow2.f32 %v1024_v58  ;;  %v1175_v42 = vmul.f32 1.442695, %v1171_v0  ;;  %624 = vperm.xlu0 %2591, %v606_v61   ;;  %v2767_v29 = vpop.eup %2766  ;;  %v1288_v35 = vadd.f32 %v1277_v2, %v1272_v22 }
 0x32b   :  { %2776 = vrcp.f32 %v1186_v54  ;;  %v1142_v7 = vpop.permute.xlu1 %1141  ;;  %v1192_v11 = vmul.f32 %v2767_v29, %v3499_v49  ;;  %v2769_v33 = vpop.eup %2768 }
 0x32c   :  { %2778 = vrcp.f32 %v1030_v37  ;;  %1068 = vperm.xlu1 %2590, %v1039_v17   ;;  %v1345_v44 = vmul.f32 %v2769_v33, %v3508_v52  ;;  %v1152_v39 = vadd.f32 %v1142_v7, %v1136_v10  ;;  %v2845_v37 = vld [vmem:[%s3767_s2 + $0x8] sm:$0xff]  ;;  %v2846_v7 = vld [vmem:[%s3767_s2 + $0x10] sm:$0xff] }
 0x32d   :  { %2780 = vpow2.f32 %v1175_v42  ;;  %v1293_v62 = vpop.permute.xlu0 %1292 }
 0x32e   :  { %779 = vperm.xlu0 %2591, %v747_v15   ;;  %2782 = vrcp.f32 %v1339_v63  ;;  %v1304_v48 = vadd.f32 %v1293_v62, %v1288_v35 }
 0x32f   :  { %v1263_v34 = vpop.permute.xlu1 %1262 }
 0x330   :  { %1221 = vperm.xlu1 %2590, %v1192_v11   ;;  %v1273_v42 = vadd.f32 %v2845_v37, %v1263_v34 }
 0x331   :  { %v1414_v55 = vpop.permute.xlu0 %1413 }
 0x332   :  { %v1425_v2 = vadd.f32 %v2844_v60, %v1414_v55 }
 0x333   :  { %v2771_v45 = vpop.eup %2770  ;;  %v1158_v49 = vpop.permute.xlu1 %1157 }
 0x334   :  { %v743_v23 = vmul.f32 %v2771_v45, %v3541_v24  ;;  %v3573_v56 = vadd.f32 %v1158_v49, %v1152_v39  ;;  %1374 = vperm.xlu1 %2590, %v1345_v44   ;;  %v2773_v12 = vpop.eup %2772 }
 0x335   :  { %v1309_v41 = vpop.permute.xlu0 %1308  ;;  %v1041_v25 = vmul.f32 %v2773_v12, %v3524_v4 }
 0x336   :  { %v1172_v40 = vsub.f32 0.0, %v3573_v56  ;;  %v3576_v27 = vadd.f32 %v1309_v41, %v1304_v48  ;;  %761 = vperm.xlu0 %2591, %v743_v23  }
 0x337   :  { %v2775_v19 = vpop.eup %2774  ;;  %v1279_v20 = vpop.permute.xlu1 %1278 }
 0x338   :  { %v2777_v52 = vpop.eup %2776  ;;  %v1031_v38 = vadd.f32 1.0, %v2775_v19  ;;  %v1177_v21 = vmul.f32 1.442695, %v1172_v40  ;;  %v1324_v24 = vsub.f32 0.0, %v3576_v27  ;;  %v1289_v63 = vadd.f32 %v1279_v20, %v1273_v42 }
 0x339   :  { %v2779_v47 = vpop.eup %2778  ;;  %v1430_v54 = vpop.permute.xlu0 %1429  ;;  %v1194_v53 = vmul.f32 %v2777_v52, %v3531_v57  ;;  %v1427_v57 = vadd.f32 %v2846_v7, %v3375_v50 }
 0x33a   :  { %v2781_v3 = vpop.eup %2780  ;;  %v1035_v1 = vmul.f32 %v2779_v47, %v3547_v43  ;;  %2784 = vrcp.f32 %v1031_v38  ;;  %v1328_v61 = vmul.f32 1.442695, %v1324_v24  ;;  %1073 = vperm.xlu0 %2591, %v1041_v25   ;;  %v1441_v43 = vadd.f32 %v1430_v54, %v1425_v2 }
 0x33b   :  { %v1183_v58 = vadd.f32 1.0, %v2781_v3  ;;  %2786 = vpow2.f32 %v1177_v21  ;;  %v1295_v0 = vpop.permute.xlu1 %1294  ;;  %v2783_v4 = vpop.eup %2782  ;;  %v1443_v32 = vadd.f32 %v3408_v36, %v1427_v57 }
 0x33c   :  { %2788 = vpow2.f32 %v1328_v61  ;;  %1050 = vperm.xlu1 %2590, %v1035_v1   ;;  %v1347_v15 = vmul.f32 %v2783_v4, %v3538_v51  ;;  %v1305_v33 = vadd.f32 %v1295_v0, %v1289_v63 }
 0x33d   :  { %2790 = vrcp.f32 %v1183_v58  ;;  %v1446_v17 = vpop.permute.xlu0 %1445  ;;  %v1459_v22 = vadd.f32 %v3437_v9, %v1443_v32 }
 0x33e   :  { %1226 = vperm.xlu0 %2591, %v1194_v53   ;;  %v1457_v62 = vadd.f32 %v1446_v17, %v1441_v43 }
 0x33f   :  { %v1416_v29 = vpop.permute.xlu1 %1415 }
 0x340   :  { %v1426_v19 = vadd.f32 %v2845_v37, %v1416_v29 }
 0x341   :  { %v1462_v11 = vpop.permute.xlu0 %1461 }
 0x342   :  { %v3591_v60 = vadd.f32 %v1462_v11, %v1457_v62  ;;  %1379 = vperm.xlu0 %2591, %v1347_v15  }
 0x343   :  { %v1311_v34 = vpop.permute.xlu1 %1310 }
 0x344   :  { %v1477_v10 = vsub.f32 0.0, %v3591_v60  ;;  %v3595_v55 = vadd.f32 %v1311_v34, %v1305_v33 }
 0x345   :  { %v1466_v44 = vpop.permute.xlu0 %1465 }
 0x346   :  { %v1481_v50 = vmul.f32 1.442695, %v1477_v10  ;;  %v1325_v51 = vsub.f32 0.0, %v3595_v55  ;;  %v3598_v35 = vadd.f32 %v1466_v44, %v1459_v22  ;;  %v2408_v22 = vld [vmem:[#allocation2 + $0x4] ss:$0 sm:$0xff] }
 0x347   :  { %v2785_v39 = vpop.eup %2784  ;;  %v1432_v45 = vpop.permute.xlu1 %1431  ;;  %v419_v44 = vmul.f32 %v2408_v22, %v3101_v13 }
 0x348   :  { %v2787_v36 = vpop.eup %2786  ;;  %v1037_v49 = vmul.f32 %v2785_v39, %v3556_v26  ;;  %2792 = vpow2.f32 %v1481_v50  ;;  %v1330_v23 = vmul.f32 1.442695, %v1325_v51  ;;  %v1479_v48 = vsub.f32 0.0, %v3598_v35  ;;  %v2847_v26 = vld [vmem:[%s3767_s2 + $0x18] sm:$0xff] }
 0x349   :  { %v2789_v9 = vpop.eup %2788  ;;  %v1184_v12 = vadd.f32 1.0, %v2787_v36  ;;  %v1442_v38 = vadd.f32 %v1432_v45, %v1426_v19  ;;  %v1428_v21 = vadd.f32 %v2847_v26, %v3398_v6  ;;  %v420_v51 = vmul.f32 1.442695, %v419_v44 }
 0x34a   :  { %v2791_v41 = vpop.eup %2790  ;;  %v1336_v40 = vadd.f32 1.0, %v2789_v9  ;;  %2794 = vpow2.f32 %v1330_v23  ;;  %v1485_v20 = vmul.f32 1.442695, %v1479_v48  ;;  %1055 = vperm.xlu0 %2591, %v1037_v49  }
 0x34b   :  { %v1188_v52 = vmul.f32 %v2791_v41, %v3560_v59  ;;  %2796 = vrcp.f32 %v1184_v12  ;;  %v1448_v25 = vpop.permute.xlu1 %1447  ;;  %v1444_v54 = vadd.f32 %v3433_v18, %v1428_v21  ;;  %v2614_v12 = vld [vmem:[%s3770_s5 + $0x38] sm:$0xff]  }
 0x34c   :  { %2798 = vrcp.f32 %v1336_v40  ;;  %v1458_v24 = vadd.f32 %v1448_v25, %v1442_v38  ;;  %2531 = vmatpush3.bf16.msra.mxu1 %v2614_v12 }
 0x34d   :  { %2800 = vpow2.f32 %v1485_v20  ;;  %1203 = vperm.xlu1 %2590, %v1188_v52   ;;  %v1460_v1 = vadd.f32 %v3470_v46, %v1444_v54  ;;  %v613_v20 = vsub.s32 1, %v3070_v30  ;;  %v2615_v52 = vld [vmem:[%s3770_s5 + $0x30] sm:$0xff]   ;;  %2532 = vmatprep.subr.bf16.mxu1 %v2968_v5 }
 0x34f   :  { %v1464_v47 = vpop.permute.xlu1 %1463 }
 0x350   :  { %v1474_v3 = vadd.f32 %v1464_v47, %v1458_v24  ;;  %2533 = vmatpush3.bf16.msra.mxu1 %v2615_v52  ;;  %v630_v24 = vrot.slane %v3113_v16, %v613_v20 }
 0x351   :  { %2534 = vmatprep.subr.bf16.mxu1 %v2968_v5 }
 0x352   :  { %v1478_v59 = vsub.f32 0.0, %v1474_v3  ;;  %v3617_v45 = vpop.permute.xlu0 %920 }
 0x353   :  { %v1468_v61 = vpop.permute.xlu1 %1467 }
 0x354   :  { %v1483_v58 = vmul.f32 1.442695, %v1478_v59  ;;  %v1476_v0 = vadd.f32 %v1468_v61, %v1460_v1 }
 0x355   :  { %v2793_v53 = vpop.eup %2792 }
 0x356   :  { %v1489_v2 = vadd.f32 1.0, %v2793_v53  ;;  %2802 = vpow2.f32 %v1483_v58  ;;  %v1480_v4 = vsub.f32 0.0, %v1476_v0  ;;  %v3622_v23 = vpop.permute.xlu0 %902 }
 0x357   :  { %v2795_v17 = vpop.eup %2794 }
 0x358   :  { %v2797_v37 = vpop.eup %2796  ;;  %2804 = vrcp.f32 %v1489_v2  ;;  %v1337_v42 = vadd.f32 1.0, %v2795_v17  ;;  %v1487_v6 = vmul.f32 1.442695, %v1480_v4  ;;  %v891_v4 = vsub.s32 3, %v3070_v30 }
 0x359   :  { %v2799_v43 = vpop.eup %2798  ;;  %v1190_v29 = vmul.f32 %v2797_v37, %v3573_v56 }
 0x35a   :  { %v2801_v18 = vpop.eup %2800  ;;  %v1341_v7 = vmul.f32 %v2799_v43, %v3576_v27  ;;  %2806 = vrcp.f32 %v1337_v42 }
 0x35b   :  { %v1491_v46 = vadd.f32 1.0, %v2801_v18  ;;  %2808 = vpow2.f32 %v1487_v6  ;;  %1208 = vperm.xlu0 %2591, %v1190_v29  }
 0x35c   :  { %1356 = vperm.xlu1 %2590, %v1341_v7  }
 0x35d   :  { %2810 = vrcp.f32 %v1491_v46  ;;  %v908_v46 = vrot.slane %v3113_v16, %v891_v4 }
 0x363   :  { %v2803_v57 = vpop.eup %2802 }
 0x364   :  { %v1490_v15 = vadd.f32 1.0, %v2803_v57 }
 0x365   :  { %v2805_v63 = vpop.eup %2804 }
 0x366   :  { %v1494_v62 = vmul.f32 %v2805_v63, %v3591_v60  ;;  %2812 = vrcp.f32 %v1490_v15 }
 0x367   :  { %v2807_v11 = vpop.eup %2806 }
 0x368   :  { %v2809_v32 = vpop.eup %2808  ;;  %v1343_v33 = vmul.f32 %v2807_v11, %v3595_v55  ;;  %1509 = vperm.xlu1 %2590, %v1494_v62   ;;  %v3615_v55 = vpop.permute.xlu1 %915 }
 0x369   :  { %v1492_v56 = vadd.f32 1.0, %v2809_v32 }
 0x36a   :  { %v2811_v34 = vpop.eup %2810  ;;  %1361 = vperm.xlu0 %2591, %v1343_v33   ;;  %v1044_v33 = vsub.s32 4, %v3070_v30 }
 0x36b   :  { %v1498_v27 = vmul.f32 %v2811_v34, %v3598_v35  ;;  %2814 = vrcp.f32 %v1492_v56  ;;  %v493_v35 = vsub.s32 0, %v3070_v30 }
 0x36c   :  { %2816 = vpow2.f32 %v420_v51  ;;  %v898_v36 = vpop.permute.xlu1 %897 }
 0x36d   :  { %1527 = vperm.xlu1 %2590, %v1498_v27   ;;  %v509_v9 = vrot.slane %v3113_v16, %v493_v35  ;;  %v909_v56 = vmul.f32 %v908_v46, %v898_v36 }
 0x370   :  { %v517_v48 = vpop.permute.xlu1 %516 }
 0x373   :  { %v2813_v10 = vpop.eup %2812 }
 0x374   :  { %v1496_v50 = vmul.f32 %v2813_v10, %v1474_v3  ;;  %v638_v26 = vpop.permute.xlu1 %637  ;;  %v750_v3 = vsub.s32 2, %v3070_v30 }
 0x376   :  { %1514 = vperm.xlu0 %2591, %v1496_v50   ;;  %v767_v42 = vrot.slane %v3113_v16, %v750_v3 }
 0x378   :  { %v2815_v60 = vpop.eup %2814 }
 0x379   :  { %v1500_v39 = vmul.f32 %v2815_v60, %v1476_v0  ;;  %v3619_v49 = vpop.eup %2816 }
 0x37a   :  { %v494_v13 = vrot.slane %v3619_v49, %v493_v35  ;;  %v614_v38 = vrot.slane %v3619_v49, %v613_v20  ;;  %v751_v59 = vrot.slane %v3619_v49, %v750_v3  ;;  %v892_v63 = vrot.slane %v3619_v49, %v891_v4 }
 0x37b   :  { %1532 = vperm.xlu0 %2591, %v1500_v39   ;;  %v1045_v44 = vrot.slane %v3619_v49, %v1044_v33  ;;  %v1061_v3 = vrot.slane %v3113_v16, %v1044_v33 }
 0x37c   :  { %v495_v40 = vmul.f32 0.0, %v494_v13 }
 0x38f   :  { %v499_v41 = vpop.permute.xlu0 %498 }
 0x390   :  { %v510_v19 = vmul.f32 %v509_v9, %v499_v41 }
 0x392   :  { %v512_v25 = vadd.f32 %v510_v19, %v495_v40 }
 0x393   :  { %v522_v61 = vpop.permute.xlu0 %521 }
 0x394   :  { %v615_v21 = vmul.f32 %v614_v38, %v512_v25  ;;  %v524_v43 = vmul.f32 %v517_v48, %v512_v25 }
 0x397   :  { %v620_v47 = vpop.permute.xlu1 %619  ;;  %v643_v17 = vpop.permute.xlu0 %642 }
 0x398   :  { %v631_v54 = vmul.f32 %v630_v24, %v620_v47 }
 0x39a   :  { %v633_v1 = vadd.f32 %v631_v54, %v615_v21 }
 0x39b   :  { %v775_v58 = vpop.permute.xlu1 %774 }
 0x39c   :  { %v752_v0 = vmul.f32 %v751_v59, %v633_v1  ;;  %v645_v10 = vmul.f32 %v638_v26, %v633_v1 }
 0x39f   :  { %v504_v53 = vpop.permute.xlu1 %503 }
 0x3a0   :  { %v511_v2 = vmul.f32 %v509_v9, %v504_v53 }
 0x3a2   :  { %v513_v37 = vadd.f32 %v511_v2, %v495_v40  ;;  %v1197_v2 = vsub.s32 5, %v3070_v30 }
 0x3a3   :  { %v757_v6 = vpop.permute.xlu1 %756 }
 0x3a4   :  { %v525_v29 = vmul.f32 %v522_v61, %v513_v37  ;;  %v768_v18 = vmul.f32 %v767_v42, %v757_v6  ;;  %v616_v7 = vmul.f32 %v614_v38, %v513_v37 }
 0x3a5   :  { %v625_v57 = vpop.permute.xlu0 %624 }
 0x3a6   :  { %v526_v15 = vadd.f32 %v525_v29, %v524_v43  ;;  %v770_v62 = vadd.f32 %v768_v18, %v752_v0  ;;  %v632_v11 = vmul.f32 %v630_v24, %v625_v57  ;;  %v910_v24 = vmul.f32 %v908_v46, %v3622_v23 }
 0x3a7   :  { %v3643_v32 = vpop.permute.xlu1 %1068  ;;  %v1198_v43 = vrot.slane %v3619_v49, %v1197_v2 }
 0x3a8   :  { %v527_v34 = vrot.slane %v526_v15, 4  ;;  %v893_v27 = vmul.f32 %v892_v63, %v770_v62  ;;  %v634_v22 = vadd.f32 %v632_v11, %v616_v7  ;;  %v782_v1 = vmul.f32 %v775_v58, %v770_v62 }
 0x3a9   :  { %v780_v9 = vpop.permute.xlu0 %779 }
 0x3aa   :  { %v528_v50 = vadd.f32 %v527_v34, %v526_v15  ;;  %v646_v60 = vmul.f32 %v643_v17, %v634_v22  ;;  %v753_v51 = vmul.f32 %v751_v59, %v634_v22  ;;  %v911_v39 = vadd.f32 %v909_v56, %v893_v27 }
 0x3ab   :  { %v3647_v12 = vpop.permute.xlu1 %1221 }
 0x3ac   :  { %v529_v35 = vrot.slane %v528_v50, 2  ;;  %v647_v13 = vadd.f32 %v646_v60, %v645_v10  ;;  %v1046_v48 = vmul.f32 %v1045_v44, %v911_v39  ;;  %v923_v6 = vmul.f32 %v3615_v55, %v911_v39 }
 0x3ae   :  { %v530_v41 = vadd.f32 %v529_v35, %v528_v50  ;;  %v648_v40 = vrot.slane %v647_v13, 4 }
 0x3af   :  { %v3649_v38 = vpop.permute.xlu1 %1374 }
 0x3b0   :  { %v649_v19 = vadd.f32 %v648_v40, %v647_v13  ;;  %v531_v36 = vrot.slane %v530_v41, 1 }
 0x3b1   :  { %v762_v20 = vpop.permute.xlu0 %761 }
 0x3b2   :  { %v650_v52 = vrot.slane %v649_v19, 2  ;;  %v769_v25 = vmul.f32 %v767_v42, %v762_v20  ;;  %v532_v47 = vadd.f32 %v531_v36, %v530_v41  ;;  %v1350_v41 = vsub.s32 6, %v3070_v30 }
 0x3b4   :  { %v651_v26 = vadd.f32 %v650_v52, %v649_v19  ;;  %v771_v21 = vadd.f32 %v769_v25, %v753_v51  ;;  %v534_v23 = vsel %vm533_vm5, %v532_v47, 0.0  ;;  %v1351_v25 = vrot.slane %v3619_v49, %v1350_v41 }
 0x3b5   :  { %v1074_v54 = vpop.permute.xlu0 %1073 }
 0x3b6   :  { %v652_v59 = vrot.slane %v651_v26, 1  ;;  %v783_v61 = vmul.f32 %v780_v9, %v771_v21  ;;  %v894_v0 = vmul.f32 %v892_v63, %v771_v21 }
 0x3b7   :  { %v1051_v53 = vpop.permute.xlu1 %1050 }
 0x3b8   :  { %v653_v4 = vadd.f32 %v652_v59, %v651_v26  ;;  %v784_v17 = vadd.f32 %v783_v61, %v782_v1  ;;  %v1062_v37 = vmul.f32 %v1061_v3, %v1051_v53  ;;  %v912_v42 = vadd.f32 %v910_v24, %v894_v0 }
 0x3b9   :  { %v1227_v46 = vpop.permute.xlu0 %1226  ;;  %v1367_v0 = vrot.slane %v3113_v16, %v1350_v41 }
 0x3ba   :  { %v655_v29 = vsel %vm654_vm6, %v653_v4, %v534_v23  ;;  %v785_v18 = vrot.slane %v784_v17, 4  ;;  %v1064_v58 = vadd.f32 %v1062_v37, %v1046_v48  ;;  %v924_v7 = vmul.f32 %v3617_v45, %v912_v42 }
 0x3bb   :  { %v1047_v57 = vmul.f32 %v1045_v44, %v912_v42  ;;  %v1214_v44 = vrot.slane %v3113_v16, %v1197_v2  ;;  %v1503_v4 = vsub.s32 7, %v3070_v30  ;;  %v2617_v30 = vld [vmem:[%s3770_s5 + $0x20] sm:$0xff]  }
 0x3bc   :  { %v786_v15 = vadd.f32 %v785_v18, %v784_v17  ;;  %v925_v63 = vadd.f32 %v924_v7, %v923_v6  ;;  %v1199_v62 = vmul.f32 %v1198_v43, %v1064_v58  ;;  %v1076_v40 = vmul.f32 %v3643_v32, %v1064_v58 }
 0x3bd   :  { %v3659_v27 = vpop.permute.xlu0 %1379  ;;  %v1504_v42 = vrot.slane %v3619_v49, %v1503_v4  ;;  %v1553_v18 = vsub.f32 0.0, %v3072_v31 }
 0x3be   :  { %v787_v11 = vrot.slane %v786_v15, 2  ;;  %v926_v33 = vrot.slane %v925_v63, 4 }
 0x3c0   :  { %v788_v56 = vadd.f32 %v787_v11, %v786_v15  ;;  %v927_v34 = vadd.f32 %v926_v33, %v925_v63  ;;  %v1554_v15 = vmul.f32 1.442695, %v1553_v18 }
 0x3c2   :  { %v789_v22 = vrot.slane %v788_v56, 1  ;;  %v928_v55 = vrot.slane %v927_v34, 2  ;;  %2818 = vpow2.f32 %v1554_v15 }
 0x3c4   :  { %v790_v10 = vadd.f32 %v789_v22, %v788_v56  ;;  %v929_v50 = vadd.f32 %v928_v55, %v927_v34 }
 0x3c5   :  { %v1056_v60 = vpop.permute.xlu0 %1055 }
 0x3c6   :  { %v792_v51 = vsel %vm791_vm7, %v790_v10, %v655_v29  ;;  %v930_v45 = vrot.slane %v929_v50, 1  ;;  %v1063_v39 = vmul.f32 %v1061_v3, %v1056_v60 }
 0x3c8   :  { %v931_v35 = vadd.f32 %v930_v45, %v929_v50  ;;  %v1065_v13 = vadd.f32 %v1063_v39, %v1047_v57  ;;  %v1204_v48 = vpop.permute.xlu1 %1203 }
 0x3c9   :  { %v1215_v9 = vmul.f32 %v1214_v44, %v1204_v48 }
 0x3ca   :  { %v1077_v19 = vmul.f32 %v1074_v54, %v1065_v13  ;;  %v1200_v36 = vmul.f32 %v1198_v43, %v1065_v13  ;;  %v933_v20 = vsel %vm932_vm8, %v931_v35, %v792_v51 }
 0x3cb   :  { %v1217_v52 = vadd.f32 %v1215_v9, %v1199_v62  ;;  %v1520_v62 = vrot.slane %v3113_v16, %v1503_v4 }
 0x3cc   :  { %v1078_v26 = vadd.f32 %v1077_v19, %v1076_v40 }
 0x3cd   :  { %v1352_v21 = vmul.f32 %v1351_v25, %v1217_v52  ;;  %v1229_v6 = vmul.f32 %v3647_v12, %v1217_v52 }
 0x3ce   :  { %v1079_v24 = vrot.slane %v1078_v26, 4 }
 0x3cf   :  { %v2819_v35 = vpop.eup %2818 }
 0x3d0   :  { %v1080_v47 = vadd.f32 %v1079_v24, %v1078_v26  ;;  %v1556_v41 = vadd.f32 1.0, %v2819_v35  ;;  %v2639_v35 = vld [vmem:[#allocation7 + $0x44] ss:$24 sps:$4 sm:$0xff]  }
 0x3d2   :  { %v1081_v3 = vrot.slane %v1080_v47, 2  ;;  %2820 = vrcp.f32 %v1556_v41  ;;  %v2645_v41 = vld [vmem:[#allocation7 + $0x14] ss:$24 sps:$4 sm:$0xff]  }
 0x3d4   :  { %v1082_v1 = vadd.f32 %v1081_v3, %v1080_v47 }
 0x3d6   :  { %v1083_v59 = vrot.slane %v1082_v1, 1  ;;  %v1209_v61 = vpop.permute.xlu0 %1208 }
 0x3d7   :  { %v1216_v53 = vmul.f32 %v1214_v44, %v1209_v61  ;;  %v1357_v2 = vpop.permute.xlu1 %1356  ;;  %v2409_v61 = vld [vmem:[#allocation2 + $0x6] ss:$0 sm:$0xff] }
 0x3d8   :  { %v1084_v32 = vadd.f32 %v1083_v59, %v1082_v1  ;;  %v1368_v54 = vmul.f32 %v1367_v0, %v1357_v2  ;;  %v1551_v2 = vmul.f32 %v2409_v61, %v3103_v14  ;;  %v2619_v14 = vld [vmem:[%s3770_s5 + $0x10] sm:$0xff]  }
 0x3d9   :  { %v1218_v17 = vadd.f32 %v1216_v53, %v1200_v36  ;;  %v2652_v61 = vld [vmem:[#allocation7 + $0x38] ss:$24 sps:$4 sm:$0xff]  }
 0x3da   :  { %v1370_v37 = vadd.f32 %v1368_v54, %v1352_v21  ;;  %v1086_v23 = vsel %vm1085_vm9, %v1084_v32, %v933_v20 }
 0x3db   :  { %v1230_v43 = vmul.f32 %v1227_v46, %v1218_v17  ;;  %v1353_v29 = vmul.f32 %v1351_v25, %v1218_v17 }
 0x3dc   :  { %v1505_v58 = vmul.f32 %v1504_v42, %v1370_v37  ;;  %v1382_v50 = vmul.f32 %v3649_v38, %v1370_v37 }
 0x3dd   :  { %v1231_v7 = vadd.f32 %v1230_v43, %v1229_v6  ;;  %v2621_v6 = vld [vmem:[%s3770_s5] sm:$0xff]  }
 0x3df   :  { %v1232_v57 = vrot.slane %v1231_v7, 4 }
 0x3e1   :  { %v1233_v63 = vadd.f32 %v1232_v57, %v1231_v7  ;;  %v2410_v7 = vld [vmem:[#allocation2 + $0x2] ss:$0 sm:$0xff] }
 0x3e3   :  { %v1234_v11 = vrot.slane %v1233_v63, 2  ;;  %v1510_v33 = vpop.permute.xlu1 %1509 }
 0x3e4   :  { %v1521_v56 = vmul.f32 %v1520_v62, %v1510_v33 }
 0x3e5   :  { %v1235_v34 = vadd.f32 %v1234_v11, %v1233_v63  ;;  %v1362_v49 = vpop.permute.xlu0 %1361 }
 0x3e6   :  { %v1369_v22 = vmul.f32 %v1367_v0, %v1362_v49  ;;  %v1523_v55 = vadd.f32 %v1521_v56, %v1505_v58  ;;  %v2821_v0 = vpop.eup %2820  ;;  %v2848_v56 = vld [vmem:[%s3765_s0] sm:$0xff] }
 0x3e7   :  { %v1236_v12 = vrot.slane %v1235_v34, 1  ;;  %v1558_v54 = vmul.f32 %v2821_v0, %v3072_v31  ;;  %v2618_v31 = vld [vmem:[%s3770_s5 + $0x18] sm:$0xff]   ;;  %v2657_v0 = vld [vmem:[#allocation7 + $0xc] ss:$24 sps:$4 sm:$0xff]  }
 0x3e8   :  { %v1371_v46 = vadd.f32 %v1369_v22, %v1353_v29  ;;  %v1528_v19 = vpop.permute.xlu1 %1527 }
 0x3e9   :  { %v1237_v10 = vadd.f32 %v1236_v12, %v1235_v34  ;;  %v1535_v25 = vmul.f32 %v1528_v19, %v1523_v55  ;;  %v2643_v19 = vld [vmem:[#allocation7 + $0x10] ss:$24 sps:$4 sm:$0xff]  }
 0x3ea   :  { %v1383_v60 = vmul.f32 %v3659_v27, %v1371_v46  ;;  %v1506_v51 = vmul.f32 %v1504_v42, %v1371_v46  ;;  %v2616_v42 = vld [vmem:[%s3770_s5 + $0x28] sm:$0xff]  }
 0x3eb   :  { %v1239_v45 = vsel %vm1238_vm10, %v1237_v10, %v1086_v23  ;;  %2535 = vmatpush3.bf16.msra.mxu1 %v2616_v42  ;;  %v2620_v23 = vld [vmem:[%s3770_s5 + $0x8] sm:$0xff]  }
 0x3ec   :  { %v1384_v16 = vadd.f32 %v1383_v60, %v1382_v50  ;;  %2536 = vmatprep.subr.bf16.mxu1 %v2968_v5  ;;  %v2622_v46 = vld [vmem:[#allocation7 + $0x90] ss:$24 sps:$4 sm:$0xff]   ;;  %v2624_v10 = vld [vmem:[#allocation7 + $0x94] ss:$24 sps:$4 sm:$0xff]   ;;  %v2625_v50 = vld [vmem:[#allocation7 + $0xa0] ss:$24 sps:$4 sm:$0xff]  }
 0x3ed   :  { %v2627_v60 = vld [vmem:[#allocation7 + $0xa4] ss:$24 sps:$4 sm:$0xff]   ;;  %1851 = vmatprep.subr.bf16.mxu0 %v2624_v10 }
 0x3ee   :  { %v1385_v39 = vrot.slane %v1384_v16, 4  ;;  %1852 = vmatpush1.bf16.msra.mxu0 %v2622_v46 }
 0x3ef   :  { %2537 = vmatpush3.bf16.msra.mxu1 %v2617_v30 }
 0x3f0   :  { %v1386_v44 = vadd.f32 %v1385_v39, %v1384_v16  ;;  %2538 = vmatprep.subr.bf16.mxu1 %v2968_v5  ;;  %v2628_v16 = vld [vmem:[#allocation7 + $0x60] ss:$24 sps:$4 sm:$0xff]   ;;  %v2631_v39 = vld [vmem:[#allocation7 + $0x70] ss:$24 sps:$4 sm:$0xff]  }
 0x3f1   :  { %v1515_v13 = vpop.permute.xlu0 %1514 }
 0x3f2   :  { %v1387_v48 = vrot.slane %v1386_v44, 2  ;;  %v1522_v9 = vmul.f32 %v1520_v62, %v1515_v13  ;;  %v2634_v13 = vld [vmem:[#allocation7 + $0x30] ss:$24 sps:$4 sm:$0xff]  }
 0x3f3   :  { %2539 = vmatpush3.bf16.msra.mxu1 %v2618_v31 }
 0x3f4   :  { %v1388_v40 = vadd.f32 %v1387_v48, %v1386_v44  ;;  %v1524_v36 = vadd.f32 %v1522_v9, %v1506_v51  ;;  %2540 = vmatprep.subr.bf16.mxu1 %v2968_v5  ;;  %v2630_v51 = vld [vmem:[#allocation7 + $0x64] ss:$24 sps:$4 sm:$0xff]   ;;  %v2636_v44 = vld [vmem:[#allocation7 + $0x34] ss:$24 sps:$4 sm:$0xff]   ;;  %v2637_v48 = vld [vmem:[#allocation7 + $0x40] ss:$24 sps:$4 sm:$0xff]  }
 0x3f5   :  { %1853 = vmatprep.subr.bf16.mxu0 %v2630_v51  ;;  %v2642_v9 = vld [vmem:[#allocation7 + $0x4] ss:$24 sps:$4 sm:$0xff]  }
 0x3f6   :  { %v1389_v20 = vrot.slane %v1388_v40, 1  ;;  %v1533_v52 = vpop.permute.xlu0 %1532  ;;  %1854 = vmatpush1.bf16.msra.mxu0 %v2628_v16  ;;  %v2979_v16 = vmov 2  }
 0x3f7   :  { %v1536_v26 = vmul.f32 %v1533_v52, %v1524_v36  ;;  %2541 = vmatpush3.bf16.msra.mxu1 %v2619_v14  ;;  %1855 = vmatprep.subr.bf16.mxu0 %v2636_v44  ;;  %v2648_v36 = vld [vmem:[#allocation7 + $0x9c] ss:$24 sps:$4 sm:$0xff]  }
 0x3f8   :  { %v1390_v38 = vadd.f32 %v1389_v20, %v1388_v40  ;;  %2542 = vmatprep.subr.bf16.mxu1 %v2968_v5  ;;  %v2640_v40 = vld [vmem:[#allocation7] ss:$24 sps:$4 sm:$0xff]   ;;  %2592 = vset.pattern.permute.xlu1 %v2979_v16 }
 0x3f9   :  { %v1537_v27 = vadd.f32 %v1536_v26, %v1535_v25  ;;  %v2658_v44 = vld [vmem:[#allocation9 + $0x78] sm:$0xff]  }
 0x3fa   :  { %v1392_v21 = vsel %vm1391_vm11, %v1390_v38, %v1239_v45  ;;  %v2633_v45 = vld [vmem:[#allocation7 + $0x74] ss:$24 sps:$4 sm:$0xff]   ;;  %1856 = vmatpush1.bf16.msra.mxu0 %v2634_v13  ;;  %v2419_v38 = vld [vmem:[#allocation2 + $0x1] ss:$0 sm:$0xff] }
 0x3fb   :  { %v1538_v24 = vrot.slane %v1537_v27, 4  ;;  %2543 = vmatpush3.bf16.msra.mxu1 %v2620_v23  ;;  %1857 = vmatprep.subr.bf16.mxu0 %v2642_v9 }
 0x3fc   :  { %2544 = vmatprep.subr.bf16.mxu1 %v2968_v5 }
 0x3fd   :  { %v1539_v47 = vadd.f32 %v1538_v24, %v1537_v27  ;;  %v2646_v24 = vld [vmem:[#allocation7 + $0x98] ss:$24 sps:$4 sm:$0xff]  }
 0x3fe   :  { %1858 = vmatpush1.bf16.msra.mxu0 %v2640_v40 }
 0x3ff   :  { %v1540_v3 = vrot.slane %v1539_v47, 2  ;;  %2545 = vmatpush3.bf16.msra.mxu1 %v2621_v6  ;;  %1892 = vmatprep.subr.bf16.mxu0 %v2648_v36  ;;  %v2663_v36 = vld [vmem:[#allocation9 + $0x28] sm:$0xff]  }
 0x400   :  { %1933 = vmatprep.subr.bf16.mxu1 %v2627_v60 }
 0x401   :  { %v1541_v1 = vadd.f32 %v1540_v3, %v1539_v47  ;;  %v2651_v3 = vld [vmem:[#allocation7 + $0x6c] ss:$24 sps:$4 sm:$0xff]  }
 0x403   :  { %v1542_v59 = vrot.slane %v1541_v1, 1 }
 0x405   :  { %v1543_v53 = vadd.f32 %v1542_v59, %v1541_v1  ;;  %v2649_v1 = vld [vmem:[#allocation7 + $0x68] ss:$24 sps:$4 sm:$0xff]   ;;  %v2654_v59 = vld [vmem:[#allocation7 + $0x3c] ss:$24 sps:$4 sm:$0xff]  }
 0x407   :  { %v1545_v32 = vsel %vm1544_vm12, %v1543_v53, %v1392_v21  ;;  %v2655_v53 = vld [vmem:[#allocation7 + $0x8] ss:$24 sps:$4 sm:$0xff]  }
 0x408   :  { %v1552_v4 = vadd.f32 %v1551_v2, %v1545_v32 }
 0x40a   :  { %v1559_v17 = vmul.f32 %v1558_v54, %v1552_v4 }
 0x40c   :  { %v1560_v37 = vmul.f32 %v1559_v17, %v1559_v17 }
 0x40e   :  { %1561 = vadd.xlane.f32.xlu1 %v1560_v37 }
 0x497   :  { %v1562_v43 = vpop.xlane.xlu1 %1561 }
 0x498   :  { %v1564_v29 = vmul.f32 0.0078125, %v1562_v43 }
 0x49a   :  { %v1565_v18 = vadd.f32 1e-06, %v1564_v29  ;;  %v3731_v29 = vand.u32 127, %v349_v28 }
 0x49c   :  { %2822 = vrsqrt.f32 %v1565_v18  ;;  %v1968_v18 = vcvt.s32.f32 %v3731_v29  ;;  %vm2032_vm5 = vcmp.ge.s32.totalorder %v3731_v29, 64  ;;  %vm2015_vm6 = vcmp.lt.s32.totalorder %v3731_v29, 64 }
 0x4a9   :  { %v2823_v58 = vpop.eup %2822 }
 0x4aa   :  { %v1567_v57 = vmul.f32 %v2823_v58, %v1559_v17 }
 0x4ac   :  { %v1573_v15 = vmul.f32 %v2410_v7, %v1567_v57 }
 0x4ae   :  { %v1574_v63 = vpack.c.bf16 %v1573_v15, %v1573_v15 }
 0x4b0   :  { %2547 = vmatmul.mubr.bf16.vlgmr.msra.gmra.mxu1 %v1574_v63 }
 0x4b1   :  { %1957 = vmatprep.mubr.bf16.mxu1 %v2969_v8  ;;  %1934 = vmatpush1.bf16.msra.mxu1 %v2625_v50 }
 0x4b2   :  { %1935 = vmatprep.subr.bf16.mxu1 %v2633_v45 }
 0x4b5   :  { %1936 = vmatpush1.bf16.msra.mxu1 %v2631_v39  ;;  %v2980_v39 = vmov 3  }
 0x4b6   :  { %1937 = vmatprep.subr.bf16.mxu1 %v2639_v35  ;;  %2593 = vset.pattern.permute.xlu0 %v2980_v39  ;;  %v2659_v35 = vld [vmem:[#allocation9 + $0x38] sm:$0xff]  }
 0x4b9   :  { %1938 = vmatpush1.bf16.msra.mxu1 %v2637_v48  ;;  %v2660_v48 = vld [vmem:[#allocation9 + $0x70] sm:$0xff]  }
 0x4ba   :  { %1939 = vmatprep.subr.bf16.mxu1 %v2645_v41  ;;  %v2661_v41 = vld [vmem:[#allocation9 + $0x30] sm:$0xff]  }
 0x4bd   :  { %1940 = vmatpush1.bf16.msra.mxu1 %v2643_v19  ;;  %v2662_v19 = vld [vmem:[#allocation9 + $0x68] sm:$0xff]  }
 0x4be   :  { %2550 = vmatprep.subr.bf16.mxu1 %v2968_v5 }
 0x570   :  { %v1673_v62 = vpop.f32.mrf.mxu1 }
 0x571   :  { %v1679_v11 = vmul.f32 0.5, %v1673_v62 }
 0x572   :  { %v2548_v33 = vpop.f32.mrf.mxu1 }
 0x573   :  { %v3708_v34 = vadd.f32 %v2848_v56, %v1679_v11 }
 0x574   :  { %v1676_v49 = vpop.f32.mrf.mxu1 }
 0x575   :  { %v1681_v22 = vmul.f32 %v3708_v34, %v3708_v34 }
 0x576   :  { %v2549_v55 = vpop.f32.mrf.mxu1 }
 0x577   :  { %v1682_v12 = vsel %vm100_vm0, %v1681_v22, 0.0 }
 0x578   :  { %1683 = vadd.xlane.f32.xlu0 %v1682_v12 }
 0x601   :  { %v1684_v20 = vpop.xlane.xlu0 %1683 }
 0x602   :  { %v1685_v52 = vmul.f32 0.015625, %v1684_v20  ;;  %v2664_v20 = vld [vmem:[#allocation9 + $0x98] sm:$0xff]  }
 0x604   :  { %v1686_v25 = vadd.f32 1e-06, %v1685_v52  ;;  %v2665_v52 = vld [vmem:[#allocation9 + $0x60] sm:$0xff]  }
 0x606   :  { %2824 = vrsqrt.f32 %v1686_v25  ;;  %v2666_v25 = vld [vmem:[#allocation9 + $0x20] sm:$0xff]  }
 0x613   :  { %v2825_v26 = vpop.eup %2824 }
 0x614   :  { %v1688_v27 = vmul.f32 %v2825_v26, %v3708_v34  ;;  %v2667_v26 = vld [vmem:[#allocation9 + $0x90] sm:$0xff]  }
 0x616   :  { %v1694_v21 = vmul.f32 %v2419_v38, %v1688_v27  ;;  %v2668_v38 = vld [vmem:[#allocation9 + $0x58] sm:$0xff]  }
 0x617   :  { %v2669_v27 = vld [vmem:[#allocation9 + $0x18] sm:$0xff]  }
 0x618   :  { %v1695_v47 = vpack.c.bf16 %v1694_v21, %v1694_v21  ;;  %v2670_v21 = vld [vmem:[#allocation9 + $0x88] sm:$0xff]  }
 0x61a   :  { %2444 = vmatmul.mubr.msk.bf16.vlgmr.msra.gmra.mxu0 %vm100_vm0, %v1695_v47  ;;  %2446 = vmatmul.mubr.msk.bf16.vlgmr.msra.gmra.mxu1 %vm100_vm0, %v1695_v47 }
 0x61b   :  { %1893 = vmatpush1.bf16.msra.mxu0 %v2646_v24  ;;  %1916 = vmatprep.mubr.bf16.mxu0 %v2969_v8  ;;  %v2671_v24 = vld [vmem:[#allocation9 + $0x50] sm:$0xff]  }
 0x61c   :  { %1894 = vmatprep.subr.bf16.mxu0 %v2651_v3  ;;  %2558 = vmatprep.mubr.msk.bf16.mxu1 %vm2970_vm1, %v2968_v5  ;;  %v2672_v3 = vld [vmem:[#allocation9 + $0x10] sm:$0xff]  }
 0x61d   :  { %2551 = vmatpush3.bf16.msra.mxu1 %v2664_v20 }
 0x61e   :  { %2552 = vmatprep.subr.bf16.mxu1 %v2968_v5 }
 0x61f   :  { %1895 = vmatpush1.bf16.msra.mxu0 %v2649_v1  ;;  %v2674_v1 = vld [vmem:[#allocation9 + $0x48] sm:$0xff]  }
 0x620   :  { %1896 = vmatprep.subr.bf16.mxu0 %v2654_v59  ;;  %v2675_v59 = vld [vmem:[#allocation9 + $0x8] sm:$0xff]  }
 0x621   :  { %2553 = vmatpush3.bf16.msra.mxu1 %v2667_v26 }
 0x622   :  { %2554 = vmatprep.subr.bf16.mxu1 %v2968_v5 }
 0x623   :  { %1897 = vmatpush1.bf16.msra.mxu0 %v2652_v61  ;;  %v2676_v61 = vld [vmem:[#allocation9 + $0x40] sm:$0xff]  }
 0x624   :  { %1898 = vmatprep.subr.bf16.mxu0 %v2657_v0  ;;  %v2677_v0 = vld [vmem:[#allocation9] sm:$0xff]  }
 0x625   :  { %2555 = vmatpush3.bf16.msra.mxu1 %v2670_v21 }
 0x626   :  { %2556 = vmatprep.subr.bf16.mxu1 %v2968_v5 }
 0x627   :  { %1899 = vmatpush1.bf16.msra.mxu0 %v2655_v53 }
 0x628   :  { %2485 = vmatprep.subr.bf16.mxu0 %v2658_v44 }
 0x62a   :  { %2445 = vmatmul.mubr.msk.bf16.vlgmr.msra.gmra.mxu0 %vm100_vm0, %v1695_v47  ;;  %v2981_v47 = vmov 1  }
 0x62b   :  { %2486 = vmatpush3.bf16.msra.mxu0 %v2659_v35 }
 0x62c   :  { %2487 = vmatprep.subr.bf16.mxu0 %v2660_v48 }
 0x62f   :  { %2488 = vmatpush3.bf16.msra.mxu0 %v2661_v41 }
 0x630   :  { %2489 = vmatprep.subr.bf16.mxu0 %v2662_v19 }
 0x633   :  { %2490 = vmatpush3.bf16.msra.mxu0 %v2663_v36 }
 0x634   :  { %2491 = vmatprep.subr.bf16.mxu0 %v2665_v52 }
 0x637   :  { %2492 = vmatpush3.bf16.msra.mxu0 %v2666_v25 }
 0x638   :  { %2493 = vmatprep.subr.bf16.mxu0 %v2668_v38 }
 0x63b   :  { %2494 = vmatpush3.bf16.msra.mxu0 %v2669_v27 }
 0x63c   :  { %2495 = vmatprep.subr.bf16.mxu0 %v2671_v24 }
 0x63f   :  { %2496 = vmatpush3.bf16.msra.mxu0 %v2672_v3 }
 0x640   :  { %2497 = vmatprep.subr.bf16.mxu0 %v2674_v1 }
 0x643   :  { %2498 = vmatpush3.bf16.msra.mxu0 %v2675_v59 }
 0x644   :  { %2499 = vmatprep.subr.bf16.mxu0 %v2676_v61 }
 0x647   :  { %2500 = vmatpush3.bf16.msra.mxu0 %v2677_v0 }
 0x6da   :  { %v3721_v2 = vpop.f32.mrf.mxu0  ;;  %v3723_v32 = vpop.f32.mrf.mxu1 }
 0x6dc   :  { %v3725_v54 = vpop.f32.mrf.mxu0  ;;  %v1961_v4 = vpop.f32.mrf.mxu1 }
 0x6dd   :  { %v1970_v17 = vsel %vm1969_vm13, %v1961_v4, -inf  ;;  %v2090_v5 = vsub.f32 0.0, %v3725_v54 }
 0x6de   :  { %v1881_v37 = vpop.f32.mrf.mxu0  ;;  %1971 = vmax.xlane.f32.xlu0 %v1970_v17  ;;  %v1963_v42 = vpop.f32.mrf.mxu1  ;;  %v2089_v17 = vsub.f32 0.0, %v3721_v2 }
 0x6df   :  { %v2094_v37 = vmul.f32 1.442695, %v2090_v5 }
 0x6e0   :  { %v1882_v30 = vpop.f32.mrf.mxu0  ;;  %v1964_v31 = vpop.f32.mrf.mxu1 }
 0x6ea   :  { %v3728_v14 = vpop.f32.mrf.mxu0 }
 0x6eb   :  { %v2091_v53 = vsub.f32 0.0, %v3728_v14 }
 0x6ec   :  { %v1920_v23 = vpop.f32.mrf.mxu0 }
 0x6ee   :  { %v1922_v6 = vpop.f32.mrf.mxu0 }
 0x6f0   :  { %v1923_v43 = vpop.f32.mrf.mxu0 }
 0x767   :  { %v1972_v58 = vpop.xlane.xlu0 %1971 }
 0x768   :  { %vm1973_vm14 = vcmp.ge.f32.partialorder %v1961_v4, %v1972_v58  ;;  %v1979_v56 = vsub.f32 %v1972_v58, %v1972_v58 }
 0x769   :  { %v1974_v7 = vsel %vm1973_vm14, %v1968_v18, 4.0 }
 0x76a   :  { %v1975_v57 = vsel %vm1969_vm13, %v1974_v7, inf  ;;  %v1980_v22 = vmul.f32 1.442695, %v1979_v56 }
 0x76b   :  { %1976 = vmin.xlane.f32.xlu1 %v1975_v57  ;;  %v2004_v57 = vadd.s32 128, %v3731_v29 }
 0x76c   :  { %2826 = vpow2.f32 %v1980_v22 }
 0x76d   :  { %vm2071_vm3 = vcmp.ge.s32.totalorder %v2004_v57, 192  ;;  %vm2055_vm4 = vcmp.lt.s32.totalorder %v2004_v57, 192 }
 0x779   :  { %v2827_v12 = vpop.eup %2826 }
 0x7f4   :  { %v1977_v15 = vpop.xlane.xlu1 %1976 }
 0x7f5   :  { %vm1978_vm15 = vcmp.eq.f32.partialorder %v1968_v18, %v1977_v15 }
 0x7f6   :  { %v1984_v63 = vsel %vm1978_vm15, -1e+30, %v1961_v4  ;;  %v1982_v50 = vsel %vm1978_vm15, %v2827_v12, 0.0  ;;  %v2096_v4 = vmul.f32 1.442695, %v2091_v53 }
 0x7f7   :  { %v1985_v62 = vsel %vm1969_vm13, %v1984_v63, -inf }
 0x7f8   :  { %1986 = vmax.xlane.f32.xlu0 %v1985_v62 }
 0x881   :  { %v1987_v11 = vpop.xlane.xlu0 %1986 }
 0x882   :  { %vm1988_vm1 = vcmp.ge.f32.partialorder %v1984_v63, %v1987_v11  ;;  %v1994_v49 = vsub.f32 %v1987_v11, %v1972_v58 }
 0x883   :  { %v1989_v33 = vsel %vm1988_vm1, %v1968_v18, 4.0 }
 0x884   :  { %v1990_v28 = vsel %vm1969_vm13, %v1989_v33, inf  ;;  %v1995_v55 = vmul.f32 1.442695, %v1994_v49 }
 0x885   :  { %1991 = vmin.xlane.f32.xlu1 %v1990_v28 }
 0x886   :  { %2828 = vpow2.f32 %v1995_v55 }
 0x893   :  { %v2829_v10 = vpop.eup %2828 }
 0x90e   :  { %v1992_v46 = vpop.xlane.xlu1 %1991 }
 0x90f   :  { %vm1993_vm2 = vcmp.eq.f32.partialorder %v1968_v18, %v1992_v46 }
 0x910   :  { %v1997_v60 = vsel %vm1993_vm2, %v2829_v10, 0.0 }
 0x911   :  { %v1998_v51 = vadd.f32 %v1997_v60, %v1982_v50 }
 0x913   :  { %v1999_v45 = vsel %vm1969_vm13, %v1998_v51, 0.0 }
 0x914   :  { %2000 = vadd.xlane.f32.xlu0 %v1999_v45 }
 0x99d   :  { %v2001_v13 = vpop.xlane.xlu0 %2000 }
 0x99e   :  { %2830 = vrcp.f32 %v2001_v13 }
 0x99f   :  { %2832 = vpow2.f32 %v2096_v4 }
 0x9a0   :  { %2834 = vpow2.f32 %v2094_v37 }
 0x9ab   :  { %v2831_v9 = vpop.eup %2830 }
 0x9ac   :  { %v2003_v40 = vmul.f32 %v2831_v9, %v1998_v51  ;;  %v2833_v42 = vpop.eup %2832 }
 0x9ad   :  { %v2835_v30 = vpop.eup %2834  ;;  %v2100_v31 = vadd.f32 1.0, %v2833_v42 }
 0x9ae   :  { %2080 = vperm.xlu0 %2593, %v2003_v40   ;;  %2061 = vperm.xlu1 %2592, %v2003_v40  }
 0x9b2   :  { %2112 = vrot.lane.b32.xlu1 %v1920_v23, %s2965_s27  ;;  %v2099_v23 = vadd.f32 1.0, %v2835_v30 }
 0x9b3   :  { %2594 = vset.pattern.permute.xlu1 %v2969_v8  ;;  %v2673_v8 = vld [vmem:[#allocation9 + $0x80] sm:$0xff]  }
 0x9b4   :  { %2557 = vmatpush3.bf16.msra.mxu1 %v2673_v8 }
 0x9b6   :  { %2023 = vperm.xlu1 %2594, %v2003_v40  }
 0x9ba   :  { %2595 = vset.pattern.permute.xlu1 %v2981_v47 }
 0x9bb   :  { %2042 = vperm.xlu1 %2595, %v2003_v40  }
 0x9bf   :  { %2114 = vrot.lane.b32.xlu1 %v3723_v32, %s2965_s27  ;;  %v2092_v32 = vmul.f32 1.442695, %v2089_v17 }
 0x9c1   :  { %2836 = vpow2.f32 %v2092_v32 }
 0x9c2   :  { %2838 = vrcp.f32 %v2100_v31 }
 0x9c3   :  { %2110 = vrot.lane.b32.xlu1 %v3728_v14, %s2965_s27  ;;  %2840 = vrcp.f32 %v2099_v23 }
 0x9ce   :  { %v2837_v6 = vpop.eup %2836 }
 0x9cf   :  { %v2098_v18 = vadd.f32 1.0, %v2837_v6  ;;  %v2839_v15 = vpop.eup %2838 }
 0x9d0   :  { %v2841_v11 = vpop.eup %2840  ;;  %v2106_v33 = vmul.f32 %v2839_v15, %v3728_v14 }
 0x9d1   :  { %2842 = vrcp.f32 %v2098_v18  ;;  %v2104_v49 = vmul.f32 %v2841_v11, %v3725_v54 }
 0x9de   :  { %v2843_v55 = vpop.eup %2842 }
 0x9df   :  { %v2102_v45 = vmul.f32 %v2843_v55, %v3721_v2 }
 0xa29   :  { %v2062_v43 = vpop.permute.xlu1 %2061  ;;  %v2081_v63 = vpop.permute.xlu0 %2080 }
 0xa2a   :  { %v2084_v28 = vsel %vm2071_vm3, %v2081_v63, 0.0  ;;  %v2065_v56 = vsel %vm2055_vm4, %v2062_v43, 0.0 }
 0xa2b   :  { %v2087_v10 = vadd.f32 %v2084_v28, %v2065_v56 }
 0xa2d   :  { %v2113_v58 = vpop.permute.xlu1 %2112 }
 0xa31   :  { %v2024_v7 = vpop.permute.xlu1 %2023 }
 0xa32   :  { %v2026_v39 = vsel %vm2015_vm6, %v2024_v7, 0.0 }
 0xa36   :  { %v2043_v62 = vpop.permute.xlu1 %2042 }
 0xa37   :  { %v2045_v60 = vsel %vm2032_vm5, %v2043_v62, 0.0 }
 0xa38   :  { %v2048_v44 = vadd.f32 %v2045_v60, %v2026_v39 }
 0xa3a   :  { %v2115_v22 = vpop.permute.xlu1 %2114 }
 0xa3b   :  { %v2117_v12 = vsel %vm100_vm0, %v2113_v58, %v2115_v22  ;;  %v2123_v46 = vmul.f32 %v2115_v22, %v2106_v33 }
 0xa3c   :  { %v2122_v50 = vmul.f32 %v2117_v12, %v2104_v49 }
 0xa3d   :  { %v2129_v51 = vpack.c.bf16 %v2123_v46, %v2123_v46 }
 0xa3e   :  { %v2111_v14 = vpop.permute.xlu1 %2110  ;;  %v2125_v16 = vmul.f32 %v2122_v50, %v2087_v10 }
 0xa3f   :  { %v2116_v54 = vsel %vm100_vm0, %v2111_v14, %v2113_v58  ;;  %2559 = vmatmul.mubr.msk.bf16.vlgmr.msra.gmra.mxu1 %vm100_vm0, %v2129_v51 }
 0xa40   :  { %v2121_v35 = vmul.f32 %v2116_v54, %v2102_v45  ;;  %v2128_v13 = vpack.c.bf16 %v2125_v16, %v2125_v16 }
 0xa42   :  { %v2124_v48 = vmul.f32 %v2121_v35, %v2048_v44  ;;  %2325 = vmatprep.mubr.bf16.mxu0 %v2128_v13 }
 0xa44   :  { %v2127_v9 = vpack.c.bf16 %v2124_v48, %v2124_v48 }
 0xa46   :  { %2326 = vmatmul.mubr.bf16.vlgmr.msra.gmra.mxu0 %v2127_v9 }
 0xaff   :  { %v2367_v29 = vpop.f32.mrf.mxu1 }
 0xb01   :  { %v2560_v41 = vpop.f32.mrf.mxu1 }
 0xb03   :  { %v2370_v40 = vpop.f32.mrf.mxu1 }
 0xb05   :  { %v2561_v19 = vpop.f32.mrf.mxu1 }
 0xb06   :  { %v2501_v36 = vpop.f32.mrf.mxu0 }
 0xb08   :  { %v2502_v2 = vpop.f32.mrf.mxu0 }
 0xb09   :  { %v2503_v20 = vadd.f32 %v2502_v2, %v2501_v36 }
 0xb0a   :  { %v2504_v52 = vpop.f32.mrf.mxu0 }
 0xb0b   :  { %v2368_v25 = vadd.f32 %v2503_v20, %v2367_v29 }
 0xb0c   :  { %v2505_v26 = vpop.f32.mrf.mxu0 }
 0xb0d   :  { %v2373_v38 = vmul.f32 0.5, %v2368_v25 }
 0xb0f   :  { %v2374_v27 = vadd.f32 %v2373_v38, %v3708_v34 }
 0xb11   :  { %2375 = vst [vmem:[%s3773_s8] sm:$0xff] %v2374_v27 }
 0xb12   :  { %2380 = vsyncpa [#allocation3], 1 }
 0xb13   :  { %2381 = vsyncpa [#allocation5], 1 }
 0xb14   :  { %2382 = vsyncpa [#allocation8], 1 }

</bundles_post_ra>
